<compile_context>
chip_gen: v7x
topology: tpu7x:2x2x1
jax: 0.10.0
libtpu: 0.0.40
codegen_flags: <defaults>
</compile_context>

<pallas_src>
import functools

import jax
import jax.numpy as jnp
from jax.experimental import pallas as pl
from jax.experimental.pallas import tpu as pltpu


# ------------------------------ small helpers -------------------------------

def _pick_tile(dim, cap, step=8):
    """Largest multiple of `step` that is <= cap and divides dim; falls back to the
    full dim (single tile) only if no such divisor exists."""
    if dim <= cap:
        return dim
    t = (cap // step) * step
    while t >= step:
        if dim % t == 0:
            return t
        t -= step
    return dim


def _mosaic_params(dim_sem, block_bytes):
    """CompilerParams with an explicit scoped-VMEM budget: double-buffered blocks
    plus margin, clamped to [32 MiB, 64 MiB] so the value is valid on v5e/v6e
    (128 MiB physical) and v7x (64 MiB physical)."""
    limit = 2 * int(block_bytes) + 8 * 1024 * 1024
    limit = max(32 * 1024 * 1024, min(limit, 64 * 1024 * 1024))
    return pltpu.CompilerParams(dimension_semantics=dim_sem,
                                vmem_limit_bytes=limit)


# ------------------------------ Pallas kernels -------------------------------

def _bmm_bn_stats_kernel(a_ref, b_ref, o_ref, sum_ref, sq_ref):
    # a: (tm, K) bf16, b: (K, tn) bf16 -> y (tm, tn) bf16 + f32 partial column stats.
    acc = jnp.dot(a_ref[...], b_ref[...], preferred_element_type=jnp.float32)
    o_ref[...] = acc.astype(o_ref.dtype)
    sum_ref[...] = jnp.sum(acc, axis=0, keepdims=True)
    sq_ref[...] = jnp.sum(acc * acc, axis=0, keepdims=True)


def pallas_bmm_bn_stats(a, b, *, tm_cap=512, tn_cap=512):
    """Batched matmul with fused per-column partial BatchNorm statistics.

    a: (P, M, K) bf16, b: (P, K, N) bf16 ->
      y (P, M, N) bf16, col_sum (P, MT, 1, N) f32, col_sumsq (P, MT, 1, N) f32.
    Full-K blocks (K is small for every generator layer); partial stats per
    (phase, M-tile) are summed by the caller (tiny)."""
    P, M, K = a.shape
    _, _, N = b.shape
    tm = _pick_tile(M, tm_cap, 8)
    tn = _pick_tile(N, tn_cap, 128)
    mt, nt = M // tm, N // tn
    blk_bytes = tm * K * 2 + K * tn * 2 + tm * tn * 2 + 2 * tn * 4
    return pl.pallas_call(
        _bmm_bn_stats_kernel,
        out_shape=(jax.ShapeDtypeStruct((P, M, N), jnp.bfloat16),
                   jax.ShapeDtypeStruct((P, mt, 1, N), jnp.float32),
                   jax.ShapeDtypeStruct((P, mt, 1, N), jnp.float32)),
        grid=(P, mt, nt),
        in_specs=[pl.BlockSpec((None, tm, K), lambda p, i, j: (p, i, 0)),
                  pl.BlockSpec((None, K, tn), lambda p, i, j: (p, 0, j))],
        out_specs=(pl.BlockSpec((None, tm, tn), lambda p, i, j: (p, i, j)),
                   pl.BlockSpec((None, None, 1, tn), lambda p, i, j: (p, i, 0, j)),
                   pl.BlockSpec((None, None, 1, tn), lambda p, i, j: (p, i, 0, j))),
        compiler_params=_mosaic_params(("parallel", "parallel", "parallel"),
                                       blk_bytes),
    )(a, b)


def _bmm_bias_tanh_t_kernel(w_ref, p_ref, bias_ref, o_ref):
    # w: (Cout, K) bf16, p: (K, tm) bf16, bias: (Cout, 1) f32 -> o: (Cout, tm) f32.
    acc = jnp.dot(w_ref[...], p_ref[...], preferred_element_type=jnp.float32)
    o_ref[...] = jnp.tanh(acc + bias_ref[...])


def pallas_bmm_bias_tanh_t(w_t, p_t, bias_col, *, tm_cap=2048):
    """Transposed final-layer GEMM with fused bias + tanh epilogue.

    w_t: (P, Cout, K) bf16, p_t: (P, K, M) bf16, bias_col: (Cout, 1) f32
      -> (P, Cout, M) f32.  The large spatial dim M is the lane dim, so stores are
    lane-dense even though Cout == channels_img == 3."""
    P, cout, K = w_t.shape
    _, _, M = p_t.shape
    tm = _pick_tile(M, tm_cap, 128)
    blk_bytes = cout * K * 2 + K * tm * 2 + cout * tm * 4 + cout * 4
    return pl.pallas_call(
        _bmm_bias_tanh_t_kernel,
        out_shape=jax.ShapeDtypeStruct((P, cout, M), jnp.float32),
        grid=(P, M // tm),
        in_specs=[pl.BlockSpec((None, cout, K), lambda p, i: (p, 0, 0)),
                  pl.BlockSpec((None, K, tm), lambda p, i: (p, 0, i)),
                  pl.BlockSpec((cout, 1), lambda p, i: (0, 0))],
        out_specs=pl.BlockSpec((None, cout, tm), lambda p, i: (p, 0, i)),
        compiler_params=_mosaic_params(("parallel", "parallel"), blk_bytes),
    )(w_t, p_t, bias_col)


def _scale_relu_kernel(x_ref, s_ref, b_ref, o_ref):
    y = x_ref[...].astype(jnp.float32) * s_ref[...] + b_ref[...]
    o_ref[...] = jnp.maximum(y, 0.0).astype(o_ref.dtype)


def pallas_scale_relu(x, scale, shift, *, tr_cap=1024, out_dtype=jnp.bfloat16):
    """y = relu(x * scale + shift) on a lane-dense (R, C) slab; writes bf16 so the
    result feeds the next layer's MXU operand directly."""
    R, C = x.shape
    tr = _pick_tile(R, tr_cap, 8)
    blk_bytes = 2 * tr * C * 2 + 2 * C * 4
    return pl.pallas_call(
        _scale_relu_kernel,
        out_shape=jax.ShapeDtypeStruct((R, C), out_dtype),
        grid=(R // tr,),
        in_specs=[pl.BlockSpec((tr, C), lambda i: (i, 0)),
                  pl.BlockSpec((1, C), lambda i: (0, 0)),
                  pl.BlockSpec((1, C), lambda i: (0, 0))],
        out_specs=pl.BlockSpec((tr, C), lambda i: (i, 0)),
        compiler_params=_mosaic_params(("parallel",), blk_bytes),
    )(x, scale, shift)


def _l0_fused_kernel(a_ref, w_ref, g_ref, b_ref, o_ref, *, c0, eps):
    # a: (N, Cin) bf16, w: (Cin, 16*c0) bf16 (columns ordered (ky, kx, c)),
    # g/b: (1, c0) f32.  Fused ConvT(k=4, s=1, p=0 on a 1x1 input) + BatchNorm + ReLU.
    y = jnp.dot(a_ref[...], w_ref[...], preferred_element_type=jnp.float32)
    m = y.shape[0]
    ssum = jnp.zeros((1, c0), jnp.float32)
    ssq = jnp.zeros((1, c0), jnp.float32)
    for s in range(16):                              # static, lane-aligned slices
        blk = y[:, s * c0:(s + 1) * c0]
        ssum = ssum + jnp.sum(blk, axis=0, keepdims=True)
        ssq = ssq + jnp.sum(blk * blk, axis=0, keepdims=True)
    count = jnp.float32(16 * m)
    mean = ssum / count
    var = jnp.maximum(ssq / count - mean * mean, 0.0)
    scale = g_ref[...] * jax.lax.rsqrt(var + eps)
    shift = b_ref[...] - mean * scale
    for s in range(16):
        blk = y[:, s * c0:(s + 1) * c0]
        o_ref[:, s * c0:(s + 1) * c0] = jnp.maximum(blk * scale + shift,
                                                    0.0).astype(o_ref.dtype)


def pallas_l0_convt_bn_relu(a, w_mat, gamma, beta, *, eps):
    """Single fused kernel for layer 0 (tiny M=batch, K=channels_noise)."""
    m = a.shape[0]
    n_cols = w_mat.shape[1]
    c0 = gamma.shape[1]
    return pl.pallas_call(
        functools.partial(_l0_fused_kernel, c0=c0, eps=eps),
        out_shape=jax.ShapeDtypeStruct((m, n_cols), jnp.bfloat16),
        compiler_params=pltpu.CompilerParams(vmem_limit_bytes=32 * 1024 * 1024),
    )(a, w_mat, gamma, beta)


# ----------------------- ConvTranspose2d lowering glue ----------------------

def _phase_weights(w_ct):
    """ConvTranspose2d weight (Cin, Cout, 4, 4) [k=4, s=2, p=1] -> sub-pixel phase
    GEMM weights (4, 4*Cin, Cout); rows ordered (dy, dx, cin), phase = py*2 + px."""
    cin, cout = w_ct.shape[0], w_ct.shape[1]
    phases = []
    for py in (0, 1):
        for px in (0, 1):
            taps = [w_ct[:, :, 3 - py - 2 * dy, 3 - px - 2 * dx]
                    for dy in (0, 1) for dx in (0, 1)]
            phases.append(jnp.stack(taps, axis=0).reshape(4 * cin, cout))
    return jnp.stack(phases, axis=0)


def _subpixel_patches(x_nhwc):
    """NHWC input -> (4, N*H*W, 4*Cin) patch operands for the 4 output phases of a
    k=4 / s=2 / p=1 transposed conv (each phase only needs a 2x2 tap window).
    TODO(synk): stays as XLA glue (no clean in-kernel shifted-window gather)."""
    n, h, w, cin = x_nhwc.shape
    xp = jnp.pad(x_nhwc, ((0, 0), (1, 1), (1, 1), (0, 0)))
    phases = []
    for py in (0, 1):
        for px in (0, 1):
            taps = [xp[:, py + dy:py + dy + h, px + dx:px + dx + w, :]
                    for dy in (0, 1) for dx in (0, 1)]
            p = jnp.stack(taps, axis=3)                       # (N, H, W, 4, Cin)
            phases.append(p.reshape(n * h * w, 4 * cin))
    return jnp.stack(phases, axis=0)


def _subpixel_patches_t(x_nhwc):
    """Like _subpixel_patches but transposed to (4, 4*Cin, N*H*W) so the final
    (Cout=3) layer's GEMM output can be lane-dense along the spatial dim."""
    n, h, w, cin = x_nhwc.shape
    xp = jnp.pad(x_nhwc, ((0, 0), (1, 1), (1, 1), (0, 0)))
    phases = []
    for py in (0, 1):
        for px in (0, 1):
            taps = [xp[:, py + dy:py + dy + h, px + dx:px + dx + w, :]
                    for dy in (0, 1) for dx in (0, 1)]
            p = jnp.stack(taps, axis=0)                       # (4, N, H, W, Cin)
            p = p.transpose(0, 4, 1, 2, 3)                    # (4, Cin, N, H, W)
            phases.append(p.reshape(4 * cin, n * h * w))
    return jnp.stack(phases, axis=0)


def _interleave_phases(y, n, h, w, c):
    """(4, N*H*W, C) phase outputs -> NHWC (N, 2H, 2W, C)."""
    y = y.reshape(2, 2, n, h, w, c)
    y = y.transpose(2, 3, 0, 4, 1, 5)                         # (N, H, py, W, px, C)
    return y.reshape(n, 2 * h, 2 * w, c)


def _phases_t_to_nchw(y, n, h, w, c):
    """(4, C, N*H*W) phase outputs -> NCHW (N, C, 2H, 2W) (boundary layout)."""
    y = y.reshape(2, 2, c, n, h, w)
    y = y.transpose(3, 2, 4, 0, 5, 1)                         # (N, C, H, py, W, px)
    return y.reshape(n, c, 2 * h, 2 * w)


def _bn_scale_shift(col_sum, col_sq, count, gamma, beta, eps):
    mean = col_sum / count
    var = jnp.maximum(col_sq / count - mean * mean, 0.0)
    scale = gamma * jax.lax.rsqrt(var + eps)
    shift = beta - mean * scale
    return scale, shift


def _fold_lane_dense(y, scale, shift):
    """Fold a (..., Cout) bf16 slab to a 128-lane-dense 2D slab (free contiguous
    reshape) and tile scale/shift to match; falls back to (rows, Cout) otherwise."""
    cout = y.shape[-1]
    total = y.size
    if cout < 128 and 128 % cout == 0 and total % 128 == 0:
        cw = 128
    else:
        cw = cout
    rep = cw // cout
    y2 = y.reshape(total // cw, cw)
    return y2, jnp.tile(scale, rep)[None], jnp.tile(shift, rep)[None]


# ------------------------------- Generator ----------------------------------

def init_generator_params(key, channels_noise, channels_img, features_g):
    fg = features_g
    layer_defs = [
        (channels_noise, fg * 16, 1, 0),   # 1x1   -> 4x4   (k=4, s=1, p=0)
        (fg * 16,        fg * 8,  2, 1),   # 4x4   -> 8x8
        (fg * 8,         fg * 4,  2, 1),   # 8x8   -> 16x16
        (fg * 4,         fg * 2,  2, 1),   # 16x16 -> 32x32
        (fg * 2,   channels_img,  2, 1),   # 32x32 -> 64x64
    ]
    params = []
    for idx, (cin, cout, s, p) in enumerate(layer_defs):
        key, kw, kg, kb = jax.random.split(key, 4)
        w = 0.02 * jax.random.normal(kw, (cin, cout, 4, 4), jnp.float32)
        layer = dict(w_ct=w, stride=s, pad=p)
        if idx == 0:
            # 1x1 input: ConvT(k=4,s=1,p=0) == (N,Cin) @ (Cin, 16*Cout), cols (ky,kx,c)
            layer["w_mat"] = (w.transpose(0, 2, 3, 1)
                              .reshape(cin, 16 * cout).astype(jnp.bfloat16))
        elif idx < 4:
            layer["w_phases"] = _phase_weights(w).astype(jnp.bfloat16)
        else:
            layer["w_phases_t"] = (_phase_weights(w).transpose(0, 2, 1)
                                   .astype(jnp.bfloat16))       # (4, Cout, 4*Cin)
        if idx < 4:
            layer["gamma"] = 1.0 + 0.1 * jax.random.normal(kg, (cout,), jnp.float32)
            layer["beta"] = 0.1 * jax.random.normal(kb, (cout,), jnp.float32)
        else:
            layer["bias"] = 0.1 * jax.random.normal(kb, (cout,), jnp.float32)
        params.append(layer)
    return params


def generator_forward(params, x_nchw, eps=1e-5):
    n = x_nchw.shape[0]

    # --- layer 0: fused ConvT(k=4,s=1,p=0 on 1x1 input) + BN + ReLU (one kernel) ---
    l0 = params[0]
    cin0 = x_nchw.shape[1]
    c0 = l0["gamma"].shape[0]
    a0 = x_nchw.reshape(n, cin0).astype(jnp.bfloat16)
    y0 = pallas_l0_convt_bn_relu(a0, l0["w_mat"], l0["gamma"][None],
                                 l0["beta"][None], eps=eps)            # (N, 16*c0) bf16
    x = y0.reshape(n, 4, 4, c0)                                        # NHWC bf16

    # --- layers 1-3: sub-pixel ConvT(k=4, s=2, p=1) + BN + ReLU --------------------
    for layer in params[1:-1]:
        h, w, cout = x.shape[1], x.shape[2], layer["gamma"].shape[0]
        patches = _subpixel_patches(x)                                 # (4, M, 4*Cin)
        m = patches.shape[1]
        y, s_, q_ = pallas_bmm_bn_stats(patches, layer["w_phases"])    # y bf16, stats f32
        scale, shift = _bn_scale_shift(s_.sum(axis=(0, 1, 2)), q_.sum(axis=(0, 1, 2)),
                                       4 * m, layer["gamma"], layer["beta"], eps)
        y2, scale_w, shift_w = _fold_lane_dense(y, scale, shift)       # 128-lane slab
        y2 = pallas_scale_relu(y2, scale_w, shift_w)
        x = _interleave_phases(y2.reshape(4, m, cout), n, h, w, cout)  # NHWC bf16
        # TODO(synk): phase interleave / next-layer patch gather remain XLA glue.

    # --- final layer: transposed sub-pixel ConvT with fused bias + tanh ------------
    last = params[-1]
    h, w, cout = x.shape[1], x.shape[2], last["bias"].shape[0]
    patches_t = _subpixel_patches_t(x)                                 # (4, 4*Cin, M)
    y = pallas_bmm_bias_tanh_t(last["w_phases_t"], patches_t,
                               last["bias"][:, None])                  # (4, Cout, M) f32
    return _phases_t_to_nchw(y, n, h, w, cout)                         # NCHW f32


# ------------------------- pure-JAX reference (f32) --------------------------

def _conv_transpose_ref(x, w_ct, stride, padding):
    k = w_ct.shape[-1]
    w = jnp.flip(w_ct, (2, 3)).transpose(1, 0, 2, 3)                   # (Cout, Cin, k, k)
    pad = k - 1 - padding
    return jax.lax.conv_general_dilated(
        x, w, window_strides=(1, 1), padding=[(pad, pad), (pad, pad)],
        lhs_dilation=(stride, stride),
        dimension_numbers=("NCHW", "OIHW", "NCHW"))


def generator_forward_ref(params, x, eps=1e-5):
    for layer in params:
        y = _conv_transpose_ref(x, layer["w_ct"], layer["stride"], layer["pad"])
        if "gamma" in layer:
            mean = jnp.mean(y, axis=(0, 2, 3), keepdims=True)
            var = jnp.mean((y - mean) ** 2, axis=(0, 2, 3), keepdims=True)
            y = (y - mean) * jax.lax.rsqrt(var + eps)
            y = y * layer["gamma"][None, :, None, None] + layer["beta"][None, :, None, None]
            x = jnp.maximum(y, 0.0)
        else:
            x = jnp.tanh(y + layer["bias"][None, :, None, None])
    return x


if __name__ == "__main__":
    channels_noise, channels_img, features_g = 16, 3, 8
    batch = 2

    key = jax.random.PRNGKey(0)
    key, kx = jax.random.split(key)
    x = jax.random.normal(kx, (batch, channels_noise, 1, 1), jnp.float32)

    params = init_generator_params(key, channels_noise, channels_img, features_g)

    fwd = jax.jit(lambda inp: generator_forward(params, inp))
    out = jax.block_until_ready(fwd(x))

    assert out.shape == (batch, channels_img, 64, 64), out.shape
    assert bool(jnp.all(jnp.isfinite(out)))
    assert bool(jnp.all(jnp.abs(out) <= 1.0))          # tanh output range

    ref = jax.block_until_ready(generator_forward_ref(params, x))
    max_err = float(jnp.max(jnp.abs(out - ref)))
    assert max_err < 0.12, f"max |pallas - ref| = {max_err}"

    print("KERNEL_OK")
</pallas_src>

<mosaic_0001>
module attributes {stable_mosaic.version = 11 : i64} {
  func.func @_l0_fused_kernel(%arg0: memref<2x16xbf16, #tpu.memory_space<vmem>>, %arg1: memref<16x2048xbf16, #tpu.memory_space<vmem>>, %arg2: memref<1x128xf32, #tpu.memory_space<vmem>>, %arg3: memref<1x128xf32, #tpu.memory_space<vmem>>, %arg4: memref<2x2048xbf16, #tpu.memory_space<vmem>>) attributes {dimension_semantics = [], scalar_prefetch = 0 : i64, scratch_operands = 0 : i64, tpu.core_type = #tpu.core_type<tc>} {
    %c0 = arith.constant 0 : index
    %c0_0 = arith.constant 0 : index
    %0 = vector.load %arg0[%c0, %c0_0] : memref<2x16xbf16, #tpu.memory_space<vmem>>, vector<2x16xbf16>
    %c0_1 = arith.constant 0 : index
    %c0_2 = arith.constant 0 : index
    %1 = vector.load %arg1[%c0_1, %c0_2] : memref<16x2048xbf16, #tpu.memory_space<vmem>>, vector<16x2048xbf16>
    %cst = arith.constant dense<0.000000e+00> : vector<2x2048xf32>
    %2 = tpu.matmul %0, %1, %cst {dimension_numbers = #tpu.dot_dimension_numbers<[1], [0], [0], [1], [0, 0, 1, 1], [], []>} : vector<2x16xbf16>, vector<16x2048xbf16>, vector<2x2048xf32> -> vector<2x2048xf32>
    %cst_3 = arith.constant 0.000000e+00 : f32
    %3 = vector.broadcast %cst_3 : f32 to vector<1x128xf32>
    %cst_4 = arith.constant 0.000000e+00 : f32
    %4 = vector.broadcast %cst_4 : f32 to vector<1x128xf32>
    %5 = vector.extract_strided_slice %2 {offsets = [0, 0], sizes = [2, 128], strides = [1, 1]} : vector<2x2048xf32> to vector<2x128xf32>
    %cst_5 = arith.constant dense<0.000000e+00> : vector<128xf32>
    %6 = vector.multi_reduction <add>, %5, %cst_5 [0] : vector<2x128xf32> to vector<128xf32>
    %7 = vector.shape_cast %6 : vector<128xf32> to vector<1x128xf32>
    %8 = arith.addf %3, %7 : vector<1x128xf32>
    %9 = arith.mulf %5, %5 : vector<2x128xf32>
    %cst_6 = arith.constant dense<0.000000e+00> : vector<128xf32>
    %10 = vector.multi_reduction <add>, %9, %cst_6 [0] : vector<2x128xf32> to vector<128xf32>
    %11 = vector.shape_cast %10 : vector<128xf32> to vector<1x128xf32>
    %12 = arith.addf %4, %11 : vector<1x128xf32>
    %13 = vector.extract_strided_slice %2 {offsets = [0, 128], sizes = [2, 128], strides = [1, 1]} : vector<2x2048xf32> to vector<2x128xf32>
    %cst_7 = arith.constant dense<0.000000e+00> : vector<128xf32>
    %14 = vector.multi_reduction <add>, %13, %cst_7 [0] : vector<2x128xf32> to vector<128xf32>
    %15 = vector.shape_cast %14 : vector<128xf32> to vector<1x128xf32>
    %16 = arith.addf %8, %15 : vector<1x128xf32>
    %17 = arith.mulf %13, %13 : vector<2x128xf32>
    %cst_8 = arith.constant dense<0.000000e+00> : vector<128xf32>
    %18 = vector.multi_reduction <add>, %17, %cst_8 [0] : vector<2x128xf32> to vector<128xf32>
    %19 = vector.shape_cast %18 : vector<128xf32> to vector<1x128xf32>
    %20 = arith.addf %12, %19 : vector<1x128xf32>
    %21 = vector.extract_strided_slice %2 {offsets = [0, 256], sizes = [2, 128], strides = [1, 1]} : vector<2x2048xf32> to vector<2x128xf32>
    %cst_9 = arith.constant dense<0.000000e+00> : vector<128xf32>
    %22 = vector.multi_reduction <add>, %21, %cst_9 [0] : vector<2x128xf32> to vector<128xf32>
    %23 = vector.shape_cast %22 : vector<128xf32> to vector<1x128xf32>
    %24 = arith.addf %16, %23 : vector<1x128xf32>
    %25 = arith.mulf %21, %21 : vector<2x128xf32>
    %cst_10 = arith.constant dense<0.000000e+00> : vector<128xf32>
    %26 = vector.multi_reduction <add>, %25, %cst_10 [0] : vector<2x128xf32> to vector<128xf32>
    %27 = vector.shape_cast %26 : vector<128xf32> to vector<1x128xf32>
    %28 = arith.addf %20, %27 : vector<1x128xf32>
    %29 = vector.extract_strided_slice %2 {offsets = [0, 384], sizes = [2, 128], strides = [1, 1]} : vector<2x2048xf32> to vector<2x128xf32>
    %cst_11 = arith.constant dense<0.000000e+00> : vector<128xf32>
    %30 = vector.multi_reduction <add>, %29, %cst_11 [0] : vector<2x128xf32> to vector<128xf32>
    %31 = vector.shape_cast %30 : vector<128xf32> to vector<1x128xf32>
    %32 = arith.addf %24, %31 : vector<1x128xf32>
    %33 = arith.mulf %29, %29 : vector<2x128xf32>
    %cst_12 = arith.constant dense<0.000000e+00> : vector<128xf32>
    %34 = vector.multi_reduction <add>, %33, %cst_12 [0] : vector<2x128xf32> to vector<128xf32>
    %35 = vector.shape_cast %34 : vector<128xf32> to vector<1x128xf32>
    %36 = arith.addf %28, %35 : vector<1x128xf32>
    %37 = vector.extract_strided_slice %2 {offsets = [0, 512], sizes = [2, 128], strides = [1, 1]} : vector<2x2048xf32> to vector<2x128xf32>
    %cst_13 = arith.constant dense<0.000000e+00> : vector<128xf32>
    %38 = vector.multi_reduction <add>, %37, %cst_13 [0] : vector<2x128xf32> to vector<128xf32>
    %39 = vector.shape_cast %38 : vector<128xf32> to vector<1x128xf32>
    %40 = arith.addf %32, %39 : vector<1x128xf32>
    %41 = arith.mulf %37, %37 : vector<2x128xf32>
    %cst_14 = arith.constant dense<0.000000e+00> : vector<128xf32>
    %42 = vector.multi_reduction <add>, %41, %cst_14 [0] : vector<2x128xf32> to vector<128xf32>
    %43 = vector.shape_cast %42 : vector<128xf32> to vector<1x128xf32>
    %44 = arith.addf %36, %43 : vector<1x128xf32>
    %45 = vector.extract_strided_slice %2 {offsets = [0, 640], sizes = [2, 128], strides = [1, 1]} : vector<2x2048xf32> to vector<2x128xf32>
    %cst_15 = arith.constant dense<0.000000e+00> : vector<128xf32>
    %46 = vector.multi_reduction <add>, %45, %cst_15 [0] : vector<2x128xf32> to vector<128xf32>
    %47 = vector.shape_cast %46 : vector<128xf32> to vector<1x128xf32>
    %48 = arith.addf %40, %47 : vector<1x128xf32>
    %49 = arith.mulf %45, %45 : vector<2x128xf32>
    %cst_16 = arith.constant dense<0.000000e+00> : vector<128xf32>
    %50 = vector.multi_reduction <add>, %49, %cst_16 [0] : vector<2x128xf32> to vector<128xf32>
    %51 = vector.shape_cast %50 : vector<128xf32> to vector<1x128xf32>
    %52 = arith.addf %44, %51 : vector<1x128xf32>
    %53 = vector.extract_strided_slice %2 {offsets = [0, 768], sizes = [2, 128], strides = [1, 1]} : vector<2x2048xf32> to vector<2x128xf32>
    %cst_17 = arith.constant dense<0.000000e+00> : vector<128xf32>
    %54 = vector.multi_reduction <add>, %53, %cst_17 [0] : vector<2x128xf32> to vector<128xf32>
    %55 = vector.shape_cast %54 : vector<128xf32> to vector<1x128xf32>
    %56 = arith.addf %48, %55 : vector<1x128xf32>
    %57 = arith.mulf %53, %53 : vector<2x128xf32>
    %cst_18 = arith.constant dense<0.000000e+00> : vector<128xf32>
    %58 = vector.multi_reduction <add>, %57, %cst_18 [0] : vector<2x128xf32> to vector<128xf32>
    %59 = vector.shape_cast %58 : vector<128xf32> to vector<1x128xf32>
    %60 = arith.addf %52, %59 : vector<1x128xf32>
    %61 = vector.extract_strided_slice %2 {offsets = [0, 896], sizes = [2, 128], strides = [1, 1]} : vector<2x2048xf32> to vector<2x128xf32>
    %cst_19 = arith.constant dense<0.000000e+00> : vector<128xf32>
    %62 = vector.multi_reduction <add>, %61, %cst_19 [0] : vector<2x128xf32> to vector<128xf32>
    %63 = vector.shape_cast %62 : vector<128xf32> to vector<1x128xf32>
    %64 = arith.addf %56, %63 : vector<1x128xf32>
    %65 = arith.mulf %61, %61 : vector<2x128xf32>
    %cst_20 = arith.constant dense<0.000000e+00> : vector<128xf32>
    %66 = vector.multi_reduction <add>, %65, %cst_20 [0] : vector<2x128xf32> to vector<128xf32>
    %67 = vector.shape_cast %66 : vector<128xf32> to vector<1x128xf32>
    %68 = arith.addf %60, %67 : vector<1x128xf32>
    %69 = vector.extract_strided_slice %2 {offsets = [0, 1024], sizes = [2, 128], strides = [1, 1]} : vector<2x2048xf32> to vector<2x128xf32>
    %cst_21 = arith.constant dense<0.000000e+00> : vector<128xf32>
    %70 = vector.multi_reduction <add>, %69, %cst_21 [0] : vector<2x128xf32> to vector<128xf32>
    %71 = vector.shape_cast %70 : vector<128xf32> to vector<1x128xf32>
    %72 = arith.addf %64, %71 : vector<1x128xf32>
    %73 = arith.mulf %69, %69 : vector<2x128xf32>
    %cst_22 = arith.constant dense<0.000000e+00> : vector<128xf32>
    %74 = vector.multi_reduction <add>, %73, %cst_22 [0] : vector<2x128xf32> to vector<128xf32>
    %75 = vector.shape_cast %74 : vector<128xf32> to vector<1x128xf32>
    %76 = arith.addf %68, %75 : vector<1x128xf32>
    %77 = vector.extract_strided_slice %2 {offsets = [0, 1152], sizes = [2, 128], strides = [1, 1]} : vector<2x2048xf32> to vector<2x128xf32>
    %cst_23 = arith.constant dense<0.000000e+00> : vector<128xf32>
    %78 = vector.multi_reduction <add>, %77, %cst_23 [0] : vector<2x128xf32> to vector<128xf32>
    %79 = vector.shape_cast %78 : vector<128xf32> to vector<1x128xf32>
    %80 = arith.addf %72, %79 : vector<1x128xf32>
    %81 = arith.mulf %77, %77 : vector<2x128xf32>
    %cst_24 = arith.constant dense<0.000000e+00> : vector<128xf32>
    %82 = vector.multi_reduction <add>, %81, %cst_24 [0] : vector<2x128xf32> to vector<128xf32>
    %83 = vector.shape_cast %82 : vector<128xf32> to vector<1x128xf32>
    %84 = arith.addf %76, %83 : vector<1x128xf32>
    %85 = vector.extract_strided_slice %2 {offsets = [0, 1280], sizes = [2, 128], strides = [1, 1]} : vector<2x2048xf32> to vector<2x128xf32>
    %cst_25 = arith.constant dense<0.000000e+00> : vector<128xf32>
    %86 = vector.multi_reduction <add>, %85, %cst_25 [0] : vector<2x128xf32> to vector<128xf32>
    %87 = vector.shape_cast %86 : vector<128xf32> to vector<1x128xf32>
    %88 = arith.addf %80, %87 : vector<1x128xf32>
    %89 = arith.mulf %85, %85 : vector<2x128xf32>
    %cst_26 = arith.constant dense<0.000000e+00> : vector<128xf32>
    %90 = vector.multi_reduction <add>, %89, %cst_26 [0] : vector<2x128xf32> to vector<128xf32>
    %91 = vector.shape_cast %90 : vector<128xf32> to vector<1x128xf32>
    %92 = arith.addf %84, %91 : vector<1x128xf32>
    %93 = vector.extract_strided_slice %2 {offsets = [0, 1408], sizes = [2, 128], strides = [1, 1]} : vector<2x2048xf32> to vector<2x128xf32>
    %cst_27 = arith.constant dense<0.000000e+00> : vector<128xf32>
    %94 = vector.multi_reduction <add>, %93, %cst_27 [0] : vector<2x128xf32> to vector<128xf32>
    %95 = vector.shape_cast %94 : vector<128xf32> to vector<1x128xf32>
    %96 = arith.addf %88, %95 : vector<1x128xf32>
    %97 = arith.mulf %93, %93 : vector<2x128xf32>
    %cst_28 = arith.constant dense<0.000000e+00> : vector<128xf32>
    %98 = vector.multi_reduction <add>, %97, %cst_28 [0] : vector<2x128xf32> to vector<128xf32>
    %99 = vector.shape_cast %98 : vector<128xf32> to vector<1x128xf32>
    %100 = arith.addf %92, %99 : vector<1x128xf32>
    %101 = vector.extract_strided_slice %2 {offsets = [0, 1536], sizes = [2, 128], strides = [1, 1]} : vector<2x2048xf32> to vector<2x128xf32>
    %cst_29 = arith.constant dense<0.000000e+00> : vector<128xf32>
    %102 = vector.multi_reduction <add>, %101, %cst_29 [0] : vector<2x128xf32> to vector<128xf32>
    %103 = vector.shape_cast %102 : vector<128xf32> to vector<1x128xf32>
    %104 = arith.addf %96, %103 : vector<1x128xf32>
    %105 = arith.mulf %101, %101 : vector<2x128xf32>
    %cst_30 = arith.constant dense<0.000000e+00> : vector<128xf32>
    %106 = vector.multi_reduction <add>, %105, %cst_30 [0] : vector<2x128xf32> to vector<128xf32>
    %107 = vector.shape_cast %106 : vector<128xf32> to vector<1x128xf32>
    %108 = arith.addf %100, %107 : vector<1x128xf32>
    %109 = vector.extract_strided_slice %2 {offsets = [0, 1664], sizes = [2, 128], strides = [1, 1]} : vector<2x2048xf32> to vector<2x128xf32>
    %cst_31 = arith.constant dense<0.000000e+00> : vector<128xf32>
    %110 = vector.multi_reduction <add>, %109, %cst_31 [0] : vector<2x128xf32> to vector<128xf32>
    %111 = vector.shape_cast %110 : vector<128xf32> to vector<1x128xf32>
    %112 = arith.addf %104, %111 : vector<1x128xf32>
    %113 = arith.mulf %109, %109 : vector<2x128xf32>
    %cst_32 = arith.constant dense<0.000000e+00> : vector<128xf32>
    %114 = vector.multi_reduction <add>, %113, %cst_32 [0] : vector<2x128xf32> to vector<128xf32>
    %115 = vector.shape_cast %114 : vector<128xf32> to vector<1x128xf32>
    %116 = arith.addf %108, %115 : vector<1x128xf32>
    %117 = vector.extract_strided_slice %2 {offsets = [0, 1792], sizes = [2, 128], strides = [1, 1]} : vector<2x2048xf32> to vector<2x128xf32>
    %cst_33 = arith.constant dense<0.000000e+00> : vector<128xf32>
    %118 = vector.multi_reduction <add>, %117, %cst_33 [0] : vector<2x128xf32> to vector<128xf32>
    %119 = vector.shape_cast %118 : vector<128xf32> to vector<1x128xf32>
    %120 = arith.addf %112, %119 : vector<1x128xf32>
    %121 = arith.mulf %117, %117 : vector<2x128xf32>
    %cst_34 = arith.constant dense<0.000000e+00> : vector<128xf32>
    %122 = vector.multi_reduction <add>, %121, %cst_34 [0] : vector<2x128xf32> to vector<128xf32>
    %123 = vector.shape_cast %122 : vector<128xf32> to vector<1x128xf32>
    %124 = arith.addf %116, %123 : vector<1x128xf32>
    %125 = vector.extract_strided_slice %2 {offsets = [0, 1920], sizes = [2, 128], strides = [1, 1]} : vector<2x2048xf32> to vector<2x128xf32>
    %cst_35 = arith.constant dense<0.000000e+00> : vector<128xf32>
    %126 = vector.multi_reduction <add>, %125, %cst_35 [0] : vector<2x128xf32> to vector<128xf32>
    %127 = vector.shape_cast %126 : vector<128xf32> to vector<1x128xf32>
    %128 = arith.addf %120, %127 : vector<1x128xf32>
    %129 = arith.mulf %125, %125 : vector<2x128xf32>
    %cst_36 = arith.constant dense<0.000000e+00> : vector<128xf32>
    %130 = vector.multi_reduction <add>, %129, %cst_36 [0] : vector<2x128xf32> to vector<128xf32>
    %131 = vector.shape_cast %130 : vector<128xf32> to vector<1x128xf32>
    %132 = arith.addf %124, %131 : vector<1x128xf32>
    %cst_37 = arith.constant 3.200000e+01 : f32
    %133 = vector.broadcast %cst_37 : f32 to vector<1x128xf32>
    %134 = arith.divf %128, %133 : vector<1x128xf32>
    %cst_38 = arith.constant 3.200000e+01 : f32
    %135 = vector.broadcast %cst_38 : f32 to vector<1x128xf32>
    %136 = arith.divf %132, %135 : vector<1x128xf32>
    %137 = arith.mulf %134, %134 : vector<1x128xf32>
    %138 = arith.subf %136, %137 : vector<1x128xf32>
    %cst_39 = arith.constant 0.000000e+00 : f32
    %139 = vector.broadcast %cst_39 : f32 to vector<1x128xf32>
    %140 = arith.maximumf %138, %139 : vector<1x128xf32>
    %c0_40 = arith.constant 0 : index
    %c0_41 = arith.constant 0 : index
    %141 = vector.load %arg2[%c0_40, %c0_41] : memref<1x128xf32, #tpu.memory_space<vmem>>, vector<1x128xf32>
    %cst_42 = arith.constant 9.99999974E-6 : f32
    %142 = vector.broadcast %cst_42 : f32 to vector<1x128xf32>
    %143 = arith.addf %140, %142 : vector<1x128xf32>
    %144 = math.rsqrt %143 : vector<1x128xf32>
    %145 = arith.mulf %141, %144 : vector<1x128xf32>
    %c0_43 = arith.constant 0 : index
    %c0_44 = arith.constant 0 : index
    %146 = vector.load %arg3[%c0_43, %c0_44] : memref<1x128xf32, #tpu.memory_space<vmem>>, vector<1x128xf32>
    %147 = arith.mulf %134, %145 : vector<1x128xf32>
    %148 = arith.subf %146, %147 : vector<1x128xf32>
    %149 = vector.extract_strided_slice %2 {offsets = [0, 0], sizes = [2, 128], strides = [1, 1]} : vector<2x2048xf32> to vector<2x128xf32>
    %150 = vector.broadcast %145 : vector<1x128xf32> to vector<2x128xf32>
    %151 = arith.mulf %149, %150 : vector<2x128xf32>
    %152 = vector.broadcast %148 : vector<1x128xf32> to vector<2x128xf32>
    %153 = arith.addf %151, %152 : vector<2x128xf32>
    %cst_45 = arith.constant 0.000000e+00 : f32
    %154 = vector.broadcast %cst_45 : f32 to vector<2x128xf32>
    %155 = arith.maximumf %153, %154 : vector<2x128xf32>
    %156 = arith.truncf %155 : vector<2x128xf32> to vector<2x128xbf16>
    %c0_46 = arith.constant 0 : index
    %c0_47 = arith.constant 0 : index
    %157 = vector.load %arg4[%c0_46, %c0_47] : memref<2x2048xbf16, #tpu.memory_space<vmem>>, vector<2x128xbf16>
    tpu.vector_store %arg4[%c0_46, %c0_47], %156 {strides = array<i32>} : memref<2x2048xbf16, #tpu.memory_space<vmem>>, vector<2x128xbf16>,
    %158 = vector.extract_strided_slice %2 {offsets = [0, 128], sizes = [2, 128], strides = [1, 1]} : vector<2x2048xf32> to vector<2x128xf32>
    %159 = vector.broadcast %145 : vector<1x128xf32> to vector<2x128xf32>
    %160 = arith.mulf %158, %159 : vector<2x128xf32>
    %161 = vector.broadcast %148 : vector<1x128xf32> to vector<2x128xf32>
    %162 = arith.addf %160, %161 : vector<2x128xf32>
    %cst_48 = arith.constant 0.000000e+00 : f32
    %163 = vector.broadcast %cst_48 : f32 to vector<2x128xf32>
    %164 = arith.maximumf %162, %163 : vector<2x128xf32>
    %165 = arith.truncf %164 : vector<2x128xf32> to vector<2x128xbf16>
    %c0_49 = arith.constant 0 : index
    %c128 = arith.constant 128 : index
    %166 = vector.load %arg4[%c0_49, %c128] : memref<2x2048xbf16, #tpu.memory_space<vmem>>, vector<2x128xbf16>
    tpu.vector_store %arg4[%c0_49, %c128], %165 {strides = array<i32>} : memref<2x2048xbf16, #tpu.memory_space<vmem>>, vector<2x128xbf16>,
    %167 = vector.extract_strided_slice %2 {offsets = [0, 256], sizes = [2, 128], strides = [1, 1]} : vector<2x2048xf32> to vector<2x128xf32>
    %168 = vector.broadcast %145 : vector<1x128xf32> to vector<2x128xf32>
    %169 = arith.mulf %167, %168 : vector<2x128xf32>
    %170 = vector.broadcast %148 : vector<1x128xf32> to vector<2x128xf32>
    %171 = arith.addf %169, %170 : vector<2x128xf32>
    %cst_50 = arith.constant 0.000000e+00 : f32
    %172 = vector.broadcast %cst_50 : f32 to vector<2x128xf32>
    %173 = arith.maximumf %171, %172 : vector<2x128xf32>
    %174 = arith.truncf %173 : vector<2x128xf32> to vector<2x128xbf16>
    %c0_51 = arith.constant 0 : index
    %c256 = arith.constant 256 : index
    %175 = vector.load %arg4[%c0_51, %c256] : memref<2x2048xbf16, #tpu.memory_space<vmem>>, vector<2x128xbf16>
    tpu.vector_store %arg4[%c0_51, %c256], %174 {strides = array<i32>} : memref<2x2048xbf16, #tpu.memory_space<vmem>>, vector<2x128xbf16>,
    %176 = vector.extract_strided_slice %2 {offsets = [0, 384], sizes = [2, 128], strides = [1, 1]} : vector<2x2048xf32> to vector<2x128xf32>
    %177 = vector.broadcast %145 : vector<1x128xf32> to vector<2x128xf32>
    %178 = arith.mulf %176, %177 : vector<2x128xf32>
    %179 = vector.broadcast %148 : vector<1x128xf32> to vector<2x128xf32>
    %180 = arith.addf %178, %179 : vector<2x128xf32>
    %cst_52 = arith.constant 0.000000e+00 : f32
    %181 = vector.broadcast %cst_52 : f32 to vector<2x128xf32>
    %182 = arith.maximumf %180, %181 : vector<2x128xf32>
    %183 = arith.truncf %182 : vector<2x128xf32> to vector<2x128xbf16>
    %c0_53 = arith.constant 0 : index
    %c384 = arith.constant 384 : index
    %184 = vector.load %arg4[%c0_53, %c384] : memref<2x2048xbf16, #tpu.memory_space<vmem>>, vector<2x128xbf16>
    tpu.vector_store %arg4[%c0_53, %c384], %183 {strides = array<i32>} : memref<2x2048xbf16, #tpu.memory_space<vmem>>, vector<2x128xbf16>,
    %185 = vector.extract_strided_slice %2 {offsets = [0, 512], sizes = [2, 128], strides = [1, 1]} : vector<2x2048xf32> to vector<2x128xf32>
    %186 = vector.broadcast %145 : vector<1x128xf32> to vector<2x128xf32>
    %187 = arith.mulf %185, %186 : vector<2x128xf32>
    %188 = vector.broadcast %148 : vector<1x128xf32> to vector<2x128xf32>
    %189 = arith.addf %187, %188 : vector<2x128xf32>
    %cst_54 = arith.constant 0.000000e+00 : f32
    %190 = vector.broadcast %cst_54 : f32 to vector<2x128xf32>
    %191 = arith.maximumf %189, %190 : vector<2x128xf32>
    %192 = arith.truncf %191 : vector<2x128xf32> to vector<2x128xbf16>
    %c0_55 = arith.constant 0 : index
    %c512 = arith.constant 512 : index
    %193 = vector.load %arg4[%c0_55, %c512] : memref<2x2048xbf16, #tpu.memory_space<vmem>>, vector<2x128xbf16>
    tpu.vector_store %arg4[%c0_55, %c512], %192 {strides = array<i32>} : memref<2x2048xbf16, #tpu.memory_space<vmem>>, vector<2x128xbf16>,
    %194 = vector.extract_strided_slice %2 {offsets = [0, 640], sizes = [2, 128], strides = [1, 1]} : vector<2x2048xf32> to vector<2x128xf32>
    %195 = vector.broadcast %145 : vector<1x128xf32> to vector<2x128xf32>
    %196 = arith.mulf %194, %195 : vector<2x128xf32>
    %197 = vector.broadcast %148 : vector<1x128xf32> to vector<2x128xf32>
    %198 = arith.addf %196, %197 : vector<2x128xf32>
    %cst_56 = arith.constant 0.000000e+00 : f32
    %199 = vector.broadcast %cst_56 : f32 to vector<2x128xf32>
    %200 = arith.maximumf %198, %199 : vector<2x128xf32>
    %201 = arith.truncf %200 : vector<2x128xf32> to vector<2x128xbf16>
    %c0_57 = arith.constant 0 : index
    %c640 = arith.constant 640 : index
    %202 = vector.load %arg4[%c0_57, %c640] : memref<2x2048xbf16, #tpu.memory_space<vmem>>, vector<2x128xbf16>
    tpu.vector_store %arg4[%c0_57, %c640], %201 {strides = array<i32>} : memref<2x2048xbf16, #tpu.memory_space<vmem>>, vector<2x128xbf16>,
    %203 = vector.extract_strided_slice %2 {offsets = [0, 768], sizes = [2, 128], strides = [1, 1]} : vector<2x2048xf32> to vector<2x128xf32>
    %204 = vector.broadcast %145 : vector<1x128xf32> to vector<2x128xf32>
    %205 = arith.mulf %203, %204 : vector<2x128xf32>
    %206 = vector.broadcast %148 : vector<1x128xf32> to vector<2x128xf32>
    %207 = arith.addf %205, %206 : vector<2x128xf32>
    %cst_58 = arith.constant 0.000000e+00 : f32
    %208 = vector.broadcast %cst_58 : f32 to vector<2x128xf32>
    %209 = arith.maximumf %207, %208 : vector<2x128xf32>
    %210 = arith.truncf %209 : vector<2x128xf32> to vector<2x128xbf16>
    %c0_59 = arith.constant 0 : index
    %c768 = arith.constant 768 : index
    %211 = vector.load %arg4[%c0_59, %c768] : memref<2x2048xbf16, #tpu.memory_space<vmem>>, vector<2x128xbf16>
    tpu.vector_store %arg4[%c0_59, %c768], %210 {strides = array<i32>} : memref<2x2048xbf16, #tpu.memory_space<vmem>>, vector<2x128xbf16>,
    %212 = vector.extract_strided_slice %2 {offsets = [0, 896], sizes = [2, 128], strides = [1, 1]} : vector<2x2048xf32> to vector<2x128xf32>
    %213 = vector.broadcast %145 : vector<1x128xf32> to vector<2x128xf32>
    %214 = arith.mulf %212, %213 : vector<2x128xf32>
    %215 = vector.broadcast %148 : vector<1x128xf32> to vector<2x128xf32>
    %216 = arith.addf %214, %215 : vector<2x128xf32>
    %cst_60 = arith.constant 0.000000e+00 : f32
    %217 = vector.broadcast %cst_60 : f32 to vector<2x128xf32>
    %218 = arith.maximumf %216, %217 : vector<2x128xf32>
    %219 = arith.truncf %218 : vector<2x128xf32> to vector<2x128xbf16>
    %c0_61 = arith.constant 0 : index
    %c896 = arith.constant 896 : index
    %220 = vector.load %arg4[%c0_61, %c896] : memref<2x2048xbf16, #tpu.memory_space<vmem>>, vector<2x128xbf16>
    tpu.vector_store %arg4[%c0_61, %c896], %219 {strides = array<i32>} : memref<2x2048xbf16, #tpu.memory_space<vmem>>, vector<2x128xbf16>,
    %221 = vector.extract_strided_slice %2 {offsets = [0, 1024], sizes = [2, 128], strides = [1, 1]} : vector<2x2048xf32> to vector<2x128xf32>
    %222 = vector.broadcast %145 : vector<1x128xf32> to vector<2x128xf32>
    %223 = arith.mulf %221, %222 : vector<2x128xf32>
    %224 = vector.broadcast %148 : vector<1x128xf32> to vector<2x128xf32>
    %225 = arith.addf %223, %224 : vector<2x128xf32>
    %cst_62 = arith.constant 0.000000e+00 : f32
    %226 = vector.broadcast %cst_62 : f32 to vector<2x128xf32>
    %227 = arith.maximumf %225, %226 : vector<2x128xf32>
    %228 = arith.truncf %227 : vector<2x128xf32> to vector<2x128xbf16>
    %c0_63 = arith.constant 0 : index
    %c1024 = arith.constant 1024 : index
    %229 = vector.load %arg4[%c0_63, %c1024] : memref<2x2048xbf16, #tpu.memory_space<vmem>>, vector<2x128xbf16>
    tpu.vector_store %arg4[%c0_63, %c1024], %228 {strides = array<i32>} : memref<2x2048xbf16, #tpu.memory_space<vmem>>, vector<2x128xbf16>,
    %230 = vector.extract_strided_slice %2 {offsets = [0, 1152], sizes = [2, 128], strides = [1, 1]} : vector<2x2048xf32> to vector<2x128xf32>
    %231 = vector.broadcast %145 : vector<1x128xf32> to vector<2x128xf32>
    %232 = arith.mulf %230, %231 : vector<2x128xf32>
    %233 = vector.broadcast %148 : vector<1x128xf32> to vector<2x128xf32>
    %234 = arith.addf %232, %233 : vector<2x128xf32>
    %cst_64 = arith.constant 0.000000e+00 : f32
    %235 = vector.broadcast %cst_64 : f32 to vector<2x128xf32>
    %236 = arith.maximumf %234, %235 : vector<2x128xf32>
    %237 = arith.truncf %236 : vector<2x128xf32> to vector<2x128xbf16>
    %c0_65 = arith.constant 0 : index
    %c1152 = arith.constant 1152 : index
    %238 = vector.load %arg4[%c0_65, %c1152] : memref<2x2048xbf16, #tpu.memory_space<vmem>>, vector<2x128xbf16>
    tpu.vector_store %arg4[%c0_65, %c1152], %237 {strides = array<i32>} : memref<2x2048xbf16, #tpu.memory_space<vmem>>, vector<2x128xbf16>,
    %239 = vector.extract_strided_slice %2 {offsets = [0, 1280], sizes = [2, 128], strides = [1, 1]} : vector<2x2048xf32> to vector<2x128xf32>
    %240 = vector.broadcast %145 : vector<1x128xf32> to vector<2x128xf32>
    %241 = arith.mulf %239, %240 : vector<2x128xf32>
    %242 = vector.broadcast %148 : vector<1x128xf32> to vector<2x128xf32>
    %243 = arith.addf %241, %242 : vector<2x128xf32>
    %cst_66 = arith.constant 0.000000e+00 : f32
    %244 = vector.broadcast %cst_66 : f32 to vector<2x128xf32>
    %245 = arith.maximumf %243, %244 : vector<2x128xf32>
    %246 = arith.truncf %245 : vector<2x128xf32> to vector<2x128xbf16>
    %c0_67 = arith.constant 0 : index
    %c1280 = arith.constant 1280 : index
    %247 = vector.load %arg4[%c0_67, %c1280] : memref<2x2048xbf16, #tpu.memory_space<vmem>>, vector<2x128xbf16>
    tpu.vector_store %arg4[%c0_67, %c1280], %246 {strides = array<i32>} : memref<2x2048xbf16, #tpu.memory_space<vmem>>, vector<2x128xbf16>,
    %248 = vector.extract_strided_slice %2 {offsets = [0, 1408], sizes = [2, 128], strides = [1, 1]} : vector<2x2048xf32> to vector<2x128xf32>
    %249 = vector.broadcast %145 : vector<1x128xf32> to vector<2x128xf32>
    %250 = arith.mulf %248, %249 : vector<2x128xf32>
    %251 = vector.broadcast %148 : vector<1x128xf32> to vector<2x128xf32>
    %252 = arith.addf %250, %251 : vector<2x128xf32>
    %cst_68 = arith.constant 0.000000e+00 : f32
    %253 = vector.broadcast %cst_68 : f32 to vector<2x128xf32>
    %254 = arith.maximumf %252, %253 : vector<2x128xf32>
    %255 = arith.truncf %254 : vector<2x128xf32> to vector<2x128xbf16>
    %c0_69 = arith.constant 0 : index
    %c1408 = arith.constant 1408 : index
    %256 = vector.load %arg4[%c0_69, %c1408] : memref<2x2048xbf16, #tpu.memory_space<vmem>>, vector<2x128xbf16>
    tpu.vector_store %arg4[%c0_69, %c1408], %255 {strides = array<i32>} : memref<2x2048xbf16, #tpu.memory_space<vmem>>, vector<2x128xbf16>,
    %257 = vector.extract_strided_slice %2 {offsets = [0, 1536], sizes = [2, 128], strides = [1, 1]} : vector<2x2048xf32> to vector<2x128xf32>
    %258 = vector.broadcast %145 : vector<1x128xf32> to vector<2x128xf32>
    %259 = arith.mulf %257, %258 : vector<2x128xf32>
    %260 = vector.broadcast %148 : vector<1x128xf32> to vector<2x128xf32>
    %261 = arith.addf %259, %260 : vector<2x128xf32>
    %cst_70 = arith.constant 0.000000e+00 : f32
    %262 = vector.broadcast %cst_70 : f32 to vector<2x128xf32>
    %263 = arith.maximumf %261, %262 : vector<2x128xf32>
    %264 = arith.truncf %263 : vector<2x128xf32> to vector<2x128xbf16>
    %c0_71 = arith.constant 0 : index
    %c1536 = arith.constant 1536 : index
    %265 = vector.load %arg4[%c0_71, %c1536] : memref<2x2048xbf16, #tpu.memory_space<vmem>>, vector<2x128xbf16>
    tpu.vector_store %arg4[%c0_71, %c1536], %264 {strides = array<i32>} : memref<2x2048xbf16, #tpu.memory_space<vmem>>, vector<2x128xbf16>,
    %266 = vector.extract_strided_slice %2 {offsets = [0, 1664], sizes = [2, 128], strides = [1, 1]} : vector<2x2048xf32> to vector<2x128xf32>
    %267 = vector.broadcast %145 : vector<1x128xf32> to vector<2x128xf32>
    %268 = arith.mulf %266, %267 : vector<2x128xf32>
    %269 = vector.broadcast %148 : vector<1x128xf32> to vector<2x128xf32>
    %270 = arith.addf %268, %269 : vector<2x128xf32>
    %cst_72 = arith.constant 0.000000e+00 : f32
    %271 = vector.broadcast %cst_72 : f32 to vector<2x128xf32>
    %272 = arith.maximumf %270, %271 : vector<2x128xf32>
    %273 = arith.truncf %272 : vector<2x128xf32> to vector<2x128xbf16>
    %c0_73 = arith.constant 0 : index
    %c1664 = arith.constant 1664 : index
    %274 = vector.load %arg4[%c0_73, %c1664] : memref<2x2048xbf16, #tpu.memory_space<vmem>>, vector<2x128xbf16>
    tpu.vector_store %arg4[%c0_73, %c1664], %273 {strides = array<i32>} : memref<2x2048xbf16, #tpu.memory_space<vmem>>, vector<2x128xbf16>,
    %275 = vector.extract_strided_slice %2 {offsets = [0, 1792], sizes = [2, 128], strides = [1, 1]} : vector<2x2048xf32> to vector<2x128xf32>
    %276 = vector.broadcast %145 : vector<1x128xf32> to vector<2x128xf32>
    %277 = arith.mulf %275, %276 : vector<2x128xf32>
    %278 = vector.broadcast %148 : vector<1x128xf32> to vector<2x128xf32>
    %279 = arith.addf %277, %278 : vector<2x128xf32>
    %cst_74 = arith.constant 0.000000e+00 : f32
    %280 = vector.broadcast %cst_74 : f32 to vector<2x128xf32>
    %281 = arith.maximumf %279, %280 : vector<2x128xf32>
    %282 = arith.truncf %281 : vector<2x128xf32> to vector<2x128xbf16>
    %c0_75 = arith.constant 0 : index
    %c1792 = arith.constant 1792 : index
    %283 = vector.load %arg4[%c0_75, %c1792] : memref<2x2048xbf16, #tpu.memory_space<vmem>>, vector<2x128xbf16>
    tpu.vector_store %arg4[%c0_75, %c1792], %282 {strides = array<i32>} : memref<2x2048xbf16, #tpu.memory_space<vmem>>, vector<2x128xbf16>,
    %284 = vector.extract_strided_slice %2 {offsets = [0, 1920], sizes = [2, 128], strides = [1, 1]} : vector<2x2048xf32> to vector<2x128xf32>
    %285 = vector.broadcast %145 : vector<1x128xf32> to vector<2x128xf32>
    %286 = arith.mulf %284, %285 : vector<2x128xf32>
    %287 = vector.broadcast %148 : vector<1x128xf32> to vector<2x128xf32>
    %288 = arith.addf %286, %287 : vector<2x128xf32>
    %cst_76 = arith.constant 0.000000e+00 : f32
    %289 = vector.broadcast %cst_76 : f32 to vector<2x128xf32>
    %290 = arith.maximumf %288, %289 : vector<2x128xf32>
    %291 = arith.truncf %290 : vector<2x128xf32> to vector<2x128xbf16>
    %c0_77 = arith.constant 0 : index
    %c1920 = arith.constant 1920 : index
    %292 = vector.load %arg4[%c0_77, %c1920] : memref<2x2048xbf16, #tpu.memory_space<vmem>>, vector<2x128xbf16>
    tpu.vector_store %arg4[%c0_77, %c1920], %291 {strides = array<i32>} : memref<2x2048xbf16, #tpu.memory_space<vmem>>, vector<2x128xbf16>,
    return
  }
}

module attributes {stable_mosaic.version = 11 : i64} {
  func.func @_bmm_bn_stats_kernel(%arg0: i32, %arg1: i32, %arg2: i32, %arg3: memref<1x32x512xbf16, #tpu.memory_space<vmem>>, %arg4: memref<1x512x64xbf16, #tpu.memory_space<vmem>>, %arg5: memref<1x32x64xbf16, #tpu.memory_space<vmem>>, %arg6: memref<1x1x1x64xf32, #tpu.memory_space<vmem>>, %arg7: memref<1x1x1x64xf32, #tpu.memory_space<vmem>>) attributes {dimension_semantics = [#tpu.dimension_semantics<parallel>, #tpu.dimension_semantics<parallel>, #tpu.dimension_semantics<parallel>], iteration_bounds = array<i64: 4, 1, 1>, scalar_prefetch = 0 : i64, scratch_operands = 0 : i64, tpu.core_type = #tpu.core_type<tc>, window_params = [{transform_indices = @transform_0, window_bounds = array<i64: 1, 32, 512>}, {transform_indices = @transform_1, window_bounds = array<i64: 1, 512, 64>}, {transform_indices = @transform_2, window_bounds = array<i64: 1, 32, 64>}, {transform_indices = @transform_3, window_bounds = array<i64: 1, 1, 1, 64>}, {transform_indices = @transform_4, window_bounds = array<i64: 1, 1, 1, 64>}]} {
    %c0 = arith.constant 0 : index
    %c0_0 = arith.constant 0 : index
    %c0_1 = arith.constant 0 : index
    %0 = vector.load %arg3[%c0, %c0_0, %c0_1] : memref<1x32x512xbf16, #tpu.memory_space<vmem>>, vector<1x32x512xbf16>
    %1 = vector.shape_cast %0 : vector<1x32x512xbf16> to vector<32x512xbf16>
    %c0_2 = arith.constant 0 : index
    %c0_3 = arith.constant 0 : index
    %c0_4 = arith.constant 0 : index
    %2 = vector.load %arg4[%c0_2, %c0_3, %c0_4] : memref<1x512x64xbf16, #tpu.memory_space<vmem>>, vector<1x512x64xbf16>
    %3 = vector.shape_cast %2 : vector<1x512x64xbf16> to vector<512x64xbf16>
    %cst = arith.constant dense<0.000000e+00> : vector<32x64xf32>
    %4 = tpu.matmul %1, %3, %cst {dimension_numbers = #tpu.dot_dimension_numbers<[1], [0], [0], [1], [0, 0, 1, 1], [], []>} : vector<32x512xbf16>, vector<512x64xbf16>, vector<32x64xf32> -> vector<32x64xf32>
    %5 = arith.truncf %4 : vector<32x64xf32> to vector<32x64xbf16>
    %c0_5 = arith.constant 0 : index
    %c0_6 = arith.constant 0 : index
    %c0_7 = arith.constant 0 : index
    %6 = vector.load %arg5[%c0_5, %c0_6, %c0_7] : memref<1x32x64xbf16, #tpu.memory_space<vmem>>, vector<1x32x64xbf16>
    %7 = vector.shape_cast %6 : vector<1x32x64xbf16> to vector<32x64xbf16>
    %8 = vector.shape_cast %5 : vector<32x64xbf16> to vector<1x32x64xbf16>
    tpu.vector_store %arg5[%c0_5, %c0_6, %c0_7], %8 {strides = array<i32>} : memref<1x32x64xbf16, #tpu.memory_space<vmem>>, vector<1x32x64xbf16>,
    %cst_8 = arith.constant dense<0.000000e+00> : vector<64xf32>
    %9 = vector.multi_reduction <add>, %4, %cst_8 [0] : vector<32x64xf32> to vector<64xf32>
    %10 = vector.shape_cast %9 : vector<64xf32> to vector<1x64xf32>
    %c0_9 = arith.constant 0 : index
    %c0_10 = arith.constant 0 : index
    %c0_11 = arith.constant 0 : index
    %c0_12 = arith.constant 0 : index
    %11 = vector.load %arg6[%c0_9, %c0_10, %c0_11, %c0_12] : memref<1x1x1x64xf32, #tpu.memory_space<vmem>>, vector<1x1x1x64xf32>
    %12 = vector.shape_cast %11 : vector<1x1x1x64xf32> to vector<1x64xf32>
    %13 = vector.shape_cast %10 : vector<1x64xf32> to vector<1x1x1x64xf32>
    tpu.vector_store %arg6[%c0_9, %c0_10, %c0_11, %c0_12], %13 {strides = array<i32>} : memref<1x1x1x64xf32, #tpu.memory_space<vmem>>, vector<1x1x1x64xf32>,
    %14 = arith.mulf %4, %4 : vector<32x64xf32>
    %cst_13 = arith.constant dense<0.000000e+00> : vector<64xf32>
    %15 = vector.multi_reduction <add>, %14, %cst_13 [0] : vector<32x64xf32> to vector<64xf32>
    %16 = vector.shape_cast %15 : vector<64xf32> to vector<1x64xf32>
    %c0_14 = arith.constant 0 : index
    %c0_15 = arith.constant 0 : index
    %c0_16 = arith.constant 0 : index
    %c0_17 = arith.constant 0 : index
    %17 = vector.load %arg7[%c0_14, %c0_15, %c0_16, %c0_17] : memref<1x1x1x64xf32, #tpu.memory_space<vmem>>, vector<1x1x1x64xf32>
    %18 = vector.shape_cast %17 : vector<1x1x1x64xf32> to vector<1x64xf32>
    %19 = vector.shape_cast %16 : vector<1x64xf32> to vector<1x1x1x64xf32>
    tpu.vector_store %arg7[%c0_14, %c0_15, %c0_16, %c0_17], %19 {strides = array<i32>} : memref<1x1x1x64xf32, #tpu.memory_space<vmem>>, vector<1x1x1x64xf32>,
    return
  }
  func.func @transform_0(%arg0: i32, %arg1: i32, %arg2: i32) -> (i32, i32, i32) {
    %c0_i32 = arith.constant 0 : i32
    %c0_i32_0 = arith.constant 0 : i32
    return %arg0, %arg1, %c0_i32 : i32, i32, i32
  }
  func.func @transform_1(%arg0: i32, %arg1: i32, %arg2: i32) -> (i32, i32, i32) {
    %c0_i32 = arith.constant 0 : i32
    %c0_i32_0 = arith.constant 0 : i32
    return %arg0, %c0_i32, %arg2 : i32, i32, i32
  }
  func.func @transform_2(%arg0: i32, %arg1: i32, %arg2: i32) -> (i32, i32, i32) {
    %c0_i32 = arith.constant 0 : i32
    return %arg0, %arg1, %arg2 : i32, i32, i32
  }
  func.func @transform_3(%arg0: i32, %arg1: i32, %arg2: i32) -> (i32, i32, i32, i32) {
    %c0_i32 = arith.constant 0 : i32
    %c0_i32_0 = arith.constant 0 : i32
    return %arg0, %arg1, %c0_i32, %arg2 : i32, i32, i32, i32
  }
  func.func @transform_4(%arg0: i32, %arg1: i32, %arg2: i32) -> (i32, i32, i32, i32) {
    %c0_i32 = arith.constant 0 : i32
    %c0_i32_0 = arith.constant 0 : i32
    return %arg0, %arg1, %c0_i32, %arg2 : i32, i32, i32, i32
  }
}

module attributes {stable_mosaic.version = 11 : i64} {
  func.func @_scale_relu_kernel(%arg0: i32, %arg1: memref<64x128xbf16, #tpu.memory_space<vmem>>, %arg2: memref<1x128xf32, #tpu.memory_space<vmem>>, %arg3: memref<1x128xf32, #tpu.memory_space<vmem>>, %arg4: memref<64x128xbf16, #tpu.memory_space<vmem>>) attributes {dimension_semantics = [#tpu.dimension_semantics<parallel>], iteration_bounds = array<i64: 1>, scalar_prefetch = 0 : i64, scratch_operands = 0 : i64, tpu.core_type = #tpu.core_type<tc>, window_params = [{transform_indices = @transform_0, window_bounds = array<i64: 64, 128>}, {pipeline_mode = #tpu.pipeline_mode<synchronous>, transform_indices = @transform_1, window_bounds = array<i64: 1, 128>}, {pipeline_mode = #tpu.pipeline_mode<synchronous>, transform_indices = @transform_2, window_bounds = array<i64: 1, 128>}, {transform_indices = @transform_3, window_bounds = array<i64: 64, 128>}]} {
    %c0 = arith.constant 0 : index
    %c0_0 = arith.constant 0 : index
    %0 = vector.load %arg1[%c0, %c0_0] : memref<64x128xbf16, #tpu.memory_space<vmem>>, vector<64x128xbf16>
    %1 = arith.extf %0 : vector<64x128xbf16> to vector<64x128xf32>
    %c0_1 = arith.constant 0 : index
    %c0_2 = arith.constant 0 : index
    %2 = vector.load %arg2[%c0_1, %c0_2] : memref<1x128xf32, #tpu.memory_space<vmem>>, vector<1x128xf32>
    %3 = vector.broadcast %2 : vector<1x128xf32> to vector<64x128xf32>
    %4 = arith.mulf %1, %3 : vector<64x128xf32>
    %c0_3 = arith.constant 0 : index
    %c0_4 = arith.constant 0 : index
    %5 = vector.load %arg3[%c0_3, %c0_4] : memref<1x128xf32, #tpu.memory_space<vmem>>, vector<1x128xf32>
    %6 = vector.broadcast %5 : vector<1x128xf32> to vector<64x128xf32>
    %7 = arith.addf %4, %6 : vector<64x128xf32>
    %cst = arith.constant 0.000000e+00 : f32
    %8 = vector.broadcast %cst : f32 to vector<64x128xf32>
    %9 = arith.maximumf %7, %8 : vector<64x128xf32>
    %10 = arith.truncf %9 : vector<64x128xf32> to vector<64x128xbf16>
    %c0_5 = arith.constant 0 : index
    %c0_6 = arith.constant 0 : index
    %11 = vector.load %arg4[%c0_5, %c0_6] : memref<64x128xbf16, #tpu.memory_space<vmem>>, vector<64x128xbf16>
    tpu.vector_store %arg4[%c0_5, %c0_6], %10 {strides = array<i32>} : memref<64x128xbf16, #tpu.memory_space<vmem>>, vector<64x128xbf16>,
    return
  }
  func.func @transform_0(%arg0: i32) -> (i32, i32) {
    %c0_i32 = arith.constant 0 : i32
    %c0_i32_0 = arith.constant 0 : i32
    return %arg0, %c0_i32 : i32, i32
  }
  func.func @transform_1(%arg0: i32) -> (i32, i32) {
    %c0_i32 = arith.constant 0 : i32
    %c0_i32_0 = arith.constant 0 : i32
    %c0_i32_1 = arith.constant 0 : i32
    return %c0_i32, %c0_i32_0 : i32, i32
  }
  func.func @transform_2(%arg0: i32) -> (i32, i32) {
    %c0_i32 = arith.constant 0 : i32
    %c0_i32_0 = arith.constant 0 : i32
    %c0_i32_1 = arith.constant 0 : i32
    return %c0_i32, %c0_i32_0 : i32, i32
  }
  func.func @transform_3(%arg0: i32) -> (i32, i32) {
    %c0_i32 = arith.constant 0 : i32
    %c0_i32_0 = arith.constant 0 : i32
    return %arg0, %c0_i32 : i32, i32
  }
}

module attributes {stable_mosaic.version = 11 : i64} {
  func.func @_bmm_bn_stats_kernel(%arg0: i32, %arg1: i32, %arg2: i32, %arg3: memref<1x128x256xbf16, #tpu.memory_space<vmem>>, %arg4: memref<1x256x32xbf16, #tpu.memory_space<vmem>>, %arg5: memref<1x128x32xbf16, #tpu.memory_space<vmem>>, %arg6: memref<1x1x1x32xf32, #tpu.memory_space<vmem>>, %arg7: memref<1x1x1x32xf32, #tpu.memory_space<vmem>>) attributes {dimension_semantics = [#tpu.dimension_semantics<parallel>, #tpu.dimension_semantics<parallel>, #tpu.dimension_semantics<parallel>], iteration_bounds = array<i64: 4, 1, 1>, scalar_prefetch = 0 : i64, scratch_operands = 0 : i64, tpu.core_type = #tpu.core_type<tc>, window_params = [{transform_indices = @transform_0, window_bounds = array<i64: 1, 128, 256>}, {transform_indices = @transform_1, window_bounds = array<i64: 1, 256, 32>}, {transform_indices = @transform_2, window_bounds = array<i64: 1, 128, 32>}, {transform_indices = @transform_3, window_bounds = array<i64: 1, 1, 1, 32>}, {transform_indices = @transform_4, window_bounds = array<i64: 1, 1, 1, 32>}]} {
    %c0 = arith.constant 0 : index
    %c0_0 = arith.constant 0 : index
    %c0_1 = arith.constant 0 : index
    %0 = vector.load %arg3[%c0, %c0_0, %c0_1] : memref<1x128x256xbf16, #tpu.memory_space<vmem>>, vector<1x128x256xbf16>
    %1 = vector.shape_cast %0 : vector<1x128x256xbf16> to vector<128x256xbf16>
    %c0_2 = arith.constant 0 : index
    %c0_3 = arith.constant 0 : index
    %c0_4 = arith.constant 0 : index
    %2 = vector.load %arg4[%c0_2, %c0_3, %c0_4] : memref<1x256x32xbf16, #tpu.memory_space<vmem>>, vector<1x256x32xbf16>
    %3 = vector.shape_cast %2 : vector<1x256x32xbf16> to vector<256x32xbf16>
    %cst = arith.constant dense<0.000000e+00> : vector<128x32xf32>
    %4 = tpu.matmul %1, %3, %cst {dimension_numbers = #tpu.dot_dimension_numbers<[1], [0], [0], [1], [0, 0, 1, 1], [], []>} : vector<128x256xbf16>, vector<256x32xbf16>, vector<128x32xf32> -> vector<128x32xf32>
    %5 = arith.truncf %4 : vector<128x32xf32> to vector<128x32xbf16>
    %c0_5 = arith.constant 0 : index
    %c0_6 = arith.constant 0 : index
    %c0_7 = arith.constant 0 : index
    %6 = vector.load %arg5[%c0_5, %c0_6, %c0_7] : memref<1x128x32xbf16, #tpu.memory_space<vmem>>, vector<1x128x32xbf16>
    %7 = vector.shape_cast %6 : vector<1x128x32xbf16> to vector<128x32xbf16>
    %8 = vector.shape_cast %5 : vector<128x32xbf16> to vector<1x128x32xbf16>
    tpu.vector_store %arg5[%c0_5, %c0_6, %c0_7], %8 {strides = array<i32>} : memref<1x128x32xbf16, #tpu.memory_space<vmem>>, vector<1x128x32xbf16>,
    %cst_8 = arith.constant dense<0.000000e+00> : vector<32xf32>
    %9 = vector.multi_reduction <add>, %4, %cst_8 [0] : vector<128x32xf32> to vector<32xf32>
    %10 = vector.shape_cast %9 : vector<32xf32> to vector<1x32xf32>
    %c0_9 = arith.constant 0 : index
    %c0_10 = arith.constant 0 : index
    %c0_11 = arith.constant 0 : index
    %c0_12 = arith.constant 0 : index
    %11 = vector.load %arg6[%c0_9, %c0_10, %c0_11, %c0_12] : memref<1x1x1x32xf32, #tpu.memory_space<vmem>>, vector<1x1x1x32xf32>
    %12 = vector.shape_cast %11 : vector<1x1x1x32xf32> to vector<1x32xf32>
    %13 = vector.shape_cast %10 : vector<1x32xf32> to vector<1x1x1x32xf32>
    tpu.vector_store %arg6[%c0_9, %c0_10, %c0_11, %c0_12], %13 {strides = array<i32>} : memref<1x1x1x32xf32, #tpu.memory_space<vmem>>, vector<1x1x1x32xf32>,
    %14 = arith.mulf %4, %4 : vector<128x32xf32>
    %cst_13 = arith.constant dense<0.000000e+00> : vector<32xf32>
    %15 = vector.multi_reduction <add>, %14, %cst_13 [0] : vector<128x32xf32> to vector<32xf32>
    %16 = vector.shape_cast %15 : vector<32xf32> to vector<1x32xf32>
    %c0_14 = arith.constant 0 : index
    %c0_15 = arith.constant 0 : index
    %c0_16 = arith.constant 0 : index
    %c0_17 = arith.constant 0 : index
    %17 = vector.load %arg7[%c0_14, %c0_15, %c0_16, %c0_17] : memref<1x1x1x32xf32, #tpu.memory_space<vmem>>, vector<1x1x1x32xf32>
    %18 = vector.shape_cast %17 : vector<1x1x1x32xf32> to vector<1x32xf32>
    %19 = vector.shape_cast %16 : vector<1x32xf32> to vector<1x1x1x32xf32>
    tpu.vector_store %arg7[%c0_14, %c0_15, %c0_16, %c0_17], %19 {strides = array<i32>} : memref<1x1x1x32xf32, #tpu.memory_space<vmem>>, vector<1x1x1x32xf32>,
    return
  }
  func.func @transform_0(%arg0: i32, %arg1: i32, %arg2: i32) -> (i32, i32, i32) {
    %c0_i32 = arith.constant 0 : i32
    %c0_i32_0 = arith.constant 0 : i32
    return %arg0, %arg1, %c0_i32 : i32, i32, i32
  }
  func.func @transform_1(%arg0: i32, %arg1: i32, %arg2: i32) -> (i32, i32, i32) {
    %c0_i32 = arith.constant 0 : i32
    %c0_i32_0 = arith.constant 0 : i32
    return %arg0, %c0_i32, %arg2 : i32, i32, i32
  }
  func.func @transform_2(%arg0: i32, %arg1: i32, %arg2: i32) -> (i32, i32, i32) {
    %c0_i32 = arith.constant 0 : i32
    return %arg0, %arg1, %arg2 : i32, i32, i32
  }
  func.func @transform_3(%arg0: i32, %arg1: i32, %arg2: i32) -> (i32, i32, i32, i32) {
    %c0_i32 = arith.constant 0 : i32
    %c0_i32_0 = arith.constant 0 : i32
    return %arg0, %arg1, %c0_i32, %arg2 : i32, i32, i32, i32
  }
  func.func @transform_4(%arg0: i32, %arg1: i32, %arg2: i32) -> (i32, i32, i32, i32) {
    %c0_i32 = arith.constant 0 : i32
    %c0_i32_0 = arith.constant 0 : i32
    return %arg0, %arg1, %c0_i32, %arg2 : i32, i32, i32, i32
  }
}

module attributes {stable_mosaic.version = 11 : i64} {
  func.func @_scale_relu_kernel(%arg0: i32, %arg1: memref<128x128xbf16, #tpu.memory_space<vmem>>, %arg2: memref<1x128xf32, #tpu.memory_space<vmem>>, %arg3: memref<1x128xf32, #tpu.memory_space<vmem>>, %arg4: memref<128x128xbf16, #tpu.memory_space<vmem>>) attributes {dimension_semantics = [#tpu.dimension_semantics<parallel>], iteration_bounds = array<i64: 1>, scalar_prefetch = 0 : i64, scratch_operands = 0 : i64, tpu.core_type = #tpu.core_type<tc>, window_params = [{transform_indices = @transform_0, window_bounds = array<i64: 128, 128>}, {pipeline_mode = #tpu.pipeline_mode<synchronous>, transform_indices = @transform_1, window_bounds = array<i64: 1, 128>}, {pipeline_mode = #tpu.pipeline_mode<synchronous>, transform_indices = @transform_2, window_bounds = array<i64: 1, 128>}, {transform_indices = @transform_3, window_bounds = array<i64: 128, 128>}]} {
    %c0 = arith.constant 0 : index
    %c0_0 = arith.constant 0 : index
    %0 = vector.load %arg1[%c0, %c0_0] : memref<128x128xbf16, #tpu.memory_space<vmem>>, vector<128x128xbf16>
    %1 = arith.extf %0 : vector<128x128xbf16> to vector<128x128xf32>
    %c0_1 = arith.constant 0 : index
    %c0_2 = arith.constant 0 : index
    %2 = vector.load %arg2[%c0_1, %c0_2] : memref<1x128xf32, #tpu.memory_space<vmem>>, vector<1x128xf32>
    %3 = vector.broadcast %2 : vector<1x128xf32> to vector<128x128xf32>
    %4 = arith.mulf %1, %3 : vector<128x128xf32>
    %c0_3 = arith.constant 0 : index
    %c0_4 = arith.constant 0 : index
    %5 = vector.load %arg3[%c0_3, %c0_4] : memref<1x128xf32, #tpu.memory_space<vmem>>, vector<1x128xf32>
    %6 = vector.broadcast %5 : vector<1x128xf32> to vector<128x128xf32>
    %7 = arith.addf %4, %6 : vector<128x128xf32>
    %cst = arith.constant 0.000000e+00 : f32
    %8 = vector.broadcast %cst : f32 to vector<128x128xf32>
    %9 = arith.maximumf %7, %8 : vector<128x128xf32>
    %10 = arith.truncf %9 : vector<128x128xf32> to vector<128x128xbf16>
    %c0_5 = arith.constant 0 : index
    %c0_6 = arith.constant 0 : index
    %11 = vector.load %arg4[%c0_5, %c0_6] : memref<128x128xbf16, #tpu.memory_space<vmem>>, vector<128x128xbf16>
    tpu.vector_store %arg4[%c0_5, %c0_6], %10 {strides = array<i32>} : memref<128x128xbf16, #tpu.memory_space<vmem>>, vector<128x128xbf16>,
    return
  }
  func.func @transform_0(%arg0: i32) -> (i32, i32) {
    %c0_i32 = arith.constant 0 : i32
    %c0_i32_0 = arith.constant 0 : i32
    return %arg0, %c0_i32 : i32, i32
  }
  func.func @transform_1(%arg0: i32) -> (i32, i32) {
    %c0_i32 = arith.constant 0 : i32
    %c0_i32_0 = arith.constant 0 : i32
    %c0_i32_1 = arith.constant 0 : i32
    return %c0_i32, %c0_i32_0 : i32, i32
  }
  func.func @transform_2(%arg0: i32) -> (i32, i32) {
    %c0_i32 = arith.constant 0 : i32
    %c0_i32_0 = arith.constant 0 : i32
    %c0_i32_1 = arith.constant 0 : i32
    return %c0_i32, %c0_i32_0 : i32, i32
  }
  func.func @transform_3(%arg0: i32) -> (i32, i32) {
    %c0_i32 = arith.constant 0 : i32
    %c0_i32_0 = arith.constant 0 : i32
    return %arg0, %c0_i32 : i32, i32
  }
}

module attributes {stable_mosaic.version = 11 : i64} {
  func.func @_bmm_bn_stats_kernel(%arg0: i32, %arg1: i32, %arg2: i32, %arg3: memref<1x512x128xbf16, #tpu.memory_space<vmem>>, %arg4: memref<1x128x16xbf16, #tpu.memory_space<vmem>>, %arg5: memref<1x512x16xbf16, #tpu.memory_space<vmem>>, %arg6: memref<1x1x1x16xf32, #tpu.memory_space<vmem>>, %arg7: memref<1x1x1x16xf32, #tpu.memory_space<vmem>>) attributes {dimension_semantics = [#tpu.dimension_semantics<parallel>, #tpu.dimension_semantics<parallel>, #tpu.dimension_semantics<parallel>], iteration_bounds = array<i64: 4, 1, 1>, scalar_prefetch = 0 : i64, scratch_operands = 0 : i64, tpu.core_type = #tpu.core_type<tc>, window_params = [{transform_indices = @transform_0, window_bounds = array<i64: 1, 512, 128>}, {transform_indices = @transform_1, window_bounds = array<i64: 1, 128, 16>}, {transform_indices = @transform_2, window_bounds = array<i64: 1, 512, 16>}, {transform_indices = @transform_3, window_bounds = array<i64: 1, 1, 1, 16>}, {transform_indices = @transform_4, window_bounds = array<i64: 1, 1, 1, 16>}]} {
    %c0 = arith.constant 0 : index
    %c0_0 = arith.constant 0 : index
    %c0_1 = arith.constant 0 : index
    %0 = vector.load %arg3[%c0, %c0_0, %c0_1] : memref<1x512x128xbf16, #tpu.memory_space<vmem>>, vector<1x512x128xbf16>
    %1 = vector.shape_cast %0 : vector<1x512x128xbf16> to vector<512x128xbf16>
    %c0_2 = arith.constant 0 : index
    %c0_3 = arith.constant 0 : index
    %c0_4 = arith.constant 0 : index
    %2 = vector.load %arg4[%c0_2, %c0_3, %c0_4] : memref<1x128x16xbf16, #tpu.memory_space<vmem>>, vector<1x128x16xbf16>
    %3 = vector.shape_cast %2 : vector<1x128x16xbf16> to vector<128x16xbf16>
    %cst = arith.constant dense<0.000000e+00> : vector<512x16xf32>
    %4 = tpu.matmul %1, %3, %cst {dimension_numbers = #tpu.dot_dimension_numbers<[1], [0], [0], [1], [0, 0, 1, 1], [], []>} : vector<512x128xbf16>, vector<128x16xbf16>, vector<512x16xf32> -> vector<512x16xf32>
    %5 = arith.truncf %4 : vector<512x16xf32> to vector<512x16xbf16>
    %c0_5 = arith.constant 0 : index
    %c0_6 = arith.constant 0 : index
    %c0_7 = arith.constant 0 : index
    %6 = vector.load %arg5[%c0_5, %c0_6, %c0_7] : memref<1x512x16xbf16, #tpu.memory_space<vmem>>, vector<1x512x16xbf16>
    %7 = vector.shape_cast %6 : vector<1x512x16xbf16> to vector<512x16xbf16>
    %8 = vector.shape_cast %5 : vector<512x16xbf16> to vector<1x512x16xbf16>
    tpu.vector_store %arg5[%c0_5, %c0_6, %c0_7], %8 {strides = array<i32>} : memref<1x512x16xbf16, #tpu.memory_space<vmem>>, vector<1x512x16xbf16>,
    %cst_8 = arith.constant dense<0.000000e+00> : vector<16xf32>
    %9 = vector.multi_reduction <add>, %4, %cst_8 [0] : vector<512x16xf32> to vector<16xf32>
    %10 = vector.shape_cast %9 : vector<16xf32> to vector<1x16xf32>
    %c0_9 = arith.constant 0 : index
    %c0_10 = arith.constant 0 : index
    %c0_11 = arith.constant 0 : index
    %c0_12 = arith.constant 0 : index
    %11 = vector.load %arg6[%c0_9, %c0_10, %c0_11, %c0_12] : memref<1x1x1x16xf32, #tpu.memory_space<vmem>>, vector<1x1x1x16xf32>
    %12 = vector.shape_cast %11 : vector<1x1x1x16xf32> to vector<1x16xf32>
    %13 = vector.shape_cast %10 : vector<1x16xf32> to vector<1x1x1x16xf32>
    tpu.vector_store %arg6[%c0_9, %c0_10, %c0_11, %c0_12], %13 {strides = array<i32>} : memref<1x1x1x16xf32, #tpu.memory_space<vmem>>, vector<1x1x1x16xf32>,
    %14 = arith.mulf %4, %4 : vector<512x16xf32>
    %cst_13 = arith.constant dense<0.000000e+00> : vector<16xf32>
    %15 = vector.multi_reduction <add>, %14, %cst_13 [0] : vector<512x16xf32> to vector<16xf32>
    %16 = vector.shape_cast %15 : vector<16xf32> to vector<1x16xf32>
    %c0_14 = arith.constant 0 : index
    %c0_15 = arith.constant 0 : index
    %c0_16 = arith.constant 0 : index
    %c0_17 = arith.constant 0 : index
    %17 = vector.load %arg7[%c0_14, %c0_15, %c0_16, %c0_17] : memref<1x1x1x16xf32, #tpu.memory_space<vmem>>, vector<1x1x1x16xf32>
    %18 = vector.shape_cast %17 : vector<1x1x1x16xf32> to vector<1x16xf32>
    %19 = vector.shape_cast %16 : vector<1x16xf32> to vector<1x1x1x16xf32>
    tpu.vector_store %arg7[%c0_14, %c0_15, %c0_16, %c0_17], %19 {strides = array<i32>} : memref<1x1x1x16xf32, #tpu.memory_space<vmem>>, vector<1x1x1x16xf32>,
    return
  }
  func.func @transform_0(%arg0: i32, %arg1: i32, %arg2: i32) -> (i32, i32, i32) {
    %c0_i32 = arith.constant 0 : i32
    %c0_i32_0 = arith.constant 0 : i32
    return %arg0, %arg1, %c0_i32 : i32, i32, i32
  }
  func.func @transform_1(%arg0: i32, %arg1: i32, %arg2: i32) -> (i32, i32, i32) {
    %c0_i32 = arith.constant 0 : i32
    %c0_i32_0 = arith.constant 0 : i32
    return %arg0, %c0_i32, %arg2 : i32, i32, i32
  }
  func.func @transform_2(%arg0: i32, %arg1: i32, %arg2: i32) -> (i32, i32, i32) {
    %c0_i32 = arith.constant 0 : i32
    return %arg0, %arg1, %arg2 : i32, i32, i32
  }
  func.func @transform_3(%arg0: i32, %arg1: i32, %arg2: i32) -> (i32, i32, i32, i32) {
    %c0_i32 = arith.constant 0 : i32
    %c0_i32_0 = arith.constant 0 : i32
    return %arg0, %arg1, %c0_i32, %arg2 : i32, i32, i32, i32
  }
  func.func @transform_4(%arg0: i32, %arg1: i32, %arg2: i32) -> (i32, i32, i32, i32) {
    %c0_i32 = arith.constant 0 : i32
    %c0_i32_0 = arith.constant 0 : i32
    return %arg0, %arg1, %c0_i32, %arg2 : i32, i32, i32, i32
  }
}

module attributes {stable_mosaic.version = 11 : i64} {
  func.func @_scale_relu_kernel(%arg0: i32, %arg1: memref<256x128xbf16, #tpu.memory_space<vmem>>, %arg2: memref<1x128xf32, #tpu.memory_space<vmem>>, %arg3: memref<1x128xf32, #tpu.memory_space<vmem>>, %arg4: memref<256x128xbf16, #tpu.memory_space<vmem>>) attributes {dimension_semantics = [#tpu.dimension_semantics<parallel>], iteration_bounds = array<i64: 1>, scalar_prefetch = 0 : i64, scratch_operands = 0 : i64, tpu.core_type = #tpu.core_type<tc>, window_params = [{transform_indices = @transform_0, window_bounds = array<i64: 256, 128>}, {pipeline_mode = #tpu.pipeline_mode<synchronous>, transform_indices = @transform_1, window_bounds = array<i64: 1, 128>}, {pipeline_mode = #tpu.pipeline_mode<synchronous>, transform_indices = @transform_2, window_bounds = array<i64: 1, 128>}, {transform_indices = @transform_3, window_bounds = array<i64: 256, 128>}]} {
    %c0 = arith.constant 0 : index
    %c0_0 = arith.constant 0 : index
    %0 = vector.load %arg1[%c0, %c0_0] : memref<256x128xbf16, #tpu.memory_space<vmem>>, vector<256x128xbf16>
    %1 = arith.extf %0 : vector<256x128xbf16> to vector<256x128xf32>
    %c0_1 = arith.constant 0 : index
    %c0_2 = arith.constant 0 : index
    %2 = vector.load %arg2[%c0_1, %c0_2] : memref<1x128xf32, #tpu.memory_space<vmem>>, vector<1x128xf32>
    %3 = vector.broadcast %2 : vector<1x128xf32> to vector<256x128xf32>
    %4 = arith.mulf %1, %3 : vector<256x128xf32>
    %c0_3 = arith.constant 0 : index
    %c0_4 = arith.constant 0 : index
    %5 = vector.load %arg3[%c0_3, %c0_4] : memref<1x128xf32, #tpu.memory_space<vmem>>, vector<1x128xf32>
    %6 = vector.broadcast %5 : vector<1x128xf32> to vector<256x128xf32>
    %7 = arith.addf %4, %6 : vector<256x128xf32>
    %cst = arith.constant 0.000000e+00 : f32
    %8 = vector.broadcast %cst : f32 to vector<256x128xf32>
    %9 = arith.maximumf %7, %8 : vector<256x128xf32>
    %10 = arith.truncf %9 : vector<256x128xf32> to vector<256x128xbf16>
    %c0_5 = arith.constant 0 : index
    %c0_6 = arith.constant 0 : index
    %11 = vector.load %arg4[%c0_5, %c0_6] : memref<256x128xbf16, #tpu.memory_space<vmem>>, vector<256x128xbf16>
    tpu.vector_store %arg4[%c0_5, %c0_6], %10 {strides = array<i32>} : memref<256x128xbf16, #tpu.memory_space<vmem>>, vector<256x128xbf16>,
    return
  }
  func.func @transform_0(%arg0: i32) -> (i32, i32) {
    %c0_i32 = arith.constant 0 : i32
    %c0_i32_0 = arith.constant 0 : i32
    return %arg0, %c0_i32 : i32, i32
  }
  func.func @transform_1(%arg0: i32) -> (i32, i32) {
    %c0_i32 = arith.constant 0 : i32
    %c0_i32_0 = arith.constant 0 : i32
    %c0_i32_1 = arith.constant 0 : i32
    return %c0_i32, %c0_i32_0 : i32, i32
  }
  func.func @transform_2(%arg0: i32) -> (i32, i32) {
    %c0_i32 = arith.constant 0 : i32
    %c0_i32_0 = arith.constant 0 : i32
    %c0_i32_1 = arith.constant 0 : i32
    return %c0_i32, %c0_i32_0 : i32, i32
  }
  func.func @transform_3(%arg0: i32) -> (i32, i32) {
    %c0_i32 = arith.constant 0 : i32
    %c0_i32_0 = arith.constant 0 : i32
    return %arg0, %c0_i32 : i32, i32
  }
}

module attributes {stable_mosaic.version = 11 : i64} {
  func.func @_bmm_bias_tanh_t_kernel(%arg0: i32, %arg1: i32, %arg2: memref<1x3x64xbf16, #tpu.memory_space<vmem>>, %arg3: memref<1x64x2048xbf16, #tpu.memory_space<vmem>>, %arg4: memref<3x1xf32, #tpu.memory_space<vmem>>, %arg5: memref<1x3x2048xf32, #tpu.memory_space<vmem>>) attributes {dimension_semantics = [#tpu.dimension_semantics<parallel>, #tpu.dimension_semantics<parallel>], iteration_bounds = array<i64: 4, 1>, scalar_prefetch = 0 : i64, scratch_operands = 0 : i64, tpu.core_type = #tpu.core_type<tc>, window_params = [{transform_indices = @transform_0, window_bounds = array<i64: 1, 3, 64>}, {transform_indices = @transform_1, window_bounds = array<i64: 1, 64, 2048>}, {pipeline_mode = #tpu.pipeline_mode<synchronous>, transform_indices = @transform_2, window_bounds = array<i64: 3, 1>}, {transform_indices = @transform_3, window_bounds = array<i64: 1, 3, 2048>}]} {
    %c0 = arith.constant 0 : index
    %c0_0 = arith.constant 0 : index
    %c0_1 = arith.constant 0 : index
    %0 = vector.load %arg2[%c0, %c0_0, %c0_1] : memref<1x3x64xbf16, #tpu.memory_space<vmem>>, vector<1x3x64xbf16>
    %1 = vector.shape_cast %0 : vector<1x3x64xbf16> to vector<3x64xbf16>
    %c0_2 = arith.constant 0 : index
    %c0_3 = arith.constant 0 : index
    %c0_4 = arith.constant 0 : index
    %2 = vector.load %arg3[%c0_2, %c0_3, %c0_4] : memref<1x64x2048xbf16, #tpu.memory_space<vmem>>, vector<1x64x2048xbf16>
    %3 = vector.shape_cast %2 : vector<1x64x2048xbf16> to vector<64x2048xbf16>
    %cst = arith.constant dense<0.000000e+00> : vector<3x2048xf32>
    %4 = tpu.matmul %1, %3, %cst {dimension_numbers = #tpu.dot_dimension_numbers<[1], [0], [0], [1], [0, 0, 1, 1], [], []>} : vector<3x64xbf16>, vector<64x2048xbf16>, vector<3x2048xf32> -> vector<3x2048xf32>
    %c0_5 = arith.constant 0 : index
    %c0_6 = arith.constant 0 : index
    %5 = vector.load %arg4[%c0_5, %c0_6] : memref<3x1xf32, #tpu.memory_space<vmem>>, vector<3x1xf32>
    %6 = vector.broadcast %5 : vector<3x1xf32> to vector<3x2048xf32>
    %7 = arith.addf %4, %6 : vector<3x2048xf32>
    %8 = math.tanh %7 : vector<3x2048xf32>
    %c0_7 = arith.constant 0 : index
    %c0_8 = arith.constant 0 : index
    %c0_9 = arith.constant 0 : index
    %9 = vector.load %arg5[%c0_7, %c0_8, %c0_9] : memref<1x3x2048xf32, #tpu.memory_space<vmem>>, vector<1x3x2048xf32>
    %10 = vector.shape_cast %9 : vector<1x3x2048xf32> to vector<3x2048xf32>
    %11 = vector.shape_cast %8 : vector<3x2048xf32> to vector<1x3x2048xf32>
    tpu.vector_store %arg5[%c0_7, %c0_8, %c0_9], %11 {strides = array<i32>} : memref<1x3x2048xf32, #tpu.memory_space<vmem>>, vector<1x3x2048xf32>,
    return
  }
  func.func @transform_0(%arg0: i32, %arg1: i32) -> (i32, i32, i32) {
    %c0_i32 = arith.constant 0 : i32
    %c0_i32_0 = arith.constant 0 : i32
    %c0_i32_1 = arith.constant 0 : i32
    return %arg0, %c0_i32, %c0_i32_0 : i32, i32, i32
  }
  func.func @transform_1(%arg0: i32, %arg1: i32) -> (i32, i32, i32) {
    %c0_i32 = arith.constant 0 : i32
    %c0_i32_0 = arith.constant 0 : i32
    return %arg0, %c0_i32, %arg1 : i32, i32, i32
  }
  func.func @transform_2(%arg0: i32, %arg1: i32) -> (i32, i32) {
    %c0_i32 = arith.constant 0 : i32
    %c0_i32_0 = arith.constant 0 : i32
    %c0_i32_1 = arith.constant 0 : i32
    return %c0_i32, %c0_i32_0 : i32, i32
  }
  func.func @transform_3(%arg0: i32, %arg1: i32) -> (i32, i32, i32) {
    %c0_i32 = arith.constant 0 : i32
    %c0_i32_0 = arith.constant 0 : i32
    return %arg0, %c0_i32, %arg1 : i32, i32, i32
  }
}

</mosaic_0001>

<bundles_post_ra>
// kernel: tile.38
= control target key start
LH: loop header
LB: loop body
LE: loop exit
PB: predicated region body
PF: predicated region fallthrough
CT: control target
= control target key end

     0   :  { %s22_s0 = inlined_call_operand.vmem [shape: f32[64], index: 0, kind: input, shape index: {}]   ;;  %s23_s1 = inlined_call_operand.vmem [shape: f32[2,64], index: 1, kind: output, shape index: {}]  }
   0x1   :  { %v4_v0 = vld [vmem:[%s22_s0] ss:$0 sm:$0xff] }
   0x2   :  { %5 = vst [vmem:[%s23_s1] sm:$0x3] %v4_v0 }

// kernel: tile.39
= control target key start
LH: loop header
LB: loop body
LE: loop exit
PB: predicated region body
PF: predicated region fallthrough
CT: control target
= control target key end

     0   :  { %vm7_vm0 = vcmask 523264   ;;  %vm13_vm1 = vcmask 1048064   ;;  %s39_s0 = inlined_call_operand.vmem [shape: f32[2,64], index: 0, kind: input, shape index: {}]   ;;  %s40_s1 = inlined_call_operand.vmem [shape: f32[1,128], index: 1, kind: output, shape index: {}]  }
   0x1   :  { %v4_v0 = vld [vmem:[%s39_s0] sm:$0x3]  ;;  %s22_s0 = smov 64  }
   0x2   :  { %5 = vst [vmem:[#allocation1] sm:$0x3] %v4_v0 }
   0x9   :  { %v10_v1 = vld [vmem:[#allocation1 + $0x1] sm:$0x1]   ;;  %v6_v2 = vld [vmem:[#allocation1] sm:$0x1]  }
   0xa   :  { %11 = vrot.lane.b32.xlu0 %v10_v1, %s22_s0  ;;  %8 = vst.msk [vmem:[#allocation0] sm:$0x1] %vm7_vm0, %v6_v2  }
  0x7c   :  { %v12_v3 = vpop.permute.xlu0 %11  }
  0x7d   :  { %14 = vst.msk [vmem:[#allocation0] sm:$0x1] %vm13_vm1, %v12_v3  }
  0x84   :  { %v18_v4 = vld [vmem:[#allocation0] sm:$0x1] }
  0x85   :  { %20 = vst [vmem:[%s40_s1] sm:$0x1] %v18_v4 }

// kernel: _lambda_.8
= control target key start
LH: loop header
LB: loop body
LE: loop exit
PB: predicated region body
PF: predicated region fallthrough
CT: control target
= control target key end

     0   :  { %9 = vsyncpa [#allocation3], 0  ;;  %s1227_s0 = inlined_call_operand.vmem [shape: bf16[2,16], index: 0, kind: input, shape index: {}]   ;;  %s1228_s1 = inlined_call_operand.vmem [shape: bf16[16,2048], index: 1, kind: input, shape index: {}]   ;;  %s1229_s2 = inlined_call_operand.hbm [shape: f32[1,128], index: 2, kind: input, shape index: {}]   ;;  %s1230_s3 = inlined_call_operand.hbm [shape: f32[1,128], index: 3, kind: input, shape index: {}]   ;;  %s1231_s4 = inlined_call_operand.vmem [shape: bf16[2,2048], index: 4, kind: output, shape index: {}]  }
   0x1   :  { %10 = vsyncpa [#allocation5], 0  ;;  %s932_s15 = smov [#allocation2]   ;;  %s933_s17 = smov [#allocation4]  }
   0x2   :  { %s21_s16 = sshll.u32 %s932_s15, 4  ;;  %s31_s18 = sshll.u32 %s933_s17, 4  ;;  %s22_s16 = int_to_ptr.vmem [resolvable:$true] %s21_s16  ;;  %s32_s18 = int_to_ptr.vmem [resolvable:$true] %s31_s18 }
   0x3   :  { %s884_s21 = scalar_lea.hbm %s1229_s2, 16 }
   0x4   :  { %p885_p0 = scmp.ne.s32.totalorder %s1229_s2, %s884_s21  ;;  %p888_p1 = scmp.lt.u32.totalorder %s884_s21, %s1229_s2 }
   0x6   :  { %p890_p2 = pnand %p888_p1, %p885_p0 }
   0x8   :  { %893 = shalt.err (!%p890_p2)
}
   0x9   :  { %s894_s26 = scalar_lea.vmem %s22_s16, 16  ;;  %s898_s27 = scalar_lea.vmem %s22_s16, 32 }
   0xa   :  { %p895_p3 = scmp.ne.s32.totalorder %s22_s16, %s894_s26  ;;  %p899_p4 = scmp.lt.s32.totalorder %s22_s16, %s22_s16 }
   0xb   :  { %p900_p5 = scmp.lt.s32.totalorder %s898_s27, %s894_s26 }
   0xd   :  { %p901_p6 = por %p900_p5, %p899_p4 }
   0xf   :  { %p902_p7 = pnand %p901_p6, %p895_p3 }
  0x11   :  { %905 = shalt.err (!%p902_p7)
}
  0x12   :  { %24 = dma.hbm_to_vmem [thread:$0]  %s1229_s2, 16, %s22_s16, [#allocation3]  }
  0x13   :  { %s906_s6 = scalar_lea.hbm %s1230_s3, 16 }
  0x14   :  { %p907_p8 = scmp.ne.s32.totalorder %s1230_s3, %s906_s6  ;;  %p910_p9 = scmp.lt.u32.totalorder %s906_s6, %s1230_s3 }
  0x16   :  { %p912_p10 = pnand %p910_p9, %p907_p8 }
  0x18   :  { %915 = shalt.err (!%p912_p10)
}
  0x19   :  { %s916_s11 = scalar_lea.vmem %s32_s18, 16  ;;  %s920_s12 = scalar_lea.vmem %s32_s18, 32 }
  0x1a   :  { %p917_p11 = scmp.ne.s32.totalorder %s32_s18, %s916_s11  ;;  %p921_p12 = scmp.lt.s32.totalorder %s32_s18, %s32_s18 }
  0x1b   :  { %p922_p13 = scmp.lt.s32.totalorder %s920_s12, %s916_s11 }
  0x1d   :  { %p923_p0 = por %p922_p13, %p921_p12 }
  0x1f   :  { %p924_p1 = pnand %p923_p0, %p917_p11 }
  0x21   :  { %927 = shalt.err (!%p924_p1)
}
  0x22   :  { %34 = dma.hbm_to_vmem [thread:$0]  %s1230_s3, 16, %s32_s18, [#allocation5]  }
  0x23   :  { %928 = dma.done.wait [#allocation3], 16  }
  0x24   :  { %929 = vsyncadd [#allocation3], 4294967280 }
  0x25   :  { %930 = dma.done.wait [#allocation5], 16  }
  0x26   :  { %931 = vsyncadd [#allocation5], 4294967280  ;;  %v934_v0 = vmov 0   ;;  %v43_v1 = vld [vmem:[%s1228_s1] sm:$0xff]  ;;  %v44_v3 = vld [vmem:[%s1228_s1 + $0x8] sm:$0xff]  ;;  %vm139_vm0 = vcmask 130048  }
  0x27   :  { %175 = vmatprep.mubr.bf16.mxu0 %v934_v0  ;;  %216 = vmatprep.mubr.bf16.mxu1 %v934_v0  ;;  %v51_v2 = vld [vmem:[%s1228_s1 + $0x40] sm:$0xff]  ;;  %v52_v5 = vld [vmem:[%s1228_s1 + $0x48] sm:$0xff]  ;;  %v45_v7 = vld [vmem:[%s1228_s1 + $0x10] sm:$0xff]  ;;  %vm471_vm1 = vcmask 1041408  }
  0x28   :  { %v856_v4 = vcombine.high %v43_v1, %v51_v2  ;;  %v855_v6 = vcombine.low %v43_v1, %v51_v2  ;;  %v858_v8 = vcombine.high %v44_v3, %v52_v5  ;;  %v857_v9 = vcombine.low %v44_v3, %v52_v5  ;;  %v53_v10 = vld [vmem:[%s1228_s1 + $0x50] sm:$0xff]  ;;  %v46_v11 = vld [vmem:[%s1228_s1 + $0x18] sm:$0xff]  ;;  %v47_v15 = vld [vmem:[%s1228_s1 + $0x20] sm:$0xff] }
  0x29   :  { %v54_v12 = vld [vmem:[%s1228_s1 + $0x58] sm:$0xff]  ;;  %v860_v13 = vcombine.high %v45_v7, %v53_v10  ;;  %v55_v16 = vld [vmem:[%s1228_s1 + $0x60] sm:$0xff]  ;;  %v859_v18 = vcombine.low %v45_v7, %v53_v10  ;;  %v48_v19 = vld [vmem:[%s1228_s1 + $0x28] sm:$0xff] }
  0x2a   :  { %143 = vmatprep.subr.bf16.mxu0 %v856_v4  ;;  %v862_v14 = vcombine.high %v46_v11, %v54_v12  ;;  %184 = vmatprep.subr.bf16.mxu1 %v858_v8  ;;  %v42_v17 = vld [vmem:[%s1227_s0] sm:$0x1]  ;;  %v56_v20 = vld [vmem:[%s1228_s1 + $0x68] sm:$0xff]  ;;  %v861_v21 = vcombine.low %v46_v11, %v54_v12  ;;  %v864_v22 = vcombine.high %v47_v15, %v55_v16  ;;  %v49_v24 = vld [vmem:[%s1228_s1 + $0x30] sm:$0xff] }
  0x2b   :  { %144 = vmatpush1.bf16.msra.mxu0 %v855_v6  ;;  %185 = vmatpush1.bf16.msra.mxu1 %v857_v9  ;;  %v866_v23 = vcombine.high %v48_v19, %v56_v20  ;;  %v57_v25 = vld [vmem:[%s1228_s1 + $0x70] sm:$0xff]  ;;  %v863_v26 = vcombine.low %v47_v15, %v55_v16  ;;  %v50_v27 = vld [vmem:[%s1228_s1 + $0x38] sm:$0xff]  ;;  %v865_v29 = vcombine.low %v48_v19, %v56_v20 }
  0x2c   :  { %225 = vmatprep.subr.bf16.mxu0 %v860_v13  ;;  %266 = vmatprep.subr.bf16.mxu1 %v862_v14  ;;  %v58_v28 = vld [vmem:[%s1228_s1 + $0x78] sm:$0xff]  ;;  %v868_v30 = vcombine.high %v49_v24, %v57_v25  ;;  %v867_v32 = vcombine.low %v49_v24, %v57_v25 }
  0x2d   :  { %v870_v31 = vcombine.high %v50_v27, %v58_v28  ;;  %v869_v33 = vcombine.low %v50_v27, %v58_v28 }
  0x2e   :  { %871 = vmatmul.mubr.msk.bf16.vlgmr.msra.gmra.mrb[0].mxu0 %vm139_vm0, %v42_v17  ;;  %872 = vmatmul.mubr.msk.bf16.vlgmr.msra.gmra.mrb[0].mxu1 %vm139_vm0, %v42_v17 }
  0x2f   :  { %226 = vmatpush1.bf16.msra.mxu0 %v859_v18  ;;  %267 = vmatpush1.bf16.msra.mxu1 %v861_v21 }
  0x30   :  { %257 = vmatprep.mubr.bf16.mxu0 %v934_v0  ;;  %298 = vmatprep.mubr.bf16.mxu1 %v934_v0 }
  0x31   :  { %307 = vmatprep.subr.bf16.mxu0 %v864_v22  ;;  %348 = vmatprep.subr.bf16.mxu1 %v866_v23 }
  0x36   :  { %873 = vmatmul.mubr.msk.bf16.vlgmr.msra.gmra.mrb[4].mxu0 %vm139_vm0, %v42_v17  ;;  %874 = vmatmul.mubr.msk.bf16.vlgmr.msra.gmra.mrb[4].mxu1 %vm139_vm0, %v42_v17 }
  0x37   :  { %308 = vmatpush1.bf16.msra.mxu0 %v863_v26  ;;  %349 = vmatpush1.bf16.msra.mxu1 %v865_v29 }
  0x38   :  { %339 = vmatprep.mubr.bf16.mxu0 %v934_v0  ;;  %380 = vmatprep.mubr.bf16.mxu1 %v934_v0 }
  0x39   :  { %389 = vmatprep.subr.bf16.mxu0 %v868_v30  ;;  %430 = vmatprep.subr.bf16.mxu1 %v870_v31 }
  0x3e   :  { %875 = vmatmul.mubr.msk.bf16.vlgmr.msra.gmra.mrb[8].mxu0 %vm139_vm0, %v42_v17  ;;  %876 = vmatmul.mubr.msk.bf16.vlgmr.msra.gmra.mrb[8].mxu1 %vm139_vm0, %v42_v17 }
  0x3f   :  { %390 = vmatpush1.bf16.msra.mxu0 %v867_v32  ;;  %431 = vmatpush1.bf16.msra.mxu1 %v869_v33 }
  0x40   :  { %421 = vmatprep.mubr.bf16.mxu0 %v934_v0  ;;  %462 = vmatprep.mubr.bf16.mxu1 %v934_v0 }
  0x46   :  { %877 = vmatmul.mubr.msk.bf16.vlgmr.msra.gmra.mrb[12].mxu0 %vm139_vm0, %v42_v17  ;;  %878 = vmatmul.mubr.msk.bf16.vlgmr.msra.gmra.mrb[12].mxu1 %vm139_vm0, %v42_v17 }
 0x101   :  { %v1051_v34 = vpop.f32.mrb[0].mxu0  ;;  %v1057_v37 = vpop.f32.mrb[0].mxu1 }
 0x102   :  { %v472_v35 = vsel %vm471_vm1, %v1051_v34, 0.0  ;;  %v480_v36 = vmul.f32 %v1051_v34, %v1051_v34  ;;  %v1059_v38 = vpop.f32.mrb[1].mxu0  ;;  %v506_v40 = vsel %vm471_vm1, %v1057_v37, 0.0  ;;  %v514_v41 = vmul.f32 %v1057_v37, %v1057_v37  ;;  %v1067_v43 = vpop.f32.mrb[1].mxu1 }
 0x103   :  { %v473_v39 = vrot.slane %v472_v35, 4  ;;  %v489_v42 = vsel %vm471_vm1, %v1059_v38, 0.0  ;;  %v181_v44 = vpop.f32.mrb[2].mxu0  ;;  %v507_v46 = vrot.slane %v506_v40, 4  ;;  %v497_v48 = vmul.f32 %v1059_v38, %v1059_v38  ;;  %v222_v50 = vpop.f32.mrb[2].mxu1 }
 0x104   :  { %v481_v45 = vsel %vm471_vm1, %v480_v36, 0.0  ;;  %v490_v47 = vrot.slane %v489_v42, 4  ;;  %v182_v49 = vpop.f32.mrb[3].mxu0  ;;  %v515_v53 = vsel %vm471_vm1, %v514_v41, 0.0  ;;  %v523_v54 = vsel %vm471_vm1, %v1067_v43, 0.0  ;;  %v223_v55 = vpop.f32.mrb[3].mxu1 }
 0x105   :  { %v474_v51 = vadd.f32 %v473_v39, %v472_v35  ;;  %v482_v52 = vrot.slane %v481_v45, 4  ;;  %v508_v56 = vadd.f32 %v507_v46, %v506_v40  ;;  %v516_v57 = vrot.slane %v515_v53, 4 }
 0x106   :  { %v491_v58 = vadd.f32 %v490_v47, %v489_v42  ;;  %v498_v59 = vsel %vm471_vm1, %v497_v48, 0.0  ;;  %v524_v63 = vrot.slane %v523_v54, 4  ;;  %v531_v3 = vmul.f32 %v1067_v43, %v1067_v43 }
 0x107   :  { %v475_v60 = vrot.slane %v474_v51, 2  ;;  %v483_v61 = vadd.f32 %v482_v52, %v481_v45  ;;  %v499_v62 = vrot.slane %v498_v59, 4  ;;  %v509_v0 = vrot.slane %v508_v56, 2 }
 0x108   :  { %v517_v1 = vadd.f32 %v516_v57, %v515_v53  ;;  %v492_v2 = vrot.slane %v491_v58, 2  ;;  %v525_v7 = vadd.f32 %v524_v63, %v523_v54  ;;  %v532_v12 = vsel %vm471_vm1, %v531_v3, 0.0 }
 0x109   :  { %v476_v4 = vadd.f32 %v475_v60, %v474_v51  ;;  %v484_v5 = vrot.slane %v483_v61, 2  ;;  %v500_v6 = vadd.f32 %v499_v62, %v498_v59  ;;  %v1078_v8 = vpop.f32.mrb[4].mxu0  ;;  %v510_v9 = vadd.f32 %v509_v0, %v508_v56  ;;  %v1081_v13 = vpop.f32.mrb[4].mxu1 }
 0x10a   :  { %v518_v10 = vrot.slane %v517_v1, 2  ;;  %v493_v11 = vadd.f32 %v492_v2, %v491_v58  ;;  %v1083_v14 = vpop.f32.mrb[5].mxu0  ;;  %v526_v18 = vrot.slane %v525_v7, 2  ;;  %v1085_v19 = vpop.f32.mrb[5].mxu1  ;;  %v533_v24 = vrot.slane %v532_v12, 4 }
 0x10b   :  { %v477_v15 = vrot.slane %v476_v4, 1  ;;  %v485_v16 = vadd.f32 %v484_v5, %v483_v61  ;;  %v501_v17 = vrot.slane %v500_v6, 2  ;;  %v263_v20 = vpop.f32.mrb[6].mxu0  ;;  %v511_v21 = vrot.slane %v510_v9, 1  ;;  %v304_v26 = vpop.f32.mrb[6].mxu1 }
 0x10c   :  { %v519_v22 = vadd.f32 %v518_v10, %v517_v1  ;;  %v494_v23 = vrot.slane %v493_v11, 1  ;;  %v264_v25 = vpop.f32.mrb[7].mxu0  ;;  %v527_v30 = vadd.f32 %v526_v18, %v525_v7  ;;  %v305_v31 = vpop.f32.mrb[7].mxu1  ;;  %v534_v36 = vadd.f32 %v533_v24, %v532_v12 }
 0x10d   :  { %v478_v27 = vadd.f32 %v477_v15, %v476_v4  ;;  %v486_v28 = vrot.slane %v485_v16, 1  ;;  %v502_v29 = vadd.f32 %v501_v17, %v500_v6  ;;  %v512_v32 = vadd.f32 %v511_v21, %v510_v9 }
 0x10e   :  { %v520_v33 = vrot.slane %v519_v22, 1  ;;  %v495_v35 = vadd.f32 %v494_v23, %v493_v11  ;;  %v528_v41 = vrot.slane %v527_v30, 1  ;;  %v540_v42 = vsel %vm471_vm1, %v1078_v8, 0.0 }
 0x10f   :  { %v487_v39 = vadd.f32 %v486_v28, %v485_v16  ;;  %v503_v40 = vrot.slane %v502_v29, 1  ;;  %v535_v46 = vrot.slane %v534_v36, 2  ;;  %v541_v47 = vrot.slane %v540_v42, 4 }
 0x110   :  { %v521_v44 = vadd.f32 %v520_v33, %v519_v22  ;;  %v496_v45 = vadd.f32 %v495_v35, %v478_v27  ;;  %v529_v49 = vadd.f32 %v528_v41, %v527_v30  ;;  %v548_v50 = vmul.f32 %v1078_v8, %v1078_v8 }
 0x111   :  { %v504_v48 = vadd.f32 %v503_v40, %v502_v29  ;;  %v574_v51 = vsel %vm471_vm1, %v1081_v13, 0.0  ;;  %v1093_v52 = vpop.f32.mrb[8].mxu0  ;;  %v536_v54 = vadd.f32 %v535_v46, %v534_v36  ;;  %v542_v55 = vadd.f32 %v541_v47, %v540_v42  ;;  %v1095_v57 = vpop.f32.mrb[8].mxu1 }
 0x112   :  { %v513_v53 = vadd.f32 %v512_v32, %v496_v45  ;;  %v575_v56 = vrot.slane %v574_v51, 4  ;;  %v1097_v58 = vpop.f32.mrb[9].mxu0  ;;  %v549_v60 = vsel %vm471_vm1, %v548_v50, 0.0  ;;  %v582_v61 = vmul.f32 %v1081_v13, %v1081_v13  ;;  %v1104_v63 = vpop.f32.mrb[9].mxu1 }
 0x113   :  { %v505_v59 = vadd.f32 %v504_v48, %v487_v39  ;;  %v557_v62 = vsel %vm471_vm1, %v1083_v14, 0.0  ;;  %v345_v0 = vpop.f32.mrb[10].mxu0  ;;  %v537_v2 = vrot.slane %v536_v54, 1  ;;  %v543_v3 = vrot.slane %v542_v55, 2  ;;  %v386_v6 = vpop.f32.mrb[10].mxu1 }
 0x114   :  { %v530_v1 = vadd.f32 %v529_v49, %v513_v53  ;;  %v550_v4 = vrot.slane %v549_v60, 4  ;;  %v346_v5 = vpop.f32.mrb[11].mxu0  ;;  %v576_v9 = vadd.f32 %v575_v56, %v574_v51  ;;  %v583_v10 = vsel %vm471_vm1, %v582_v61, 0.0  ;;  %v387_v12 = vpop.f32.mrb[11].mxu1 }
 0x115   :  { %v522_v7 = vadd.f32 %v521_v44, %v505_v59  ;;  %v558_v11 = vrot.slane %v557_v62, 4  ;;  %v538_v15 = vadd.f32 %v537_v2, %v536_v54  ;;  %v544_v16 = vadd.f32 %v543_v3, %v542_v55 }
 0x116   :  { %v551_v17 = vadd.f32 %v550_v4, %v549_v60  ;;  %v584_v18 = vrot.slane %v583_v10, 4  ;;  %v577_v20 = vrot.slane %v576_v9, 2  ;;  %v565_v22 = vmul.f32 %v1083_v14, %v1083_v14 }
 0x117   :  { %v559_v21 = vadd.f32 %v558_v11, %v557_v62  ;;  %v591_v23 = vsel %vm471_vm1, %v1085_v19, 0.0  ;;  %v539_v24 = vadd.f32 %v538_v15, %v522_v7  ;;  %v545_v25 = vrot.slane %v544_v16, 1 }
 0x118   :  { %v552_v26 = vrot.slane %v551_v17, 2  ;;  %v585_v27 = vadd.f32 %v584_v18, %v583_v10  ;;  %v578_v28 = vadd.f32 %v577_v20, %v576_v9  ;;  %v566_v30 = vsel %vm471_vm1, %v565_v22, 0.0 }
 0x119   :  { %v560_v29 = vrot.slane %v559_v21, 2  ;;  %v592_v31 = vrot.slane %v591_v23, 4  ;;  %v1112_v32 = vpop.f32.mrb[12].mxu0  ;;  %v546_v33 = vadd.f32 %v545_v25, %v544_v16  ;;  %v567_v39 = vrot.slane %v566_v30, 4  ;;  %v1114_v40 = vpop.f32.mrb[12].mxu1 }
 0x11a   :  { %v553_v35 = vadd.f32 %v552_v26, %v551_v17  ;;  %v586_v36 = vrot.slane %v585_v27, 2  ;;  %v1116_v41 = vpop.f32.mrb[13].mxu0  ;;  %v579_v42 = vrot.slane %v578_v28, 1  ;;  %v599_v46 = vmul.f32 %v1085_v19, %v1085_v19  ;;  %v1120_v47 = vpop.f32.mrb[13].mxu1 }
 0x11b   :  { %v561_v44 = vadd.f32 %v560_v29, %v559_v21  ;;  %v593_v45 = vadd.f32 %v592_v31, %v591_v23  ;;  %v427_v48 = vpop.f32.mrb[14].mxu0  ;;  %v547_v49 = vadd.f32 %v546_v33, %v530_v1  ;;  %v568_v53 = vadd.f32 %v567_v39, %v566_v30  ;;  %v468_v55 = vpop.f32.mrb[14].mxu1 }
 0x11c   :  { %v554_v50 = vrot.slane %v553_v35, 1  ;;  %v587_v51 = vadd.f32 %v586_v36, %v585_v27  ;;  %v428_v54 = vpop.f32.mrb[15].mxu0  ;;  %v580_v56 = vadd.f32 %v579_v42, %v578_v28  ;;  %v600_v61 = vsel %vm471_vm1, %v599_v46, 0.0  ;;  %v469_v62 = vpop.f32.mrb[15].mxu1 }
 0x11d   :  { %v562_v59 = vrot.slane %v561_v44, 1  ;;  %v594_v60 = vrot.slane %v593_v45, 2  ;;  %v569_v3 = vrot.slane %v568_v53, 2  ;;  %v601_v4 = vrot.slane %v600_v61, 4 }
 0x11e   :  { %v555_v0 = vadd.f32 %v554_v50, %v553_v35  ;;  %v588_v2 = vrot.slane %v587_v51, 1  ;;  %v608_v1 = vsel %vm471_vm1, %v1093_v52, 0.0  ;;  %v616_v7 = vmul.f32 %v1093_v52, %v1093_v52 }
 0x11f   :  { %v563_v5 = vadd.f32 %v562_v59, %v561_v44  ;;  %v595_v6 = vadd.f32 %v594_v60, %v593_v45  ;;  %v570_v11 = vadd.f32 %v569_v3, %v568_v53  ;;  %v602_v12 = vadd.f32 %v601_v4, %v600_v61 }
 0x120   :  { %v556_v9 = vadd.f32 %v555_v0, %v539_v24  ;;  %v589_v10 = vadd.f32 %v588_v2, %v587_v51  ;;  %v609_v17 = vrot.slane %v608_v1, 4  ;;  %v617_v18 = vsel %vm471_vm1, %v616_v7, 0.0 }
 0x121   :  { %v564_v15 = vadd.f32 %v563_v5, %v547_v49  ;;  %v596_v16 = vrot.slane %v595_v6, 1  ;;  %v571_v20 = vrot.slane %v570_v11, 1  ;;  %v603_v21 = vrot.slane %v602_v12, 2 }
 0x122   :  { %v618_v22 = vrot.slane %v617_v18, 4  ;;  %v642_v23 = vsel %vm471_vm1, %v1095_v57, 0.0  ;;  %v610_v27 = vadd.f32 %v609_v17, %v608_v1  ;;  %v650_v31 = vmul.f32 %v1095_v57, %v1095_v57 }
 0x123   :  { %v581_v25 = vadd.f32 %v580_v56, %v564_v15  ;;  %v597_v26 = vadd.f32 %v596_v16, %v595_v6  ;;  %v643_v28 = vrot.slane %v642_v23, 4  ;;  %v572_v29 = vadd.f32 %v571_v20, %v570_v11 }
 0x124   :  { %v604_v24 = vadd.f32 %v603_v21, %v602_v12  ;;  %v619_v30 = vadd.f32 %v618_v22, %v617_v18  ;;  %v611_v35 = vrot.slane %v610_v27, 2  ;;  %v625_v39 = vsel %vm471_vm1, %v1097_v58, 0.0 }
 0x125   :  { %v598_v33 = vadd.f32 %v597_v26, %v581_v25  ;;  %v644_v36 = vadd.f32 %v643_v28, %v642_v23  ;;  %v573_v42 = vadd.f32 %v572_v29, %v556_v9  ;;  %v651_v46 = vsel %vm471_vm1, %v650_v31, 0.0 }
 0x126   :  { %v605_v44 = vrot.slane %v604_v24, 1  ;;  %v620_v45 = vrot.slane %v619_v30, 2  ;;  %v612_v48 = vadd.f32 %v611_v35, %v610_v27  ;;  %v652_v50 = vrot.slane %v651_v46, 4 }
 0x127   :  { %v645_v49 = vrot.slane %v644_v36, 2  ;;  %v626_v51 = vrot.slane %v625_v39, 4  ;;  %v590_v53 = vadd.f32 %v589_v10, %v573_v42  ;;  %v633_v56 = vmul.f32 %v1097_v58, %v1097_v58 }
 0x128   :  { %v606_v54 = vadd.f32 %v605_v44, %v604_v24  ;;  %v621_v55 = vadd.f32 %v620_v45, %v619_v30  ;;  %v613_v59 = vrot.slane %v612_v48, 1  ;;  %v653_v61 = vadd.f32 %v652_v50, %v651_v46 }
 0x129   :  { %v646_v60 = vadd.f32 %v645_v49, %v644_v36  ;;  %v627_v62 = vadd.f32 %v626_v51, %v625_v39  ;;  %v634_v3 = vsel %vm471_vm1, %v633_v56, 0.0  ;;  %v659_v4 = vsel %vm471_vm1, %v1104_v63, 0.0 }
 0x12a   :  { %v607_v0 = vadd.f32 %v606_v54, %v590_v53  ;;  %v622_v2 = vrot.slane %v621_v55, 1  ;;  %v614_v5 = vadd.f32 %v613_v59, %v612_v48  ;;  %v654_v1 = vrot.slane %v653_v61, 2 }
 0x12b   :  { %v647_v6 = vrot.slane %v646_v60, 1  ;;  %v628_v7 = vrot.slane %v627_v62, 2  ;;  %v635_v10 = vrot.slane %v634_v3, 4  ;;  %v660_v11 = vrot.slane %v659_v4, 4 }
 0x12c   :  { %v623_v9 = vadd.f32 %v622_v2, %v621_v55  ;;  %v667_v12 = vmul.f32 %v1104_v63, %v1104_v63  ;;  %v615_v15 = vadd.f32 %v614_v5, %v598_v33  ;;  %v655_v16 = vadd.f32 %v654_v1, %v653_v61 }
 0x12d   :  { %v629_v17 = vadd.f32 %v628_v7, %v627_v62  ;;  %v636_v20 = vadd.f32 %v635_v10, %v634_v3  ;;  %v661_v21 = vadd.f32 %v660_v11, %v659_v4  ;;  %v648_v23 = vadd.f32 %v647_v6, %v646_v60 }
 0x12e   :  { %v624_v18 = vadd.f32 %v623_v9, %v607_v0  ;;  %v668_v22 = vsel %vm471_vm1, %v667_v12, 0.0  ;;  %v676_v27 = vsel %vm471_vm1, %v1112_v32, 0.0  ;;  %v684_v30 = vmul.f32 %v1112_v32, %v1112_v32 }
 0x12f   :  { %v630_v25 = vrot.slane %v629_v17, 1  ;;  %v669_v26 = vrot.slane %v668_v22, 4  ;;  %v637_v28 = vrot.slane %v636_v20, 2  ;;  %v662_v29 = vrot.slane %v661_v21, 2 }
 0x130   :  { %v677_v24 = vrot.slane %v676_v27, 4  ;;  %v656_v31 = vrot.slane %v655_v16, 1  ;;  %v710_v36 = vsel %vm471_vm1, %v1114_v40, 0.0  ;;  %v685_v45 = vsel %vm471_vm1, %v684_v30, 0.0 }
 0x131   :  { %v631_v33 = vadd.f32 %v630_v25, %v629_v17  ;;  %v670_v35 = vadd.f32 %v669_v26, %v668_v22  ;;  %v638_v39 = vadd.f32 %v637_v28, %v636_v20  ;;  %v663_v42 = vadd.f32 %v662_v29, %v661_v21 }
 0x132   :  { %v678_v44 = vadd.f32 %v677_v24, %v676_v27  ;;  %v686_v49 = vrot.slane %v685_v45, 4  ;;  %v711_v50 = vrot.slane %v710_v36, 4  ;;  %v718_v55 = vmul.f32 %v1114_v40, %v1114_v40 }
 0x133   :  { %v632_v46 = vadd.f32 %v631_v33, %v615_v15  ;;  %v671_v48 = vrot.slane %v670_v35, 2  ;;  %v639_v51 = vrot.slane %v638_v39, 1  ;;  %v664_v53 = vrot.slane %v663_v42, 1 }
 0x134   :  { %v679_v54 = vrot.slane %v678_v44, 2  ;;  %v687_v60 = vadd.f32 %v686_v49, %v685_v45  ;;  %v712_v61 = vadd.f32 %v711_v50, %v710_v36  ;;  %v719_v3 = vsel %vm471_vm1, %v718_v55, 0.0 }
 0x135   :  { %v649_v56 = vadd.f32 %v648_v23, %v632_v46  ;;  %v672_v59 = vadd.f32 %v671_v48, %v670_v35  ;;  %v640_v62 = vadd.f32 %v639_v51, %v638_v39  ;;  %v665_v0 = vadd.f32 %v664_v53, %v663_v42 }
 0x136   :  { %v680_v2 = vadd.f32 %v679_v54, %v678_v44  ;;  %v657_v4 = vadd.f32 %v656_v31, %v655_v16  ;;  %v688_v6 = vrot.slane %v687_v60, 2  ;;  %v720_v1 = vrot.slane %v719_v3, 4 }
 0x137   :  { %v673_v5 = vrot.slane %v672_v59, 1  ;;  %v641_v7 = vadd.f32 %v640_v62, %v624_v18  ;;  %v666_v9 = vadd.f32 %v665_v0, %v649_v56  ;;  %v693_v11 = vsel %vm471_vm1, %v1116_v41, 0.0 }
 0x138   :  { %v681_v10 = vrot.slane %v680_v2, 1  ;;  %v689_v15 = vadd.f32 %v688_v6, %v687_v60  ;;  %v713_v17 = vrot.slane %v712_v61, 2  ;;  %v721_v20 = vadd.f32 %v720_v1, %v719_v3 }
 0x139   :  { %v674_v12 = vadd.f32 %v673_v5, %v672_v59  ;;  %v658_v21 = vadd.f32 %v657_v4, %v641_v7  ;;  %v694_v23 = vrot.slane %v693_v11, 4  ;;  %v701_v25 = vmul.f32 %v1116_v41, %v1116_v41 }
 0x13a   :  { %v682_v22 = vadd.f32 %v681_v10, %v680_v2  ;;  %v690_v16 = vrot.slane %v689_v15, 1  ;;  %v727_v26 = vsel %vm471_vm1, %v1120_v47, 0.0  ;;  %v722_v30 = vrot.slane %v721_v20, 2 }
 0x13b   :  { %v675_v18 = vadd.f32 %v674_v12, %v658_v21  ;;  %v695_v28 = vadd.f32 %v694_v23, %v693_v11  ;;  %v702_v29 = vsel %vm471_vm1, %v701_v25, 0.0  ;;  %v714_v33 = vadd.f32 %v713_v17, %v712_v61 }
 0x13c   :  { %v683_v27 = vadd.f32 %v682_v22, %v666_v9  ;;  %v691_v24 = vadd.f32 %v690_v16, %v689_v15  ;;  %v703_v31 = vrot.slane %v702_v29, 4  ;;  %v728_v36 = vrot.slane %v727_v26, 4 }
 0x13d   :  { %v696_v35 = vrot.slane %v695_v28, 2  ;;  %v735_v39 = vmul.f32 %v1120_v47, %v1120_v47  ;;  %v723_v49 = vadd.f32 %v722_v30, %v721_v20  ;;  %v715_v53 = vrot.slane %v714_v33, 1 }
 0x13e   :  { %v692_v42 = vadd.f32 %v691_v24, %v675_v18  ;;  %v704_v44 = vadd.f32 %v703_v31, %v702_v29  ;;  %v729_v46 = vadd.f32 %v728_v36, %v727_v26  ;;  %v750_v29 = vld [vmem:[#allocation2] sm:$0x1] }
 0x13f   :  { %v697_v45 = vadd.f32 %v696_v35, %v695_v28  ;;  %v736_v48 = vsel %vm471_vm1, %v735_v39, 0.0  ;;  %v724_v62 = vrot.slane %v723_v49, 1  ;;  %v716_v3 = vadd.f32 %v715_v53, %v714_v33  ;;  %v754_v33 = vld [vmem:[#allocation4] sm:$0x1] }
 0x140   :  { %v705_v50 = vrot.slane %v704_v44, 2  ;;  %v737_v51 = vrot.slane %v736_v48, 4  ;;  %v730_v55 = vrot.slane %v729_v46, 2 }
 0x141   :  { %v698_v54 = vrot.slane %v697_v45, 1  ;;  %v725_v10 = vadd.f32 %v724_v62, %v723_v49 }
 0x142   :  { %v706_v56 = vadd.f32 %v705_v50, %v704_v44  ;;  %v738_v59 = vadd.f32 %v737_v51, %v736_v48  ;;  %v731_v61 = vadd.f32 %v730_v55, %v729_v46 }
 0x143   :  { %v699_v60 = vadd.f32 %v698_v54, %v697_v45 }
 0x144   :  { %v707_v0 = vrot.slane %v706_v56, 1  ;;  %v739_v2 = vrot.slane %v738_v59, 2  ;;  %v732_v5 = vrot.slane %v731_v61, 1 }
 0x145   :  { %v700_v4 = vadd.f32 %v699_v60, %v683_v27  ;;  %v758_v27 = vlaneseq }
 0x146   :  { %v708_v6 = vadd.f32 %v707_v0, %v706_v56  ;;  %v740_v1 = vadd.f32 %v739_v2, %v738_v59  ;;  %v733_v9 = vadd.f32 %v732_v5, %v731_v61 }
 0x147   :  { %v717_v7 = vadd.f32 %v716_v3, %v700_v4  ;;  %v759_v28 = vshrl.u32 %v758_v27, 7 }
 0x148   :  { %v709_v11 = vadd.f32 %v708_v6, %v692_v42  ;;  %v741_v12 = vrot.slane %v740_v1, 1 }
 0x149   :  { %v734_v15 = vadd.f32 %v733_v9, %v717_v7  ;;  %v760_v24 = vsub.s32 0, %v759_v28 }
 0x14a   :  { %v726_v17 = vadd.f32 %v725_v10, %v709_v11  ;;  %v742_v20 = vadd.f32 %v741_v12, %v740_v1 }
 0x14b   :  { %v745_v21 = vmul.f32 0.03125, %v734_v15 }
 0x14c   :  { %v743_v22 = vadd.f32 %v742_v20, %v726_v17 }
 0x14d   :  { %v747_v23 = vmul.f32 %v745_v21, %v745_v21 }
 0x14e   :  { %v746_v25 = vmul.f32 0.03125, %v743_v22 }
 0x150   :  { %v748_v16 = vsub.f32 %v746_v25, %v747_v23 }
 0x152   :  { %v749_v26 = vmax.f32 %v748_v16, 0.0 }
 0x154   :  { %v751_v18 = vadd.f32 1e-05, %v749_v26 }
 0x156   :  { %882 = vrsqrt.f32 %v751_v18 }
 0x160   :  { %v883_v30 = vpop.eup %882 }
 0x161   :  { %v753_v31 = vmul.f32 %v883_v30, %v750_v29 }
 0x163   :  { %v755_v35 = vmul.f32 %v753_v31, %v745_v21  ;;  %v761_v36 = vrot.slane %v753_v31, %v760_v24 }
 0x165   :  { %v756_v39 = vsub.f32 %v754_v33, %v755_v35  ;;  %v763_v42 = vmul.f32 %v761_v36, %v1051_v34  ;;  %v774_v44 = vmul.f32 %v761_v36, %v1059_v38  ;;  %v779_v45 = vmul.f32 %v761_v36, %v1057_v37 }
 0x166   :  { %v784_v46 = vmul.f32 %v761_v36, %v1067_v43  ;;  %v789_v48 = vmul.f32 %v761_v36, %v1078_v8  ;;  %v794_v49 = vmul.f32 %v761_v36, %v1083_v14  ;;  %v799_v50 = vmul.f32 %v761_v36, %v1081_v13 }
 0x167   :  { %v768_v51 = vrot.slane %v756_v39, %v760_v24  ;;  %v804_v53 = vmul.f32 %v761_v36, %v1085_v19  ;;  %v809_v54 = vmul.f32 %v761_v36, %v1093_v52  ;;  %v814_v55 = vmul.f32 %v761_v36, %v1097_v58 }
 0x168   :  { %v819_v34 = vmul.f32 %v761_v36, %v1095_v57  ;;  %v824_v38 = vmul.f32 %v761_v36, %v1104_v63  ;;  %v829_v37 = vmul.f32 %v761_v36, %v1112_v32  ;;  %v834_v43 = vmul.f32 %v761_v36, %v1116_v41 }
 0x169   :  { %v770_v8 = vadd.f32 %v768_v51, %v763_v42  ;;  %v775_v56 = vadd.f32 %v774_v44, %v768_v51  ;;  %v780_v14 = vadd.f32 %v779_v45, %v768_v51  ;;  %v785_v59 = vadd.f32 %v784_v46, %v768_v51 }
 0x16a   :  { %v790_v13 = vadd.f32 %v789_v48, %v768_v51  ;;  %v795_v60 = vadd.f32 %v794_v49, %v768_v51  ;;  %v800_v61 = vadd.f32 %v799_v50, %v768_v51  ;;  %v805_v19 = vadd.f32 %v804_v53, %v768_v51 }
 0x16b   :  { %v771_v62 = vmax.f32 %v770_v8, 0.0  ;;  %v776_v52 = vmax.f32 %v775_v56, 0.0  ;;  %v781_v0 = vmax.f32 %v780_v14, 0.0  ;;  %v786_v58 = vmax.f32 %v785_v59, 0.0 }
 0x16c   :  { %v791_v2 = vmax.f32 %v790_v13, 0.0  ;;  %v796_v57 = vmax.f32 %v795_v60, 0.0  ;;  %v801_v3 = vmax.f32 %v800_v61, 0.0  ;;  %v806_v63 = vmax.f32 %v805_v19, 0.0 }
 0x16d   :  { %v772_v4 = vpack.c.bf16 %v771_v62, %v771_v62  ;;  %v777_v32 = vpack.c.bf16 %v776_v52, %v776_v52  ;;  %v782_v5 = vpack.c.bf16 %v781_v0, %v781_v0  ;;  %v787_v41 = vpack.c.bf16 %v786_v58, %v786_v58 }
 0x16e   :  { %v792_v6 = vpack.c.bf16 %v791_v2, %v791_v2  ;;  %v797_v1 = vpack.c.bf16 %v796_v57, %v796_v57  ;;  %v802_v7 = vpack.c.bf16 %v801_v3, %v801_v3  ;;  %v807_v9 = vpack.c.bf16 %v806_v63, %v806_v63 }
 0x16f   :  { %773 = vst [vmem:[%s1231_s4] sm:$0x1] %v772_v4  ;;  %778 = vst [vmem:[%s1231_s4 + $0x1] sm:$0x1] %v777_v32  ;;  %v810_v10 = vadd.f32 %v809_v54, %v768_v51  ;;  %v815_v11 = vadd.f32 %v814_v55, %v768_v51  ;;  %v820_v12 = vadd.f32 %v819_v34, %v768_v51 }
 0x170   :  { %783 = vst [vmem:[%s1231_s4 + $0x2] sm:$0x1] %v782_v5  ;;  %788 = vst [vmem:[%s1231_s4 + $0x3] sm:$0x1] %v787_v41  ;;  %v825_v15 = vadd.f32 %v824_v38, %v768_v51  ;;  %v830_v17 = vadd.f32 %v829_v37, %v768_v51  ;;  %v835_v20 = vadd.f32 %v834_v43, %v768_v51 }
 0x171   :  { %793 = vst [vmem:[%s1231_s4 + $0x4] sm:$0x1] %v792_v6  ;;  %798 = vst [vmem:[%s1231_s4 + $0x5] sm:$0x1] %v797_v1  ;;  %v839_v21 = vmul.f32 %v761_v36, %v1114_v40  ;;  %v844_v22 = vmul.f32 %v761_v36, %v1120_v47  ;;  %v811_v23 = vmax.f32 %v810_v10, 0.0  ;;  %v816_v25 = vmax.f32 %v815_v11, 0.0 }
 0x172   :  { %803 = vst [vmem:[%s1231_s4 + $0x6] sm:$0x1] %v802_v7  ;;  %808 = vst [vmem:[%s1231_s4 + $0x7] sm:$0x1] %v807_v9  ;;  %v821_v16 = vmax.f32 %v820_v12, 0.0  ;;  %v826_v26 = vmax.f32 %v825_v15, 0.0 }
 0x173   :  { %v831_v18 = vmax.f32 %v830_v17, 0.0  ;;  %v836_v27 = vmax.f32 %v835_v20, 0.0  ;;  %v840_v28 = vadd.f32 %v839_v21, %v768_v51  ;;  %v845_v29 = vadd.f32 %v844_v22, %v768_v51 }
 0x174   :  { %v812_v24 = vpack.c.bf16 %v811_v23, %v811_v23  ;;  %v817_v30 = vpack.c.bf16 %v816_v25, %v816_v25  ;;  %v822_v31 = vpack.c.bf16 %v821_v16, %v821_v16  ;;  %v827_v33 = vpack.c.bf16 %v826_v26, %v826_v26 }
 0x175   :  { %v832_v35 = vpack.c.bf16 %v831_v18, %v831_v18  ;;  %v837_v39 = vpack.c.bf16 %v836_v27, %v836_v27  ;;  %v841_v42 = vmax.f32 %v840_v28, 0.0  ;;  %v846_v44 = vmax.f32 %v845_v29, 0.0 }
 0x176   :  { %813 = vst [vmem:[%s1231_s4 + $0x8] sm:$0x1] %v812_v24  ;;  %818 = vst [vmem:[%s1231_s4 + $0x9] sm:$0x1] %v817_v30 }
 0x177   :  { %823 = vst [vmem:[%s1231_s4 + $0xa] sm:$0x1] %v822_v31  ;;  %828 = vst [vmem:[%s1231_s4 + $0xb] sm:$0x1] %v827_v33  ;;  %v842_v40 = vpack.c.bf16 %v841_v42, %v841_v42  ;;  %v847_v47 = vpack.c.bf16 %v846_v44, %v846_v44 }
 0x178   :  { %833 = vst [vmem:[%s1231_s4 + $0xc] sm:$0x1] %v832_v35  ;;  %838 = vst [vmem:[%s1231_s4 + $0xd] sm:$0x1] %v837_v39 }
 0x179   :  { %843 = vst [vmem:[%s1231_s4 + $0xe] sm:$0x1] %v842_v40  ;;  %848 = vst [vmem:[%s1231_s4 + $0xf] sm:$0x1] %v847_v47 }
 0x17a   :  { %853 = vsyncpa [#allocation3], 1 }
 0x17b   :  { %854 = vsyncpa [#allocation5], 1 }

// kernel: _lambda_.10
= control target key start
LH: loop header
LB: loop body
LE: loop exit
PB: predicated region body
PF: predicated region fallthrough
CT: control target
= control target key end

     0   :  { %s222_s0 = inlined_call_operand.vmem [shape: bf16[64,128], index: 0, kind: input, shape index: {}]   ;;  %s223_s1 = inlined_call_operand.vmem [shape: f32[1,128], index: 1, kind: input, shape index: {}]   ;;  %s224_s2 = inlined_call_operand.vmem [shape: f32[1,128], index: 2, kind: input, shape index: {}]   ;;  %s225_s3 = inlined_call_operand.vmem [shape: bf16[64,128], index: 3, kind: output, shape index: {}]  }
   0x1   :  { %v131_v0 = vld [vmem:[%s222_s0] sm:$0xff]   ;;  %v166_v4 = vld [vmem:[%s222_s0 + $0x8] sm:$0xff]   ;;  %v167_v5 = vld [vmem:[%s222_s0 + $0x10] sm:$0xff]  }
   0x2   :  { %v112_v1 = vld [vmem:[%s223_s1] ss:$0 sm:$0xff]  ;;  %v132_v2 = vunpack.c.l.bf16 %v131_v0  ;;  %v133_v3 = vunpack.c.h.bf16 %v131_v0  ;;  %v168_v6 = vld [vmem:[%s222_s0 + $0x18] sm:$0xff]   ;;  %v136_v8 = vunpack.c.l.bf16 %v166_v4  ;;  %v137_v9 = vunpack.c.h.bf16 %v166_v4 }
   0x3   :  { %v113_v7 = vld [vmem:[%s224_s2] ss:$0 sm:$0xff]  ;;  %v140_v10 = vunpack.c.l.bf16 %v167_v5  ;;  %v141_v11 = vunpack.c.h.bf16 %v167_v5  ;;  %v144_v14 = vunpack.c.l.bf16 %v168_v6  ;;  %v145_v15 = vunpack.c.h.bf16 %v168_v6 }
   0x4   :  { %v37_v12 = vmul.f32 %v132_v2, %v112_v1  ;;  %v38_v13 = vmul.f32 %v133_v3, %v112_v1  ;;  %v39_v16 = vmul.f32 %v136_v8, %v112_v1  ;;  %v40_v17 = vmul.f32 %v137_v9, %v112_v1 }
   0x5   :  { %v41_v18 = vmul.f32 %v140_v10, %v112_v1  ;;  %v42_v19 = vmul.f32 %v141_v11, %v112_v1  ;;  %v43_v22 = vmul.f32 %v144_v14, %v112_v1  ;;  %v44_v23 = vmul.f32 %v145_v15, %v112_v1 }
   0x6   :  { %v52_v20 = vadd.f32 %v113_v7, %v37_v12  ;;  %v53_v21 = vadd.f32 %v113_v7, %v38_v13  ;;  %v54_v24 = vadd.f32 %v113_v7, %v39_v16  ;;  %v55_v25 = vadd.f32 %v113_v7, %v40_v17 }
   0x7   :  { %v56_v26 = vadd.f32 %v113_v7, %v41_v18  ;;  %v57_v27 = vadd.f32 %v113_v7, %v42_v19  ;;  %v58_v30 = vadd.f32 %v113_v7, %v43_v22  ;;  %v59_v31 = vadd.f32 %v113_v7, %v44_v23 }
   0x8   :  { %v60_v28 = vmax.f32 %v52_v20, 0.0  ;;  %v61_v29 = vmax.f32 %v53_v21, 0.0  ;;  %v62_v32 = vmax.f32 %v54_v24, 0.0  ;;  %v63_v33 = vmax.f32 %v55_v25, 0.0 }
   0x9   :  { %v64_v34 = vmax.f32 %v56_v26, 0.0  ;;  %v65_v35 = vmax.f32 %v57_v27, 0.0  ;;  %v66_v37 = vmax.f32 %v58_v30, 0.0  ;;  %v67_v38 = vmax.f32 %v59_v31, 0.0 }
   0xa   :  { %v149_v36 = vpack.c.bf16 %v61_v29, %v60_v28  ;;  %v154_v39 = vpack.c.bf16 %v63_v33, %v62_v32 }
   0xb   :  { %v159_v40 = vpack.c.bf16 %v65_v35, %v64_v34  ;;  %v164_v41 = vpack.c.bf16 %v67_v38, %v66_v37 }
   0xc   :  { %150 = vst [vmem:[%s225_s3] sm:$0xff] %v149_v36   ;;  %169 = vst [vmem:[%s225_s3 + $0x8] sm:$0xff] %v154_v39  }
   0xd   :  { %170 = vst [vmem:[%s225_s3 + $0x10] sm:$0xff] %v159_v40   ;;  %171 = vst [vmem:[%s225_s3 + $0x18] sm:$0xff] %v164_v41  }

// kernel: _lambda_.9
= control target key start
LH: loop header
LB: loop body
LE: loop exit
PB: predicated region body
PF: predicated region fallthrough
CT: control target
= control target key end

     0   :  { %10 = vsyncpa [#allocation3], 0  ;;  %s1547_s0 = inlined_call_operand.vmem [shape: bf16[4,32,512], index: 0, kind: input, shape index: {}]   ;;  %s1548_s1 = inlined_call_operand.hbm [shape: bf16[4,512,64], index: 1, kind: input, shape index: {}]   ;;  %s1549_s2 = inlined_call_operand.vmem [shape: bf16[4,32,64], index: 2, kind: output, shape index: {0}]   ;;  %s1550_s3 = inlined_call_operand.vmem [shape: f32[4,1,1,64], index: 3, kind: output, shape index: {1}]   ;;  %s1551_s4 = inlined_call_operand.vmem [shape: f32[4,1,1,64], index: 4, kind: output, shape index: {2}]  }
   0x1   :  { %12 = vsyncpa [#allocation3 + $0x1], 0  ;;  %s1356_s15 = smov 0   ;;  %s1358_s16 = smov 0  }
   0x2   :  { %s1360_s17 = smov 0   ;;  %s1362_s18 = smov 0  }
   0x3   :  { %s1364_s19 = smov 0   ;;  %s1366_s20 = smov 0  }
   0x4 LB: > { %s1023_s21 = sadd.s32 4294967295, %s1326_s20   ;;  %s37_s22 = sadd.s32 1, %s1322_s19  ;;  %s1326_s20 = sphi %s1366_s20, %s18_s20   ;;  %s1322_s19 = sphi %s1364_s19, %s1559_s19   ;;  %s1318_s18 = sphi %s1362_s18, %s1558_s18   ;;  %s1314_s17 = sphi %s1360_s17, %s1557_s17   ;;  %s1310_s16 = sphi %s1358_s16, %s1556_s16   ;;  %s1306_s15 = sphi %s1356_s15, %s1555_s15  }
   0x5   : > { %p39_p0 = scmp.ge.s32.totalorder %s37_s22, 4  ;;  %s74_s23 = sadd.s32 1, %s1314_s17 }
   0x6   : > { %p81_p1 = scmp.ne.s32.totalorder %s1314_s17, %s1310_s16  ;;  %p82_p2 = scmp.eq.s32.totalorder %s1326_s20, 0 }
   0x7   : > { %s1561_s22 = smov (%p39_p0, %s37_s22), 0  ;;  %p87_p4 = scmp.ne.s32.totalorder %s1310_s16, %s1306_s15 }
   0x8   : > { %p1392_p3 = por %p82_p2, %p81_p1  ;;  %s69_s25 = ssub.s32 %s1322_s19, %s1561_s22 }
   0x9   : > { %p88_p5 = scmp.eq.s32.totalorder %s1023_s21, 0  ;;  %p72_p6 = scmp.eq.s32.totalorder %s69_s25, 0 }
   0xa   : > { %p1151_p8 = scmp.lt.s32.totalorder %s1326_s20, 4  ;;  %s215_s28 = sand.u32 1, %s1314_s17  }
   0xb   : > { %p1399_p7 = por %p88_p5, %p87_p4  ;;  %s1082_s29 = sshll.u32 %s1322_s19, 12 }
   0xc   : > { %s1405_s27 = scalar_select %p72_p6, %s1314_s17, %s74_s23  }
   0xd   : > { %s1027_s30 = sshll.u32 %s215_s28, 8  ;;  %s1412_s7 = scalar_lea.hbm %s1548_s1, %s1082_s29 }
   0xe   : > { %s219_s8 = scalar_lea.vmem [#allocation2], %s1027_s30  ;;  %p1416_p9 = pnand %p1151_p8, %p1392_p3 }
   0xf   : > { %s227_s9 = sshll.u32 %s219_s8, 4  ;;  %s1422_s11 = scalar_lea.sflag [#allocation3], %s215_s28  ;;  %s1420_s9 = int_to_ptr.vmem [resolvable:$true] %s227_s9 }
  0x10   : > { %s1246_s12 = scalar_lea.hbm %s1412_s7, 4096  ;;  %p1248_p11 = pneg %p1416_p9 }
  0x11   : > { %p1247_p10 = scmp.ne.s32.totalorder %s1412_s7, %s1246_s12  ;;  %s1251_s15 = scalar_lea.hbm %s1548_s1, 16384 }
  0x12   : > { %p1252_p0 = scmp.lt.u32.totalorder %s1412_s7, %s1548_s1  ;;  %p1253_p1 = scmp.lt.u32.totalorder %s1251_s15, %s1246_s12 }
  0x13   : > { %p1249_p12 = pnand %p1248_p11, %p1247_p10  ;;  %p1255_p3 = scmp.lt.u32.totalorder %s1246_s12, %s1412_s7 }
  0x14   : > { %p1254_p2 = por %p1253_p1, %p1252_p0 }
  0x15   : > { %p1250_p13 = pneg %p1249_p12 }
  0x16   : > { %p1256_p4 = por %p1255_p3, %p1254_p2 }
  0x18   : > { %p1257_p5 = pnand %p1256_p4, %p1250_p13 }
  0x1a   : > { %1260 = shalt.err (!%p1257_p5)
}
  0x1b   : > { %s1261_s24 = scalar_lea.vmem %s1420_s9, 4096  ;;  %s1328_s25 = smov [#allocation2]  }
  0x1c   : > { %p1262_p6 = scmp.ne.s32.totalorder %s1420_s9, %s1261_s24  ;;  %s1266_s28 = sshll.u32 %s1328_s25, 4  ;;  %s1267_s28 = int_to_ptr.vmem [resolvable:$false] %s1266_s28 }
  0x1d   : > { %s1268_s29 = scalar_lea.vmem %s1267_s28, 8192  ;;  %p1269_p12 = scmp.lt.s32.totalorder %s1420_s9, %s1267_s28 }
  0x1e   : > { %p1264_p8 = pnand %p1262_p6, %p1248_p11  ;;  %p1270_p0 = scmp.lt.s32.totalorder %s1268_s29, %s1261_s24 }
  0x20   : > { %p1265_p10 = pneg %p1264_p8  ;;  %p1271_p1 = por %p1270_p0, %p1269_p12 }
  0x22   : > { %p1272_p2 = pnand %p1271_p1, %p1265_p10 }
  0x24   : > { %1275 = shalt.err (!%p1272_p2)
}
  0x25   : > { %s1329_s30 = smov 64   ;;  %s1330_s5 = smov 4  }
  0x26   : > { %1150 = dma.hbm_to_vmem [thread:$0]  (!%p1416_p9), %s1412_s7, 4096, %s1420_s9, %s1422_s11, %s1329_s30, %s1329_s30, %s1330_s5  }
  0x27   : > { %p1030_p11 = scmp.ge.s32.totalorder %s1326_s20, 1  ;;  %p235_p13 = scmp.lt.s32.totalorder %s1326_s20, 5 }
  0x29   : > { %p236_p3 = pnand %p1030_p11, %p235_p13 }
  0x2a   : > { %s241_s6 = sand.u32 (!%p236_p3), 1, %s1310_s16  }
  0x2b   : > { %239 = sbr.rel (%p236_p3) target bundleno = 331 (0x14b), region = 28  ;;  %s1031_s8 = sshll.u32 (!%p236_p3), %s241_s6, 8 }
  0x2c   : > { %s242_s12 = scalar_lea.sflag (!%p236_p3), [#allocation3], %s241_s6  ;;  %s1453_s13 = scalar_lea.vmem (!%p236_p3), [#allocation2], %s1031_s8 }
  0x32   : > { %1301 = dma.done.wait (%p1399_p7), %s242_s12, 4096  }
  0x33   : > { %1303 = vsyncadd (%p1399_p7), %s242_s12, 4294963200  ;;  %v1202_v0 = vld [vmem:[%s1453_s13 + $0x40] sm:$0xff]   ;;  %v1206_v4 = vld [vmem:[%s1453_s13 + $0x48] sm:$0xff]   ;;  %p306_p7 = scmp.lt.s32.totalorder %s1318_s18, 3  ;;  %vm766_vm0 = vcmask 519168   ;;  %vm771_vm1 = vcmask 523264  }
  0x34   : > { %v1203_v1 = vld [vmem:[%s1453_s13 + $0xc0] sm:$0xff]   ;;  %1089 = vmatprep.subr.bf16.mxu0 %v1202_v0  ;;  %v1207_v5 = vld [vmem:[%s1453_s13 + $0xc8] sm:$0xff]   ;;  %v1210_v8 = vld [vmem:[%s1453_s13 + $0x50] sm:$0xff]   ;;  %vm785_vm2 = vcmask 516096  }
  0x35   : > { %v1204_v2 = vld [vmem:[%s1453_s13] sm:$0xff]   ;;  %1117 = vmatprep.subr.bf16.mxu1 %v1203_v1  ;;  %v1208_v6 = vld [vmem:[%s1453_s13 + $0x8] sm:$0xff]   ;;  %v1211_v9 = vld [vmem:[%s1453_s13 + $0xd0] sm:$0xff]   ;;  %s1563_s18 = smov (!%p306_p7, %s1318_s18), 3 }
  0x36   : > { %v1205_v3 = vld [vmem:[%s1453_s13 + $0x80] sm:$0xff]   ;;  %1090 = vmatpush3.bf16.msra.mxu0 %v1204_v2  ;;  %v1209_v7 = vld [vmem:[%s1453_s13 + $0x88] sm:$0xff]   ;;  %v1212_v10 = vld [vmem:[%s1453_s13 + $0x10] sm:$0xff]   ;;  %s1083_s26 = sshll.u32 %s1563_s18, 6  ;;  %s1084_s11 = sshll.u32 %s1563_s18, 4 }
  0x37   : > { %1118 = vmatpush3.bf16.msra.mxu1 %v1205_v3  ;;  %1091 = vmatprep.subr.bf16.mxu0 %v1206_v4  ;;  %v1213_v11 = vld [vmem:[%s1453_s13 + $0x90] sm:$0xff]   ;;  %v1214_v12 = vld [vmem:[%s1453_s13 + $0x58] sm:$0xff]   ;;  %v1218_v16 = vld [vmem:[%s1453_s13 + $0x60] sm:$0xff]   ;;  %s314_s10 = scalar_lea.vmem %s1547_s0, %s1083_s26  ;;  %s1503_s21 = scalar_lea.vmem %s1549_s2, %s1084_s11 }
  0x38   : > { %1119 = vmatprep.subr.bf16.mxu1 %v1207_v5  ;;  %v1215_v13 = vld [vmem:[%s1453_s13 + $0xd8] sm:$0xff]   ;;  %v1219_v17 = vld [vmem:[%s1453_s13 + $0xe0] sm:$0xff]   ;;  %v1222_v20 = vld [vmem:[%s1453_s13 + $0x68] sm:$0xff]   ;;  %s337_s25 = scalar_lea.vmem %s1550_s3, %s1563_s18  ;;  %s346_s30 = scalar_lea.vmem %s1551_s4, %s1563_s18 }
  0x39   : > { %v1216_v14 = vld [vmem:[%s1453_s13 + $0x18] sm:$0xff]   ;;  %v1220_v18 = vld [vmem:[%s1453_s13 + $0x20] sm:$0xff]   ;;  %v1223_v21 = vld [vmem:[%s1453_s13 + $0xe8] sm:$0xff]  }
  0x3a   : > { %1092 = vmatpush3.bf16.msra.mxu0 %v1208_v6  ;;  %v1217_v15 = vld [vmem:[%s1453_s13 + $0x98] sm:$0xff]   ;;  %v1221_v19 = vld [vmem:[%s1453_s13 + $0xa0] sm:$0xff]   ;;  %v1224_v22 = vld [vmem:[%s1453_s13 + $0x28] sm:$0xff]  }
  0x3b   : > { %1120 = vmatpush3.bf16.msra.mxu1 %v1209_v7  ;;  %1093 = vmatprep.subr.bf16.mxu0 %v1210_v8  ;;  %v1225_v23 = vld [vmem:[%s1453_s13 + $0xa8] sm:$0xff]   ;;  %v1226_v24 = vld [vmem:[%s1453_s13 + $0x70] sm:$0xff]   ;;  %v1230_v28 = vld [vmem:[%s1453_s13 + $0x78] sm:$0xff]  }
  0x3c   : > { %1121 = vmatprep.subr.bf16.mxu1 %v1211_v9  ;;  %v1227_v25 = vld [vmem:[%s1453_s13 + $0xf0] sm:$0xff]   ;;  %v1231_v29 = vld [vmem:[%s1453_s13 + $0xf8] sm:$0xff]  }
  0x3d   : > { %v1228_v26 = vld [vmem:[%s1453_s13 + $0x30] sm:$0xff]   ;;  %v1232_v30 = vld [vmem:[%s1453_s13 + $0x38] sm:$0xff]  }
  0x3e   : > { %1094 = vmatpush3.bf16.msra.mxu0 %v1212_v10  ;;  %v1229_v27 = vld [vmem:[%s1453_s13 + $0xb0] sm:$0xff]   ;;  %v1233_v31 = vld [vmem:[%s1453_s13 + $0xb8] sm:$0xff]  }
  0x3f   : > { %1122 = vmatpush3.bf16.msra.mxu1 %v1213_v11  ;;  %1095 = vmatprep.subr.bf16.mxu0 %v1214_v12  ;;  %v1234_v32 = vld [vmem:[%s314_s10] ss:$16 sps:$4 sm:$0xff]   ;;  %v1236_v33 = vld [vmem:[%s314_s10 + $0x4] ss:$16 sps:$4 sm:$0xff]   ;;  %v1237_v34 = vld [vmem:[%s314_s10 + $0x8] ss:$16 sps:$4 sm:$0xff]  }
  0x40   : > { %1123 = vmatprep.subr.bf16.mxu1 %v1215_v13  ;;  %v1239_v35 = vld [vmem:[%s314_s10 + $0xc] ss:$16 sps:$4 sm:$0xff]   ;;  %684 = vmatprep.mubr.bf16.mxu0 %v1236_v33  ;;  %v1240_v36 = vld [vmem:[%s314_s10 + $0x24] ss:$16 sps:$4 sm:$0xff]   ;;  %v1244_v38 = vld [vmem:[%s314_s10 + $0x20] ss:$16 sps:$4 sm:$0xff]  }
  0x41   : > { %733 = vmatprep.mubr.bf16.mxu1 %v1239_v35  ;;  %v1242_v37 = vld [vmem:[%s314_s10 + $0x2c] ss:$16 sps:$4 sm:$0xff]   ;;  %v1245_v39 = vld [vmem:[%s314_s10 + $0x28] ss:$16 sps:$4 sm:$0xff]  }
  0x42   : > { %1096 = vmatpush3.bf16.msra.mxu0 %v1216_v14 }
  0x43   : > { %1124 = vmatpush3.bf16.msra.mxu1 %v1217_v15  ;;  %1097 = vmatprep.subr.bf16.mxu0 %v1218_v16 }
  0x44   : > { %1125 = vmatprep.subr.bf16.mxu1 %v1219_v17 }
  0x46   : > { %1098 = vmatpush3.bf16.msra.mxu0 %v1220_v18 }
  0x47   : > { %1126 = vmatpush3.bf16.msra.mxu1 %v1221_v19  ;;  %1099 = vmatprep.subr.bf16.mxu0 %v1222_v20 }
  0x48   : > { %1127 = vmatprep.subr.bf16.mxu1 %v1223_v21 }
  0x4a   : > { %1100 = vmatpush3.bf16.msra.mxu0 %v1224_v22 }
  0x4b   : > { %1128 = vmatpush3.bf16.msra.mxu1 %v1225_v23  ;;  %1101 = vmatprep.subr.bf16.mxu0 %v1226_v24 }
  0x4c   : > { %1129 = vmatprep.subr.bf16.mxu1 %v1227_v25 }
  0x4e   : > { %1102 = vmatpush3.bf16.msra.mxu0 %v1228_v26 }
  0x4f   : > { %1130 = vmatpush3.bf16.msra.mxu1 %v1229_v27  ;;  %1103 = vmatprep.subr.bf16.mxu0 %v1230_v28 }
  0x50   : > { %1131 = vmatprep.subr.bf16.mxu1 %v1231_v29 }
  0x52   : > { %1104 = vmatpush3.bf16.msra.mxu0 %v1232_v30 }
  0x53   : > { %1132 = vmatpush3.bf16.msra.mxu1 %v1233_v31 }
  0x55   : > { %685 = vmatmul.mubr.bf16.vlgmr.msra.gmra.mrb[0].mxu0 %v1234_v32 }
  0x56   : > { %734 = vmatmul.mubr.bf16.vlgmr.msra.gmra.mrb[0].mxu1 %v1237_v34  ;;  %692 = vmatprep.mubr.bf16.mxu0 %v1240_v36 }
  0x57   : > { %741 = vmatprep.mubr.bf16.mxu1 %v1242_v37 }
  0x5d   : > { %693 = vmatmul.mubr.bf16.gmra.mrb[4].mxu0 %v1244_v38 }
  0x5e   : > { %742 = vmatmul.mubr.bf16.gmra.mrb[4].mxu1 %v1245_v39 }
 0x128   : > { %v1105_v40 = vpop.f32.mrb[0].mxu0 }
 0x129   : > { %v1133_v41 = vpop.f32.mrb[0].mxu1  ;;  %v1106_v42 = vpop.f32.mrb[1].mxu0 }
 0x12a   : > { %v1107_v43 = vadd.f32 %v1106_v42, %v1105_v40  ;;  %v1134_v44 = vpop.f32.mrb[1].mxu1  ;;  %v1108_v45 = vpop.f32.mrb[2].mxu0 }
 0x12b   : > { %v1135_v46 = vadd.f32 %v1134_v44, %v1133_v41  ;;  %v1136_v47 = vpop.f32.mrb[2].mxu1  ;;  %v1109_v48 = vpop.f32.mrb[3].mxu0 }
 0x12c   : > { %v1110_v49 = vadd.f32 %v1109_v48, %v1108_v45  ;;  %v1137_v50 = vpop.f32.mrb[3].mxu1 }
 0x12d   : > { %v736_v51 = vadd.f32 %v1135_v46, %v1107_v43  ;;  %v1138_v52 = vadd.f32 %v1137_v50, %v1136_v47 }
 0x12f   : > { %v1085_v53 = vpack.c.bf16 %v736_v51, %v736_v51  ;;  %v787_v54 = vmul.f32 %v736_v51, %v736_v51  ;;  %v739_v55 = vadd.f32 %v1138_v52, %v1110_v49  ;;  %v772_v57 = vsel %vm771_vm1, %v736_v51, 0.0 }
 0x130   : > { %v1111_v56 = vpop.f32.mrb[4].mxu0 }
 0x131   : > { %767 = vst.msk [vmem:[%s1503_s21] sm:$0xf] %vm766_vm0, %v1085_v53  ;;  %v1086_v58 = vpack.c.bf16 %v739_v55, %v739_v55  ;;  %v773_v59 = vsel %vm771_vm1, %v739_v55, 0.0  ;;  %v788_v60 = vmul.f32 %v739_v55, %v739_v55  ;;  %v1139_v61 = vpop.f32.mrb[4].mxu1  ;;  %v1112_v62 = vpop.f32.mrb[5].mxu0  ;;  %v791_v3 = vsel %vm771_vm1, %v787_v54, 0.0 }
 0x132   : > { %v774_v63 = vadd.f32 %v773_v59, %v772_v57  ;;  %v1113_v0 = vadd.f32 %v1112_v62, %v1111_v56  ;;  %v1140_v1 = vpop.f32.mrb[5].mxu1  ;;  %v1114_v2 = vpop.f32.mrb[6].mxu0 }
 0x133   : > { %768 = vst.msk [vmem:[%s1503_s21 + $0x4] sm:$0xf] %vm766_vm0, %v1086_v58  ;;  %v792_v4 = vsel %vm771_vm1, %v788_v60, 0.0  ;;  %v1141_v5 = vadd.f32 %v1140_v1, %v1139_v61  ;;  %v1142_v6 = vpop.f32.mrb[6].mxu1  ;;  %v1115_v7 = vpop.f32.mrb[7].mxu0 }
 0x134   : > { %v793_v8 = vadd.f32 %v792_v4, %v791_v3  ;;  %v1116_v9 = vadd.f32 %v1115_v7, %v1114_v2  ;;  %v1143_v10 = vpop.f32.mrb[7].mxu1 }
 0x135   : > { %v744_v11 = vadd.f32 %v1141_v5, %v1113_v0  ;;  %v1144_v12 = vadd.f32 %v1143_v10, %v1142_v6 }
 0x137   : > { %v1087_v13 = vpack.c.bf16 %v744_v11, %v744_v11  ;;  %v775_v14 = vsel %vm771_vm1, %v744_v11, 0.0  ;;  %v789_v15 = vmul.f32 %v744_v11, %v744_v11  ;;  %v747_v16 = vadd.f32 %v1144_v12, %v1116_v9 }
 0x138   : > { %v776_v17 = vadd.f32 %v775_v14, %v774_v63 }
 0x139   : > { %769 = vst.msk [vmem:[%s1503_s21 + $0x8] sm:$0xf] %vm766_vm0, %v1087_v13  ;;  %v794_v18 = vsel %vm771_vm1, %v789_v15, 0.0  ;;  %v1088_v19 = vpack.c.bf16 %v747_v16, %v747_v16  ;;  %v777_v20 = vsel %vm771_vm1, %v747_v16, 0.0  ;;  %v790_v21 = vmul.f32 %v747_v16, %v747_v16 }
 0x13a   : > { %v795_v22 = vadd.f32 %v794_v18, %v793_v8  ;;  %v778_v23 = vadd.f32 %v777_v20, %v776_v17 }
 0x13b   : > { %770 = vst.msk [vmem:[%s1503_s21 + $0xc] sm:$0xf] %vm766_vm0, %v1088_v19  ;;  %v796_v24 = vsel %vm771_vm1, %v790_v21, 0.0 }
 0x13c   : > { %v779_v25 = vrot.slane %v778_v23, 4  ;;  %v797_v26 = vadd.f32 %v796_v24, %v795_v22 }
 0x13e   : > { %v780_v27 = vadd.f32 %v779_v25, %v778_v23  ;;  %v798_v28 = vrot.slane %v797_v26, 4 }
 0x140   : > { %v781_v29 = vrot.slane %v780_v27, 2  ;;  %v799_v30 = vadd.f32 %v798_v28, %v797_v26 }
 0x142   : > { %v782_v31 = vadd.f32 %v781_v29, %v780_v27  ;;  %v800_v32 = vrot.slane %v799_v30, 2 }
 0x144   : > { %v783_v33 = vrot.slane %v782_v31, 1  ;;  %v801_v34 = vadd.f32 %v800_v32, %v799_v30 }
 0x146   : > { %v784_v35 = vadd.f32 %v783_v33, %v782_v31  ;;  %v802_v36 = vrot.slane %v801_v34, 1 }
 0x148   : > { %786 = vst.msk [vmem:[%s337_s25] sm:$0x1] %vm785_vm2, %v784_v35  ;;  %v803_v37 = vadd.f32 %v802_v36, %v801_v34 }
 0x14a   : > { %804 = vst.msk [vmem:[%s346_s30] sm:$0x1] %vm785_vm2, %v803_v37 }
 0x14b PF: > { %s18_s20 = sadd.s32 1, %s1326_s20   ;;  %s1555_s15 = smov %s1310_s16 }
 0x14c   : > { %p15_p9 = scmp.ge.s32.totalorder %s18_s20, 6   ;;  %s1556_s16 = smov %s1314_s17 }
 0x14d   : > { %s1557_s17 = smov %s1405_s27  ;;  %s1558_s18 = smov %s1322_s19 }
 0x14e   : > { %s1559_s19 = smov %s1561_s22  ;;  %17 = sbr.rel (!%p15_p9) target bundleno = 4 (0x4), region = 95 }
 0x155   :  { %889 = vsyncpa [#allocation3], 1 }
 0x156   :  { %891 = vsyncpa [#allocation3 + $0x1], 1 }

// kernel: tile.48
= control target key start
LH: loop header
LB: loop body
LE: loop exit
PB: predicated region body
PF: predicated region fallthrough
CT: control target
= control target key end

     0   :  { %s22_s0 = inlined_call_operand.vmem [shape: f32[32], index: 0, kind: input, shape index: {}]   ;;  %s23_s1 = inlined_call_operand.vmem [shape: f32[4,32], index: 1, kind: output, shape index: {}]  }
   0x1   :  { %v4_v0 = vld [vmem:[%s22_s0] ss:$0 sm:$0xff] }
   0x2   :  { %5 = vst [vmem:[%s23_s1] sm:$0xf] %v4_v0 }

// kernel: tile.49
= control target key start
LH: loop header
LB: loop body
LE: loop exit
PB: predicated region body
PF: predicated region fallthrough
CT: control target
= control target key end

     0   :  { %vm7_vm0 = vcmask 261120   ;;  %s37_s8 = smov 32   ;;  %s38_s9 = smov 64   ;;  %vm13_vm1 = vcmask 1048320   ;;  %vm19_vm2 = vcmask 785920   ;;  %vm25_vm3 = vcmask 523520   ;;  %s55_s0 = inlined_call_operand.vmem [shape: f32[4,32], index: 0, kind: input, shape index: {}]   ;;  %s56_s1 = inlined_call_operand.vmem [shape: f32[1,128], index: 1, kind: output, shape index: {}]  }
   0x1   :  { %v4_v0 = vld [vmem:[%s55_s0] sm:$0xf]  ;;  %s36_s0 = smov 96  }
   0x2   :  { %5 = vst [vmem:[#allocation1] sm:$0xf] %v4_v0 }
   0x9   :  { %v10_v1 = vld [vmem:[#allocation1 + $0x3] sm:$0x1]   ;;  %v22_v2 = vld [vmem:[#allocation1 + $0x1] sm:$0x1]   ;;  %v6_v3 = vld [vmem:[#allocation1] sm:$0x1]  }
   0xa   :  { %11 = vrot.lane.b32.xlu0 %v10_v1, %s36_s0  ;;  %23 = vrot.lane.b32.xlu1 %v22_v2, %s37_s8  ;;  %v16_v4 = vld [vmem:[#allocation1 + $0x2] sm:$0x1]   ;;  %8 = vst.msk [vmem:[#allocation0] sm:$0x1] %vm7_vm0, %v6_v3  }
   0xe   :  { %17 = vrot.lane.b32.xlu0 %v16_v4, %s38_s9 }
  0x7c   :  { %v12_v5 = vpop.permute.xlu0 %11   ;;  %v24_v6 = vpop.permute.xlu1 %23  }
  0x7d   :  { %14 = vst.msk [vmem:[#allocation0] sm:$0x1] %vm13_vm1, %v12_v5  }
  0x80   :  { %v18_v7 = vpop.permute.xlu0 %17  }
  0x81   :  { %20 = vst.msk [vmem:[#allocation0] sm:$0x1] %vm19_vm2, %v18_v7  }
  0x82   :  { %26 = vst.msk [vmem:[#allocation0] sm:$0x1] %vm25_vm3, %v24_v6  }
  0x89   :  { %v30_v8 = vld [vmem:[#allocation0] sm:$0x1] }
  0x8a   :  { %32 = vst [vmem:[%s56_s1] sm:$0x1] %v30_v8 }

// kernel: _lambda_.11
= control target key start
LH: loop header
LB: loop body
LE: loop exit
PB: predicated region body
PF: predicated region fallthrough
CT: control target
= control target key end

     0   :  { %s1316_s15 = smov 0   ;;  %s1318_s16 = smov 0   ;;  %s1501_s0 = inlined_call_operand.vmem [shape: bf16[4,128,256], index: 0, kind: input, shape index: {}]   ;;  %s1502_s1 = inlined_call_operand.vmem [shape: bf16[4,256,32], index: 1, kind: input, shape index: {}]   ;;  %s1503_s2 = inlined_call_operand.vmem [shape: bf16[4,128,32], index: 2, kind: output, shape index: {0}]   ;;  %s1504_s3 = inlined_call_operand.vmem [shape: f32[4,1,1,32], index: 3, kind: output, shape index: {1}]   ;;  %s1505_s4 = inlined_call_operand.vmem [shape: f32[4,1,1,32], index: 4, kind: output, shape index: {2}]  }
   0x1   :  { %s1320_s17 = smov 0  }
   0x2 LB: > { %s34_s18 = sadd.s32 1, %s1285_s16  ;;  %p1047_p0 = scmp.ge.s32.totalorder %s1289_s17, 1  ;;  %s1289_s17 = sphi %s1320_s17, %s15_s17   ;;  %s1285_s16 = sphi %s1318_s16, %s1507_s16   ;;  %s1281_s15 = sphi %s1316_s15, %s1506_s15  }
   0x3   : > { %p36_p1 = scmp.ge.s32.totalorder %s34_s18, 4  ;;  %p221_p2 = scmp.lt.s32.totalorder %s1289_s17, 5 }
   0x5   : > { %s1509_s18 = smov (%p36_p1, %s34_s18), 0  ;;  %p222_p3 = pnand %p1047_p0, %p221_p2 }
   0x6   : > { %p286_p4 = scmp.lt.s32.totalorder (!%p222_p3), %s1281_s15, 3  ;;  %vm721_vm0 = vcmask (!%p222_p3), 257024   ;;  %vm738_vm1 = vcmask (!%p222_p3), 261120   ;;  %vm776_vm2 = vcmask (!%p222_p3), 253952  }
   0x7   : > { %225 = sbr.rel (%p222_p3) target bundleno = 325 (0x145), region = 28 }
   0xe   : > { %s1511_s15 = smov (!%p286_p4, %s1281_s15), 3 }
   0xf   : > { %s1104_s19 = sshll.u32 %s1511_s15, 7  ;;  %s1106_s26 = sshll.u32 %s1511_s15, 6 }
  0x10   : > { %s1340_s22 = scalar_lea.vmem %s1502_s1, %s1104_s19  ;;  %s1354_s25 = scalar_lea.vmem %s1501_s0, %s1104_s19 }
  0x11   : > { %v1227_v0 = vld [vmem:[%s1340_s22 + $0x40] sm:$0xff]   ;;  %v1229_v2 = vld [vmem:[%s1340_s22 + $0x48] sm:$0xff]   ;;  %v1231_v4 = vld [vmem:[%s1340_s22 + $0x50] sm:$0xff]   ;;  %s1385_s29 = scalar_lea.vmem %s1503_s2, %s1106_s26  ;;  %s325_s6 = scalar_lea.vmem %s1504_s3, %s1511_s15 }
  0x12   : > { %v1228_v1 = vld [vmem:[%s1340_s22] sm:$0xff]   ;;  %1123 = vmatprep.subr.bf16.mxu0 %v1227_v0  ;;  %1187 = vmatprep.subr.bf16.mxu1 %v1227_v0  ;;  %v1230_v3 = vld [vmem:[%s1340_s22 + $0x8] sm:$0xff]   ;;  %v1232_v5 = vld [vmem:[%s1340_s22 + $0x10] sm:$0xff]   ;;  %s334_s9 = scalar_lea.vmem %s1505_s4, %s1511_s15 }
  0x13   : > { %1124 = vmatpush3.bf16.msra.mxu0 %v1228_v1  ;;  %1195 = vmatpush3.bf16.msra.mxu1 %v1228_v1  ;;  %v1233_v6 = vld [vmem:[%s1340_s22 + $0x58] sm:$0xff]   ;;  %v1235_v8 = vld [vmem:[%s1340_s22 + $0x60] sm:$0xff]   ;;  %v1237_v10 = vld [vmem:[%s1340_s22 + $0x68] sm:$0xff]  }
  0x14   : > { %1125 = vmatprep.subr.bf16.mxu0 %v1229_v2  ;;  %1188 = vmatprep.subr.bf16.mxu1 %v1229_v2  ;;  %v1234_v7 = vld [vmem:[%s1340_s22 + $0x18] sm:$0xff]   ;;  %v1236_v9 = vld [vmem:[%s1340_s22 + $0x20] sm:$0xff]   ;;  %v1238_v12 = vld [vmem:[%s1340_s22 + $0x28] sm:$0xff]  }
  0x15   : > { %v1245_v11 = vld [vmem:[%s1354_s25 + $0x4] ss:$8 sps:$4 sm:$0xff]   ;;  %v1239_v14 = vld [vmem:[%s1340_s22 + $0x70] sm:$0xff]   ;;  %v1241_v16 = vld [vmem:[%s1340_s22 + $0x78] sm:$0xff]  }
  0x16   : > { %v1251_v13 = vld [vmem:[%s1354_s25 + $0x44] ss:$8 sps:$4 sm:$0xff]   ;;  %592 = vmatprep.mubr.bf16.mxu0 %v1245_v11  ;;  %v1240_v15 = vld [vmem:[%s1340_s22 + $0x30] sm:$0xff]   ;;  %v1242_v17 = vld [vmem:[%s1340_s22 + $0x38] sm:$0xff]  }
  0x17   : > { %1126 = vmatpush3.bf16.msra.mxu0 %v1230_v3  ;;  %1196 = vmatpush3.bf16.msra.mxu1 %v1230_v3  ;;  %v1243_v18 = vld [vmem:[%s1354_s25] ss:$8 sps:$4 sm:$0xff]   ;;  %v1246_v20 = vld [vmem:[%s1354_s25 + $0x14] ss:$8 sps:$4 sm:$0xff]   ;;  %v1248_v22 = vld [vmem:[%s1354_s25 + $0x10] ss:$8 sps:$4 sm:$0xff]  }
  0x18   : > { %1127 = vmatprep.subr.bf16.mxu0 %v1231_v4  ;;  %1189 = vmatprep.subr.bf16.mxu1 %v1231_v4  ;;  %v1249_v19 = vld [vmem:[%s1354_s25 + $0x40] ss:$8 sps:$4 sm:$0xff]   ;;  %v1255_v21 = vld [vmem:[%s1354_s25 + $0x54] ss:$8 sps:$4 sm:$0xff]   ;;  %v1257_v23 = vld [vmem:[%s1354_s25 + $0x50] ss:$8 sps:$4 sm:$0xff]  }
  0x19   : > { %624 = vmatprep.mubr.bf16.mxu1 %v1251_v13  ;;  %v1252_v24 = vld [vmem:[%s1354_s25 + $0x24] ss:$8 sps:$4 sm:$0xff]   ;;  %v1254_v26 = vld [vmem:[%s1354_s25 + $0x20] ss:$8 sps:$4 sm:$0xff]   ;;  %v1258_v28 = vld [vmem:[%s1354_s25 + $0x34] ss:$8 sps:$4 sm:$0xff]  }
  0x1a   : > { %v1261_v25 = vld [vmem:[%s1354_s25 + $0x64] ss:$8 sps:$4 sm:$0xff]   ;;  %v1263_v27 = vld [vmem:[%s1354_s25 + $0x60] ss:$8 sps:$4 sm:$0xff]   ;;  %v1264_v29 = vld [vmem:[%s1354_s25 + $0x74] ss:$8 sps:$4 sm:$0xff]  }
  0x1b   : > { %1128 = vmatpush3.bf16.msra.mxu0 %v1232_v5  ;;  %1197 = vmatpush3.bf16.msra.mxu1 %v1232_v5  ;;  %v1260_v30 = vld [vmem:[%s1354_s25 + $0x30] ss:$8 sps:$4 sm:$0xff]  }
  0x1c   : > { %1129 = vmatprep.subr.bf16.mxu0 %v1233_v6  ;;  %1190 = vmatprep.subr.bf16.mxu1 %v1233_v6  ;;  %v1266_v31 = vld [vmem:[%s1354_s25 + $0x70] ss:$8 sps:$4 sm:$0xff]  }
  0x1f   : > { %1130 = vmatpush3.bf16.msra.mxu0 %v1234_v7  ;;  %1198 = vmatpush3.bf16.msra.mxu1 %v1234_v7 }
  0x20   : > { %1131 = vmatprep.subr.bf16.mxu0 %v1235_v8  ;;  %1191 = vmatprep.subr.bf16.mxu1 %v1235_v8 }
  0x23   : > { %1132 = vmatpush3.bf16.msra.mxu0 %v1236_v9  ;;  %1199 = vmatpush3.bf16.msra.mxu1 %v1236_v9 }
  0x24   : > { %1133 = vmatprep.subr.bf16.mxu0 %v1237_v10  ;;  %1192 = vmatprep.subr.bf16.mxu1 %v1237_v10 }
  0x27   : > { %1134 = vmatpush3.bf16.msra.mxu0 %v1238_v12  ;;  %1200 = vmatpush3.bf16.msra.mxu1 %v1238_v12 }
  0x28   : > { %1135 = vmatprep.subr.bf16.mxu0 %v1239_v14  ;;  %1193 = vmatprep.subr.bf16.mxu1 %v1239_v14 }
  0x2b   : > { %1136 = vmatpush3.bf16.msra.mxu0 %v1240_v15  ;;  %1201 = vmatpush3.bf16.msra.mxu1 %v1240_v15 }
  0x2c   : > { %1137 = vmatprep.subr.bf16.mxu0 %v1241_v16  ;;  %1194 = vmatprep.subr.bf16.mxu1 %v1241_v16 }
  0x2f   : > { %1138 = vmatpush3.bf16.msra.mxu0 %v1242_v17  ;;  %1202 = vmatpush3.bf16.msra.mxu1 %v1242_v17 }
  0x32   : > { %593 = vmatmul.mubr.bf16.vlgmr.msra.gmra.mrb[0].mxu0 %v1243_v18  ;;  %625 = vmatmul.mubr.bf16.vlgmr.msra.gmra.mrb[0].mxu1 %v1249_v19 }
  0x33   : > { %600 = vmatprep.mubr.bf16.mxu0 %v1246_v20  ;;  %632 = vmatprep.mubr.bf16.mxu1 %v1255_v21 }
  0x3a   : > { %601 = vmatmul.mubr.bf16.gmra.mrb[4].mxu0 %v1248_v22  ;;  %633 = vmatmul.mubr.bf16.gmra.mrb[4].mxu1 %v1257_v23 }
  0x3b   : > { %608 = vmatprep.mubr.bf16.mxu0 %v1252_v24  ;;  %640 = vmatprep.mubr.bf16.mxu1 %v1261_v25 }
  0x42   : > { %609 = vmatmul.mubr.bf16.gmra.mrb[8].mxu0 %v1254_v26  ;;  %641 = vmatmul.mubr.bf16.gmra.mrb[8].mxu1 %v1263_v27 }
  0x43   : > { %616 = vmatprep.mubr.bf16.mxu0 %v1258_v28  ;;  %648 = vmatprep.mubr.bf16.mxu1 %v1264_v29 }
  0x4a   : > { %617 = vmatmul.mubr.bf16.gmra.mrb[12].mxu0 %v1260_v30  ;;  %649 = vmatmul.mubr.bf16.gmra.mrb[12].mxu1 %v1266_v31 }
 0x105   : > { %v1139_v32 = vpop.f32.mrb[0].mxu0  ;;  %v1163_v33 = vpop.f32.mrb[0].mxu1 }
 0x106   : > { %v1140_v34 = vpop.f32.mrb[1].mxu0  ;;  %v1164_v35 = vpop.f32.mrb[1].mxu1 }
 0x107   : > { %v1141_v36 = vadd.f32 %v1140_v34, %v1139_v32  ;;  %v1142_v37 = vpop.f32.mrb[2].mxu0  ;;  %v1380_v38 = vadd.f32 %v1164_v35, %v1163_v33  ;;  %v1166_v39 = vpop.f32.mrb[2].mxu1 }
 0x108   : > { %v1143_v40 = vpop.f32.mrb[3].mxu0  ;;  %v1167_v41 = vpop.f32.mrb[3].mxu1 }
 0x109   : > { %v1107_v42 = vpack.c.bf16 %v1141_v36, %v1141_v36  ;;  %v778_v43 = vmul.f32 %v1141_v36, %v1141_v36  ;;  %v1144_v44 = vadd.f32 %v1143_v40, %v1142_v37  ;;  %v1115_v45 = vpack.c.bf16 %v1380_v38, %v1380_v38 }
 0x10a   : > { %v1389_v46 = vadd.f32 %v1167_v41, %v1166_v39  ;;  %v739_v47 = vsel %vm738_vm1, %v1141_v36, 0.0 }
 0x10b   : > { %722 = vst.msk [vmem:[%s1385_s29] sm:$0xf] %vm721_vm0, %v1107_v42  ;;  %v1108_v48 = vpack.c.bf16 %v1144_v44, %v1144_v44  ;;  %v740_v49 = vsel %vm738_vm1, %v1144_v44, 0.0  ;;  %v779_v50 = vmul.f32 %v1144_v44, %v1144_v44  ;;  %730 = vst.msk [vmem:[%s1385_s29 + $0x20] sm:$0xf] %vm721_vm0, %v1115_v45  ;;  %v794_v53 = vsel %vm738_vm1, %v778_v43, 0.0 }
 0x10c   : > { %v741_v51 = vadd.f32 %v740_v49, %v739_v47  ;;  %v1116_v52 = vpack.c.bf16 %v1389_v46, %v1389_v46 }
 0x10d   : > { %723 = vst.msk [vmem:[%s1385_s29 + $0x4] sm:$0xf] %vm721_vm0, %v1108_v48  ;;  %v795_v54 = vsel %vm738_vm1, %v779_v50, 0.0  ;;  %v1145_v55 = vpop.f32.mrb[4].mxu0  ;;  %v1169_v56 = vpop.f32.mrb[4].mxu1 }
 0x10e   : > { %v796_v57 = vadd.f32 %v795_v54, %v794_v53  ;;  %v1146_v58 = vpop.f32.mrb[5].mxu0  ;;  %731 = vst.msk [vmem:[%s1385_s29 + $0x24] sm:$0xf] %vm721_vm0, %v1116_v52  ;;  %v1170_v59 = vpop.f32.mrb[5].mxu1 }
 0x10f   : > { %v1147_v60 = vadd.f32 %v1146_v58, %v1145_v55  ;;  %v1148_v61 = vpop.f32.mrb[6].mxu0  ;;  %v1405_v62 = vadd.f32 %v1170_v59, %v1169_v56  ;;  %v1172_v63 = vpop.f32.mrb[6].mxu1 }
 0x110   : > { %v1149_v0 = vpop.f32.mrb[7].mxu0  ;;  %v1173_v1 = vpop.f32.mrb[7].mxu1 }
 0x111   : > { %v1109_v2 = vpack.c.bf16 %v1147_v60, %v1147_v60  ;;  %v742_v3 = vsel %vm738_vm1, %v1147_v60, 0.0  ;;  %v780_v4 = vmul.f32 %v1147_v60, %v1147_v60  ;;  %v1150_v5 = vadd.f32 %v1149_v0, %v1148_v61 }
 0x112   : > { %v743_v6 = vadd.f32 %v742_v3, %v741_v51  ;;  %v1117_v7 = vpack.c.bf16 %v1405_v62, %v1405_v62  ;;  %v1416_v14 = vadd.f32 %v1173_v1, %v1172_v63  ;;  %v786_v60 = vmul.f32 %v1380_v38, %v1380_v38 }
 0x113   : > { %724 = vst.msk [vmem:[%s1385_s29 + $0x8] sm:$0xf] %vm721_vm0, %v1109_v2  ;;  %v797_v8 = vsel %vm738_vm1, %v780_v4, 0.0  ;;  %v1110_v9 = vpack.c.bf16 %v1150_v5, %v1150_v5  ;;  %v744_v10 = vsel %vm738_vm1, %v1150_v5, 0.0  ;;  %v781_v11 = vmul.f32 %v1150_v5, %v1150_v5 }
 0x114   : > { %v798_v12 = vadd.f32 %v797_v8, %v796_v57  ;;  %v745_v13 = vadd.f32 %v744_v10, %v743_v6  ;;  %732 = vst.msk [vmem:[%s1385_s29 + $0x28] sm:$0xf] %vm721_vm0, %v1117_v7  ;;  %v1118_v20 = vpack.c.bf16 %v1416_v14, %v1416_v14  ;;  %v754_v7 = vsel %vm738_vm1, %v1380_v38, 0.0 }
 0x115   : > { %725 = vst.msk [vmem:[%s1385_s29 + $0xc] sm:$0xf] %vm721_vm0, %v1110_v9  ;;  %v799_v15 = vsel %vm738_vm1, %v781_v11, 0.0  ;;  %v1151_v16 = vpop.f32.mrb[8].mxu0  ;;  %v1175_v17 = vpop.f32.mrb[8].mxu1  ;;  %v787_v8 = vmul.f32 %v1389_v46, %v1389_v46 }
 0x116   : > { %v800_v18 = vadd.f32 %v799_v15, %v798_v12  ;;  %v1152_v19 = vpop.f32.mrb[9].mxu0  ;;  %v1176_v21 = vpop.f32.mrb[9].mxu1  ;;  %733 = vst.msk [vmem:[%s1385_s29 + $0x2c] sm:$0xf] %vm721_vm0, %v1118_v20  ;;  %v756_v15 = vsel %vm738_vm1, %v1389_v46, 0.0  ;;  %v789_v20 = vmul.f32 %v1416_v14, %v1416_v14  ;;  %v760_v46 = vsel %vm738_vm1, %v1416_v14, 0.0 }
 0x117   : > { %v1153_v22 = vadd.f32 %v1152_v19, %v1151_v16  ;;  %v1154_v23 = vpop.f32.mrb[10].mxu0  ;;  %v1423_v24 = vadd.f32 %v1176_v21, %v1175_v17  ;;  %v1178_v25 = vpop.f32.mrb[10].mxu1  ;;  %v788_v16 = vmul.f32 %v1405_v62, %v1405_v62  ;;  %v758_v19 = vsel %vm738_vm1, %v1405_v62, 0.0 }
 0x118   : > { %v1155_v26 = vpop.f32.mrb[11].mxu0  ;;  %v1179_v27 = vpop.f32.mrb[11].mxu1 }
 0x119   : > { %v1111_v28 = vpack.c.bf16 %v1153_v22, %v1153_v22  ;;  %v746_v29 = vsel %vm738_vm1, %v1153_v22, 0.0  ;;  %v782_v30 = vmul.f32 %v1153_v22, %v1153_v22  ;;  %v1156_v31 = vadd.f32 %v1155_v26, %v1154_v23 }
 0x11a   : > { %v747_v32 = vadd.f32 %v746_v29, %v745_v13  ;;  %v1119_v33 = vpack.c.bf16 %v1423_v24, %v1423_v24  ;;  %v1180_v41 = vadd.f32 %v1179_v27, %v1178_v25  ;;  %v809_v13 = vsel %vm738_vm1, %v786_v60, 0.0 }
 0x11b   : > { %726 = vst.msk [vmem:[%s1385_s29 + $0x10] sm:$0xf] %vm721_vm0, %v1111_v28  ;;  %v801_v34 = vsel %vm738_vm1, %v782_v30, 0.0  ;;  %v1112_v35 = vpack.c.bf16 %v1156_v31, %v1156_v31  ;;  %v748_v36 = vsel %vm738_vm1, %v1156_v31, 0.0  ;;  %v783_v37 = vmul.f32 %v1156_v31, %v1156_v31 }
 0x11c   : > { %v802_v39 = vadd.f32 %v801_v34, %v800_v18  ;;  %v749_v40 = vadd.f32 %v748_v36, %v747_v32  ;;  %734 = vst.msk [vmem:[%s1385_s29 + $0x30] sm:$0xf] %vm721_vm0, %v1119_v33  ;;  %v1120_v48 = vpack.c.bf16 %v1180_v41, %v1180_v41  ;;  %v811_v18 = vsel %vm738_vm1, %v787_v8, 0.0 }
 0x11d   : > { %727 = vst.msk [vmem:[%s1385_s29 + $0x14] sm:$0xf] %vm721_vm0, %v1112_v35  ;;  %v803_v42 = vsel %vm738_vm1, %v783_v37, 0.0  ;;  %v1157_v43 = vpop.f32.mrb[12].mxu0  ;;  %v1181_v44 = vpop.f32.mrb[12].mxu1  ;;  %v813_v23 = vsel %vm738_vm1, %v788_v16, 0.0  ;;  %v790_v25 = vmul.f32 %v1423_v24, %v1423_v24  ;;  %v791_v29 = vmul.f32 %v1180_v41, %v1180_v41 }
 0x11e   : > { %v804_v45 = vadd.f32 %v803_v42, %v802_v39  ;;  %v1158_v47 = vpop.f32.mrb[13].mxu0  ;;  %v1182_v49 = vpop.f32.mrb[13].mxu1  ;;  %735 = vst.msk [vmem:[%s1385_s29 + $0x34] sm:$0xf] %vm721_vm0, %v1120_v48  ;;  %v815_v28 = vsel %vm738_vm1, %v789_v20, 0.0  ;;  %v762_v62 = vsel %vm738_vm1, %v1423_v24, 0.0 }
 0x11f   : > { %v1159_v50 = vadd.f32 %v1158_v47, %v1157_v43  ;;  %v1160_v51 = vpop.f32.mrb[14].mxu0  ;;  %v1183_v52 = vadd.f32 %v1182_v49, %v1181_v44  ;;  %v1184_v53 = vpop.f32.mrb[14].mxu1  ;;  %v817_v33 = vsel %vm738_vm1, %v790_v25, 0.0  ;;  %v764_v34 = vsel %vm738_vm1, %v1180_v41, 0.0 }
 0x120   : > { %v1161_v54 = vpop.f32.mrb[15].mxu0  ;;  %v1185_v55 = vpop.f32.mrb[15].mxu1  ;;  %v819_v37 = vsel %vm738_vm1, %v791_v29, 0.0 }
 0x121   : > { %v1113_v56 = vpack.c.bf16 %v1159_v50, %v1159_v50  ;;  %v750_v57 = vsel %vm738_vm1, %v1159_v50, 0.0  ;;  %v784_v58 = vmul.f32 %v1159_v50, %v1159_v50  ;;  %v1162_v59 = vadd.f32 %v1161_v54, %v1160_v51 }
 0x122   : > { %v751_v61 = vadd.f32 %v750_v57, %v749_v40  ;;  %v1121_v63 = vpack.c.bf16 %v1183_v52, %v1183_v52  ;;  %v1186_v6 = vadd.f32 %v1185_v55, %v1184_v53  ;;  %v792_v30 = vmul.f32 %v1183_v52, %v1183_v52 }
 0x123   : > { %728 = vst.msk [vmem:[%s1385_s29 + $0x18] sm:$0xf] %vm721_vm0, %v1113_v56  ;;  %v805_v0 = vsel %vm738_vm1, %v784_v58, 0.0  ;;  %v1114_v1 = vpack.c.bf16 %v1162_v59, %v1162_v59  ;;  %v752_v2 = vsel %vm738_vm1, %v1162_v59, 0.0  ;;  %v785_v3 = vmul.f32 %v1162_v59, %v1162_v59 }
 0x124   : > { %v806_v4 = vadd.f32 %v805_v0, %v804_v45  ;;  %v753_v5 = vadd.f32 %v752_v2, %v751_v61  ;;  %736 = vst.msk [vmem:[%s1385_s29 + $0x38] sm:$0xf] %vm721_vm0, %v1121_v63  ;;  %v1122_v12 = vpack.c.bf16 %v1186_v6, %v1186_v6  ;;  %v766_v14 = vsel %vm738_vm1, %v1183_v52, 0.0 }
 0x125   : > { %729 = vst.msk [vmem:[%s1385_s29 + $0x1c] sm:$0xf] %vm721_vm0, %v1114_v1  ;;  %v807_v9 = vsel %vm738_vm1, %v785_v3, 0.0  ;;  %v821_v39 = vsel %vm738_vm1, %v792_v30, 0.0  ;;  %v793_v40 = vmul.f32 %v1186_v6, %v1186_v6  ;;  %v768_v43 = vsel %vm738_vm1, %v1186_v6, 0.0 }
 0x126   : > { %v755_v10 = vadd.f32 %v754_v7, %v753_v5  ;;  %v808_v11 = vadd.f32 %v807_v9, %v806_v4  ;;  %737 = vst.msk [vmem:[%s1385_s29 + $0x3c] sm:$0xf] %vm721_vm0, %v1122_v12 }
 0x127   : > { %v823_v47 = vsel %vm738_vm1, %v793_v40, 0.0 }
 0x128   : > { %v757_v17 = vadd.f32 %v756_v15, %v755_v10  ;;  %v810_v38 = vadd.f32 %v809_v13, %v808_v11 }
 0x12a   : > { %v812_v21 = vadd.f32 %v811_v18, %v810_v38  ;;  %v759_v22 = vadd.f32 %v758_v19, %v757_v17 }
 0x12c   : > { %v761_v26 = vadd.f32 %v760_v46, %v759_v22  ;;  %v814_v27 = vadd.f32 %v813_v23, %v812_v21 }
 0x12e   : > { %v763_v31 = vadd.f32 %v762_v62, %v761_v26  ;;  %v816_v32 = vadd.f32 %v815_v28, %v814_v27 }
 0x130   : > { %v818_v35 = vadd.f32 %v817_v33, %v816_v32  ;;  %v765_v36 = vadd.f32 %v764_v34, %v763_v31 }
 0x132   : > { %v820_v42 = vadd.f32 %v819_v37, %v818_v35  ;;  %v767_v24 = vadd.f32 %v766_v14, %v765_v36 }
 0x134   : > { %v822_v44 = vadd.f32 %v821_v39, %v820_v42  ;;  %v769_v45 = vadd.f32 %v768_v43, %v767_v24 }
 0x136   : > { %v770_v41 = vrot.slane %v769_v45, 4  ;;  %v824_v48 = vadd.f32 %v823_v47, %v822_v44 }
 0x138   : > { %v771_v49 = vadd.f32 %v770_v41, %v769_v45  ;;  %v825_v50 = vrot.slane %v824_v48, 4 }
 0x13a   : > { %v772_v51 = vrot.slane %v771_v49, 2  ;;  %v826_v52 = vadd.f32 %v825_v50, %v824_v48 }
 0x13c   : > { %v773_v53 = vadd.f32 %v772_v51, %v771_v49  ;;  %v827_v54 = vrot.slane %v826_v52, 2 }
 0x13e   : > { %v774_v55 = vrot.slane %v773_v53, 1  ;;  %v828_v56 = vadd.f32 %v827_v54, %v826_v52 }
 0x140   : > { %v775_v57 = vadd.f32 %v774_v55, %v773_v53  ;;  %v829_v58 = vrot.slane %v828_v56, 1 }
 0x142   : > { %777 = vst.msk [vmem:[%s325_s6] sm:$0x1] %vm776_vm2, %v775_v57  ;;  %v830_v59 = vadd.f32 %v829_v58, %v828_v56 }
 0x144   : > { %831 = vst.msk [vmem:[%s334_s9] sm:$0x1] %vm776_vm2, %v830_v59 }
 0x145 PF: > { %s15_s17 = sadd.s32 1, %s1289_s17   ;;  %s1506_s15 = smov %s1285_s16 }
 0x146   : > { %p12_p5 = scmp.ge.s32.totalorder %s15_s17, 6   ;;  %s1507_s16 = smov %s1509_s18 }
 0x148   :  { %14 = sbr.rel (!%p12_p5) target bundleno = 2 (0x2), region = 85 }

// kernel: _lambda_.12
= control target key start
LH: loop header
LB: loop body
LE: loop exit
PB: predicated region body
PF: predicated region fallthrough
CT: control target
= control target key end

     0   :  { %s422_s0 = inlined_call_operand.vmem [shape: bf16[128,128], index: 0, kind: input, shape index: {}]   ;;  %s423_s1 = inlined_call_operand.vmem [shape: f32[1,128], index: 1, kind: input, shape index: {}]   ;;  %s424_s2 = inlined_call_operand.vmem [shape: f32[1,128], index: 2, kind: input, shape index: {}]   ;;  %s425_s3 = inlined_call_operand.vmem [shape: bf16[128,128], index: 3, kind: output, shape index: {}]  }
   0x1   :  { %v227_v0 = vld [vmem:[%s422_s0] sm:$0xff]   ;;  %v298_v4 = vld [vmem:[%s422_s0 + $0x8] sm:$0xff]   ;;  %v299_v5 = vld [vmem:[%s422_s0 + $0x10] sm:$0xff]  }
   0x2   :  { %v338_v1 = vld [vmem:[%s423_s1] ss:$0 sm:$0xff]  ;;  %v228_v2 = vunpack.c.l.bf16 %v227_v0  ;;  %v229_v3 = vunpack.c.h.bf16 %v227_v0  ;;  %v300_v6 = vld [vmem:[%s422_s0 + $0x18] sm:$0xff]   ;;  %v232_v8 = vunpack.c.l.bf16 %v298_v4  ;;  %v233_v9 = vunpack.c.h.bf16 %v298_v4  ;;  %v302_v33 = vld [vmem:[%s422_s0 + $0x28] sm:$0xff]  }
   0x3   :  { %v352_v7 = vld [vmem:[%s424_s2] ss:$0 sm:$0xff]  ;;  %v236_v10 = vunpack.c.l.bf16 %v299_v5  ;;  %v237_v11 = vunpack.c.h.bf16 %v299_v5  ;;  %v240_v14 = vunpack.c.l.bf16 %v300_v6  ;;  %v241_v15 = vunpack.c.h.bf16 %v300_v6  ;;  %v303_v38 = vld [vmem:[%s422_s0 + $0x30] sm:$0xff]   ;;  %v304_v43 = vld [vmem:[%s422_s0 + $0x38] sm:$0xff]  }
   0x4   :  { %v53_v12 = vmul.f32 %v228_v2, %v338_v1  ;;  %v54_v13 = vmul.f32 %v229_v3, %v338_v1  ;;  %v55_v16 = vmul.f32 %v232_v8, %v338_v1  ;;  %v56_v17 = vmul.f32 %v233_v9, %v338_v1  ;;  %v301_v28 = vld [vmem:[%s422_s0 + $0x20] sm:$0xff]  }
   0x5   :  { %v57_v18 = vmul.f32 %v236_v10, %v338_v1  ;;  %v58_v19 = vmul.f32 %v237_v11, %v338_v1  ;;  %v59_v22 = vmul.f32 %v240_v14, %v338_v1  ;;  %v60_v23 = vmul.f32 %v241_v15, %v338_v1 }
   0x6   :  { %v76_v20 = vadd.f32 %v352_v7, %v53_v12  ;;  %v77_v21 = vadd.f32 %v352_v7, %v54_v13  ;;  %v78_v24 = vadd.f32 %v352_v7, %v55_v16  ;;  %v79_v25 = vadd.f32 %v352_v7, %v56_v17 }
   0x7   :  { %v80_v26 = vadd.f32 %v352_v7, %v57_v18  ;;  %v81_v27 = vadd.f32 %v352_v7, %v58_v19  ;;  %v82_v31 = vadd.f32 %v352_v7, %v59_v22  ;;  %v83_v32 = vadd.f32 %v352_v7, %v60_v23 }
   0x8   :  { %v92_v29 = vmax.f32 %v76_v20, 0.0  ;;  %v93_v30 = vmax.f32 %v77_v21, 0.0  ;;  %v94_v34 = vmax.f32 %v78_v24, 0.0  ;;  %v95_v35 = vmax.f32 %v79_v25, 0.0 }
   0x9   :  { %v96_v36 = vmax.f32 %v80_v26, 0.0  ;;  %v97_v37 = vmax.f32 %v81_v27, 0.0  ;;  %v98_v40 = vmax.f32 %v82_v31, 0.0  ;;  %v99_v41 = vmax.f32 %v83_v32, 0.0 }
   0xa   :  { %v261_v39 = vpack.c.bf16 %v93_v30, %v92_v29  ;;  %v244_v42 = vunpack.c.l.bf16 %v301_v28  ;;  %v266_v44 = vpack.c.bf16 %v95_v35, %v94_v34  ;;  %v245_v46 = vunpack.c.h.bf16 %v301_v28 }
   0xb   :  { %v271_v45 = vpack.c.bf16 %v97_v37, %v96_v36  ;;  %v248_v47 = vunpack.c.l.bf16 %v302_v33  ;;  %v276_v48 = vpack.c.bf16 %v99_v41, %v98_v40  ;;  %v249_v50 = vunpack.c.h.bf16 %v302_v33 }
   0xc   :  { %262 = vst [vmem:[%s425_s3] sm:$0xff] %v261_v39   ;;  %v61_v49 = vmul.f32 %v244_v42, %v338_v1  ;;  %v252_v51 = vunpack.c.l.bf16 %v303_v38  ;;  %305 = vst [vmem:[%s425_s3 + $0x8] sm:$0xff] %v266_v44   ;;  %v62_v52 = vmul.f32 %v245_v46, %v338_v1  ;;  %v253_v54 = vunpack.c.h.bf16 %v303_v38 }
   0xd   :  { %306 = vst [vmem:[%s425_s3 + $0x10] sm:$0xff] %v271_v45   ;;  %v63_v53 = vmul.f32 %v248_v47, %v338_v1  ;;  %v256_v55 = vunpack.c.l.bf16 %v304_v43  ;;  %307 = vst [vmem:[%s425_s3 + $0x18] sm:$0xff] %v276_v48   ;;  %v64_v57 = vmul.f32 %v249_v50, %v338_v1  ;;  %v257_v59 = vunpack.c.h.bf16 %v304_v43 }
   0xe   :  { %v84_v56 = vadd.f32 %v352_v7, %v61_v49  ;;  %v65_v58 = vmul.f32 %v252_v51, %v338_v1  ;;  %v85_v60 = vadd.f32 %v352_v7, %v62_v52  ;;  %v66_v62 = vmul.f32 %v253_v54, %v338_v1 }
   0xf   :  { %v86_v61 = vadd.f32 %v352_v7, %v63_v53  ;;  %v67_v63 = vmul.f32 %v256_v55, %v338_v1  ;;  %v87_v2 = vadd.f32 %v352_v7, %v64_v57  ;;  %v68_v4 = vmul.f32 %v257_v59, %v338_v1 }
  0x10   :  { %v100_v0 = vmax.f32 %v84_v56, 0.0  ;;  %v88_v3 = vadd.f32 %v352_v7, %v65_v58  ;;  %v101_v5 = vmax.f32 %v85_v60, 0.0  ;;  %v89_v8 = vadd.f32 %v352_v7, %v66_v62 }
  0x11   :  { %v102_v6 = vmax.f32 %v86_v61, 0.0  ;;  %v90_v9 = vadd.f32 %v352_v7, %v67_v63  ;;  %v103_v10 = vmax.f32 %v87_v2, 0.0  ;;  %v91_v12 = vadd.f32 %v352_v7, %v68_v4 }
  0x12   :  { %v104_v11 = vmax.f32 %v88_v3, 0.0  ;;  %v281_v13 = vpack.c.bf16 %v101_v5, %v100_v0  ;;  %v105_v14 = vmax.f32 %v89_v8, 0.0 }
  0x13   :  { %v106_v15 = vmax.f32 %v90_v9, 0.0  ;;  %v286_v16 = vpack.c.bf16 %v103_v10, %v102_v6  ;;  %v107_v17 = vmax.f32 %v91_v12, 0.0 }
  0x14   :  { %308 = vst [vmem:[%s425_s3 + $0x20] sm:$0xff] %v281_v13   ;;  %v291_v1 = vpack.c.bf16 %v105_v14, %v104_v11 }
  0x15   :  { %309 = vst [vmem:[%s425_s3 + $0x28] sm:$0xff] %v286_v16   ;;  %v296_v18 = vpack.c.bf16 %v107_v17, %v106_v15 }
  0x16   :  { %310 = vst [vmem:[%s425_s3 + $0x30] sm:$0xff] %v291_v1  }
  0x17   :  { %311 = vst [vmem:[%s425_s3 + $0x38] sm:$0xff] %v296_v18  }

// kernel: _lambda_.13
= control target key start
LH: loop header
LB: loop body
LE: loop exit
PB: predicated region body
PF: predicated region fallthrough
CT: control target
= control target key end

     0   :  { %s2238_s15 = smov 0   ;;  %s2240_s16 = smov 0   ;;  %s2816_s0 = inlined_call_operand.vmem [shape: bf16[4,512,128], index: 0, kind: input, shape index: {}]   ;;  %s2817_s1 = inlined_call_operand.vmem [shape: bf16[4,128,16], index: 1, kind: input, shape index: {}]   ;;  %s2818_s2 = inlined_call_operand.vmem [shape: bf16[4,512,16], index: 2, kind: output, shape index: {0}]   ;;  %s2819_s3 = inlined_call_operand.vmem [shape: f32[4,1,1,16], index: 3, kind: output, shape index: {1}]   ;;  %s2820_s4 = inlined_call_operand.vmem [shape: f32[4,1,1,16], index: 4, kind: output, shape index: {2}]  }
   0x1   :  { %s2242_s17 = smov 0  }
   0x2 LB: > { %s34_s18 = sadd.s32 1, %s2207_s16  ;;  %p1809_p0 = scmp.ge.s32.totalorder %s2211_s17, 1  ;;  %s2211_s17 = sphi %s2242_s17, %s15_s17   ;;  %s2207_s16 = sphi %s2240_s16, %s2822_s16   ;;  %s2203_s15 = sphi %s2238_s15, %s2821_s15  }
   0x3   : > { %p36_p1 = scmp.ge.s32.totalorder %s34_s18, 4  ;;  %p220_p2 = scmp.lt.s32.totalorder %s2211_s17, 5 }
   0x5   : > { %s2824_s18 = smov (%p36_p1, %s34_s18), 0  ;;  %p221_p3 = pnand %p1809_p0, %p220_p2 }
   0x6   : > { %p284_p4 = scmp.lt.s32.totalorder (!%p221_p3), %s2203_s15, 3  ;;  %vm1198_vm0 = vcmask (!%p221_p3), 125952   ;;  %vm1263_vm1 = vcmask (!%p221_p3), 130048   ;;  %vm1397_vm2 = vcmask (!%p221_p3), 122880  }
   0x7   : > { %224 = sbr.rel (%p221_p3) target bundleno = 407 (0x197), region = 28 }
   0xe   : > { %s2826_s15 = smov (!%p284_p4, %s2203_s15), 3 }
   0xf   : > { %s1923_s19 = sshll.u32 %s2826_s15, 6  ;;  %s1922_s23 = sshll.u32 %s2826_s15, 8 }
  0x10   : > { %s2262_s22 = scalar_lea.vmem %s2817_s1, %s1923_s19  ;;  %s2273_s26 = scalar_lea.vmem %s2816_s0, %s1922_s23 }
  0x11   : > { %v2149_v0 = vld [vmem:[%s2262_s22] sm:$0xff]   ;;  %v2150_v1 = vld [vmem:[%s2262_s22 + $0x8] sm:$0xff]   ;;  %v2151_v2 = vld [vmem:[%s2262_s22 + $0x10] sm:$0xff]   ;;  %s2317_s29 = scalar_lea.vmem %s2818_s2, %s1922_s23  ;;  %s322_s6 = scalar_lea.vmem %s2819_s3, %s2826_s15 }
  0x12   : > { %2029 = vmatprep.subr.bf16.mxu0 %v2149_v0  ;;  %2109 = vmatprep.subr.bf16.mxu1 %v2149_v0  ;;  %v2152_v3 = vld [vmem:[%s2262_s22 + $0x18] sm:$0xff]   ;;  %v2157_v4 = vld [vmem:[%s2273_s26] sm:$0xff]   ;;  %v2154_v6 = vld [vmem:[%s2262_s22 + $0x28] sm:$0xff]   ;;  %s331_s9 = scalar_lea.vmem %s2820_s4, %s2826_s15 }
  0x13   : > { %2030 = vmatpush3.bf16.msra.mxu0 %v2149_v0  ;;  %2117 = vmatpush3.bf16.msra.mxu1 %v2149_v0  ;;  %v2153_v5 = vld [vmem:[%s2262_s22 + $0x20] sm:$0xff]   ;;  %v2155_v7 = vld [vmem:[%s2262_s22 + $0x30] sm:$0xff]   ;;  %v2156_v8 = vld [vmem:[%s2262_s22 + $0x38] sm:$0xff]  }
  0x14   : > { %2031 = vmatprep.subr.bf16.mxu0 %v2150_v1  ;;  %2110 = vmatprep.subr.bf16.mxu1 %v2150_v1  ;;  %v2173_v9 = vld [vmem:[%s2273_s26 + $0x80] sm:$0xff]   ;;  %v2158_v10 = vld [vmem:[%s2273_s26 + $0x8] sm:$0xff]   ;;  %v2159_v11 = vld [vmem:[%s2273_s26 + $0x10] sm:$0xff]  }
  0x15   : > { %2045 = vmatprep.mubr.bf16.mxu0 %v2157_v4  ;;  %2077 = vmatprep.mubr.bf16.mxu1 %v2173_v9  ;;  %v2174_v12 = vld [vmem:[%s2273_s26 + $0x88] sm:$0xff]   ;;  %v2175_v13 = vld [vmem:[%s2273_s26 + $0x90] sm:$0xff]   ;;  %v2160_v14 = vld [vmem:[%s2273_s26 + $0x18] sm:$0xff]  }
  0x16   : > { %v2161_v15 = vld [vmem:[%s2273_s26 + $0x20] sm:$0xff]   ;;  %v2176_v16 = vld [vmem:[%s2273_s26 + $0x98] sm:$0xff]   ;;  %v2162_v18 = vld [vmem:[%s2273_s26 + $0x28] sm:$0xff]  }
  0x17   : > { %2032 = vmatpush3.bf16.msra.mxu0 %v2150_v1  ;;  %2118 = vmatpush3.bf16.msra.mxu1 %v2150_v1  ;;  %v2177_v17 = vld [vmem:[%s2273_s26 + $0xa0] sm:$0xff]   ;;  %v2178_v19 = vld [vmem:[%s2273_s26 + $0xa8] sm:$0xff]   ;;  %v2163_v20 = vld [vmem:[%s2273_s26 + $0x30] sm:$0xff]  }
  0x18   : > { %2033 = vmatprep.subr.bf16.mxu0 %v2151_v2  ;;  %2111 = vmatprep.subr.bf16.mxu1 %v2151_v2  ;;  %v2179_v21 = vld [vmem:[%s2273_s26 + $0xb0] sm:$0xff]   ;;  %v2164_v22 = vld [vmem:[%s2273_s26 + $0x38] sm:$0xff]   ;;  %v2165_v24 = vld [vmem:[%s2273_s26 + $0x40] sm:$0xff]  }
  0x19   : > { %v2180_v23 = vld [vmem:[%s2273_s26 + $0xb8] sm:$0xff]   ;;  %v2181_v25 = vld [vmem:[%s2273_s26 + $0xc0] sm:$0xff]   ;;  %v2166_v26 = vld [vmem:[%s2273_s26 + $0x48] sm:$0xff]  }
  0x1a   : > { %v2182_v27 = vld [vmem:[%s2273_s26 + $0xc8] sm:$0xff]   ;;  %v2167_v28 = vld [vmem:[%s2273_s26 + $0x50] sm:$0xff]   ;;  %v2168_v30 = vld [vmem:[%s2273_s26 + $0x58] sm:$0xff]  }
  0x1b   : > { %2034 = vmatpush3.bf16.msra.mxu0 %v2151_v2  ;;  %2119 = vmatpush3.bf16.msra.mxu1 %v2151_v2  ;;  %v2183_v29 = vld [vmem:[%s2273_s26 + $0xd0] sm:$0xff]   ;;  %v2184_v31 = vld [vmem:[%s2273_s26 + $0xd8] sm:$0xff]   ;;  %v2169_v32 = vld [vmem:[%s2273_s26 + $0x60] sm:$0xff]  }
  0x1c   : > { %2035 = vmatprep.subr.bf16.mxu0 %v2152_v3  ;;  %2112 = vmatprep.subr.bf16.mxu1 %v2152_v3  ;;  %v2185_v33 = vld [vmem:[%s2273_s26 + $0xe0] sm:$0xff]   ;;  %v2170_v34 = vld [vmem:[%s2273_s26 + $0x68] sm:$0xff]   ;;  %v2171_v36 = vld [vmem:[%s2273_s26 + $0x70] sm:$0xff]  }
  0x1d   : > { %v2186_v35 = vld [vmem:[%s2273_s26 + $0xe8] sm:$0xff]   ;;  %v2187_v37 = vld [vmem:[%s2273_s26 + $0xf0] sm:$0xff]   ;;  %v2172_v38 = vld [vmem:[%s2273_s26 + $0x78] sm:$0xff]  }
  0x1e   : > { %v2188_v39 = vld [vmem:[%s2273_s26 + $0xf8] sm:$0xff]  }
  0x1f   : > { %2036 = vmatpush3.bf16.msra.mxu0 %v2152_v3  ;;  %2120 = vmatpush3.bf16.msra.mxu1 %v2152_v3 }
  0x20   : > { %2037 = vmatprep.subr.bf16.mxu0 %v2153_v5  ;;  %2113 = vmatprep.subr.bf16.mxu1 %v2153_v5 }
  0x23   : > { %2038 = vmatpush3.bf16.msra.mxu0 %v2153_v5  ;;  %2121 = vmatpush3.bf16.msra.mxu1 %v2153_v5 }
  0x24   : > { %2039 = vmatprep.subr.bf16.mxu0 %v2154_v6  ;;  %2114 = vmatprep.subr.bf16.mxu1 %v2154_v6 }
  0x27   : > { %2040 = vmatpush3.bf16.msra.mxu0 %v2154_v6  ;;  %2122 = vmatpush3.bf16.msra.mxu1 %v2154_v6 }
  0x28   : > { %2041 = vmatprep.subr.bf16.mxu0 %v2155_v7  ;;  %2115 = vmatprep.subr.bf16.mxu1 %v2155_v7 }
  0x2b   : > { %2042 = vmatpush3.bf16.msra.mxu0 %v2155_v7  ;;  %2123 = vmatpush3.bf16.msra.mxu1 %v2155_v7 }
  0x2c   : > { %2043 = vmatprep.subr.bf16.mxu0 %v2156_v8  ;;  %2116 = vmatprep.subr.bf16.mxu1 %v2156_v8 }
  0x2f   : > { %2044 = vmatpush3.bf16.msra.mxu0 %v2156_v8  ;;  %2124 = vmatpush3.bf16.msra.mxu1 %v2156_v8 }
  0x32   : > { %2046 = vmatmul.mubr.bf16.vlgmr.msra.gmra.mrb[0].mxu0 %v2158_v10  ;;  %2078 = vmatmul.mubr.bf16.vlgmr.msra.gmra.mrb[0].mxu1 %v2174_v12 }
  0x33   : > { %2049 = vmatprep.mubr.bf16.mxu0 %v2159_v11  ;;  %2081 = vmatprep.mubr.bf16.mxu1 %v2175_v13 }
  0x3a   : > { %2050 = vmatmul.mubr.bf16.gmra.mrb[4].mxu0 %v2160_v14  ;;  %2082 = vmatmul.mubr.bf16.gmra.mrb[4].mxu1 %v2176_v16 }
  0x3b   : > { %2053 = vmatprep.mubr.bf16.mxu0 %v2161_v15  ;;  %2085 = vmatprep.mubr.bf16.mxu1 %v2177_v17 }
  0x42   : > { %2054 = vmatmul.mubr.bf16.gmra.mrb[8].mxu0 %v2162_v18  ;;  %2086 = vmatmul.mubr.bf16.gmra.mrb[8].mxu1 %v2178_v19 }
  0x43   : > { %2057 = vmatprep.mubr.bf16.mxu0 %v2163_v20  ;;  %2089 = vmatprep.mubr.bf16.mxu1 %v2179_v21 }
  0x4a   : > { %2058 = vmatmul.mubr.bf16.gmra.mrb[12].mxu0 %v2164_v22  ;;  %2090 = vmatmul.mubr.bf16.gmra.mrb[12].mxu1 %v2180_v23 }
  0x4b   : > { %2061 = vmatprep.mubr.bf16.mxu0 %v2165_v24  ;;  %2093 = vmatprep.mubr.bf16.mxu1 %v2181_v25 }
  0x52   : > { %2062 = vmatmul.mubr.bf16.gmra.mrb[16].mxu0 %v2166_v26  ;;  %2094 = vmatmul.mubr.bf16.gmra.mrb[16].mxu1 %v2182_v27 }
  0x53   : > { %2065 = vmatprep.mubr.bf16.mxu0 %v2167_v28  ;;  %2097 = vmatprep.mubr.bf16.mxu1 %v2183_v29 }
  0x5a   : > { %2066 = vmatmul.mubr.bf16.gmra.mrb[20].mxu0 %v2168_v30  ;;  %2098 = vmatmul.mubr.bf16.gmra.mrb[20].mxu1 %v2184_v31 }
  0x5b   : > { %2069 = vmatprep.mubr.bf16.mxu0 %v2169_v32  ;;  %2101 = vmatprep.mubr.bf16.mxu1 %v2185_v33 }
  0x62   : > { %2070 = vmatmul.mubr.bf16.gmra.mrb[24].mxu0 %v2170_v34  ;;  %2102 = vmatmul.mubr.bf16.gmra.mrb[24].mxu1 %v2186_v35 }
  0x63   : > { %2073 = vmatprep.mubr.bf16.mxu0 %v2171_v36  ;;  %2105 = vmatprep.mubr.bf16.mxu1 %v2187_v37 }
  0x6a   : > { %2074 = vmatmul.mubr.bf16.gmra.mrb[28].mxu0 %v2172_v38  ;;  %2106 = vmatmul.mubr.bf16.gmra.mrb[28].mxu1 %v2188_v39 }
 0x105   : > { %v2047_v40 = vpop.f32.mrb[0].mxu0  ;;  %v2319_v41 = vpop.f32.mrb[0].mxu1 }
 0x106   : > { %v1927_v42 = vpack.c.bf16 %v2047_v40, %v2047_v40  ;;  %v687_v43 = vpop.f32.mrb[1].mxu0  ;;  %v1959_v44 = vpack.c.bf16 %v2319_v41, %v2319_v41  ;;  %v2323_v45 = vpop.f32.mrb[1].mxu1  ;;  %v1401_v50 = vmul.f32 %v2047_v40, %v2047_v40  ;;  %v1267_v61 = vsel %vm1263_vm1, %v2047_v40, 0.0 }
 0x107   : > { %v1925_v46 = vpack.c.bf16 %v687_v43, %v687_v43  ;;  %v1399_v47 = vmul.f32 %v687_v43, %v687_v43  ;;  %v2048_v48 = vpop.f32.mrb[2].mxu0  ;;  %v2325_v49 = vpop.f32.mrb[2].mxu1  ;;  %v1264_v54 = vsel %vm1263_vm1, %v687_v43, 0.0  ;;  %v1957_v60 = vpack.c.bf16 %v2323_v45, %v2323_v45 }
 0x108   : > { %1201 = vst.msk [vmem:[%s2317_s29 + $0x8] sm:$0xf] %vm1198_vm0, %v1927_v42  ;;  %v1928_v51 = vpack.c.bf16 %v2048_v48, %v2048_v48  ;;  %v690_v52 = vpop.f32.mrb[3].mxu0  ;;  %1233 = vst.msk [vmem:[%s2317_s29 + $0x88] sm:$0xf] %vm1198_vm0, %v1959_v44  ;;  %v2331_v53 = vpop.f32.mrb[3].mxu1  ;;  %v1402_v58 = vmul.f32 %v2048_v48, %v2048_v48  ;;  %v1960_v0 = vpack.c.bf16 %v2325_v49, %v2325_v49 }
 0x109   : > { %1199 = vst.msk [vmem:[%s2317_s29] sm:$0xf] %vm1198_vm0, %v1925_v46  ;;  %v1926_v55 = vpack.c.bf16 %v690_v52, %v690_v52  ;;  %v1265_v56 = vsel %vm1263_vm1, %v690_v52, 0.0  ;;  %v1400_v57 = vmul.f32 %v690_v52, %v690_v52  ;;  %v1463_v62 = vsel %vm1263_vm1, %v1399_v47, 0.0  ;;  %1231 = vst.msk [vmem:[%s2317_s29 + $0x80] sm:$0xf] %vm1198_vm0, %v1957_v60 }
 0x10a   : > { %1202 = vst.msk [vmem:[%s2317_s29 + $0xc] sm:$0xf] %vm1198_vm0, %v1928_v51  ;;  %v1266_v59 = vadd.f32 %v1265_v56, %v1264_v54  ;;  %v1466_v3 = vsel %vm1263_vm1, %v1401_v50, 0.0  ;;  %1234 = vst.msk [vmem:[%s2317_s29 + $0x8c] sm:$0xf] %vm1198_vm0, %v1960_v0  ;;  %v1958_v5 = vpack.c.bf16 %v2331_v53, %v2331_v53  ;;  %v1269_v7 = vsel %vm1263_vm1, %v2048_v48, 0.0 }
 0x10b   : > { %1200 = vst.msk [vmem:[%s2317_s29 + $0x4] sm:$0xf] %vm1198_vm0, %v1926_v55  ;;  %v1464_v63 = vsel %vm1263_vm1, %v1400_v57, 0.0  ;;  %v1468_v8 = vsel %vm1263_vm1, %v1402_v58, 0.0 }
 0x10c   : > { %v1268_v1 = vadd.f32 %v1267_v61, %v1266_v59  ;;  %v1465_v2 = vadd.f32 %v1464_v63, %v1463_v62  ;;  %1232 = vst.msk [vmem:[%s2317_s29 + $0x84] sm:$0xf] %vm1198_vm0, %v1958_v5 }
 0x10d   : > { %v2051_v4 = vpop.f32.mrb[4].mxu0  ;;  %v2355_v6 = vpop.f32.mrb[4].mxu1 }
 0x10e   : > { %v1467_v9 = vadd.f32 %v1466_v3, %v1465_v2  ;;  %v1931_v10 = vpack.c.bf16 %v2051_v4, %v2051_v4  ;;  %v703_v11 = vpop.f32.mrb[5].mxu0  ;;  %v2359_v12 = vpop.f32.mrb[5].mxu1  ;;  %v1270_v14 = vadd.f32 %v1269_v7, %v1268_v1  ;;  %v1405_v26 = vmul.f32 %v2051_v4, %v2051_v4 }
 0x10f   : > { %v1929_v13 = vpack.c.bf16 %v703_v11, %v703_v11  ;;  %v1271_v15 = vsel %vm1263_vm1, %v703_v11, 0.0  ;;  %v1403_v16 = vmul.f32 %v703_v11, %v703_v11  ;;  %v2052_v17 = vpop.f32.mrb[6].mxu0  ;;  %v2364_v18 = vpop.f32.mrb[6].mxu1  ;;  %v1963_v31 = vpack.c.bf16 %v2355_v6, %v2355_v6 }
 0x110   : > { %1205 = vst.msk [vmem:[%s2317_s29 + $0x18] sm:$0xf] %vm1198_vm0, %v1931_v10  ;;  %v1469_v19 = vadd.f32 %v1468_v8, %v1467_v9  ;;  %v1932_v20 = vpack.c.bf16 %v2052_v17, %v2052_v17  ;;  %v706_v21 = vpop.f32.mrb[7].mxu0  ;;  %v2368_v22 = vpop.f32.mrb[7].mxu1  ;;  %v1272_v23 = vadd.f32 %v1271_v15, %v1270_v14  ;;  %v1275_v32 = vsel %vm1263_vm1, %v2051_v4, 0.0 }
 0x111   : > { %1203 = vst.msk [vmem:[%s2317_s29 + $0x10] sm:$0xf] %vm1198_vm0, %v1929_v13  ;;  %v1470_v24 = vsel %vm1263_vm1, %v1403_v16, 0.0  ;;  %v1930_v25 = vpack.c.bf16 %v706_v21, %v706_v21  ;;  %v1273_v28 = vsel %vm1263_vm1, %v706_v21, 0.0  ;;  %v1404_v29 = vmul.f32 %v706_v21, %v706_v21  ;;  %1237 = vst.msk [vmem:[%s2317_s29 + $0x98] sm:$0xf] %vm1198_vm0, %v1963_v31 }
 0x112   : > { %v1471_v27 = vadd.f32 %v1470_v24, %v1469_v19  ;;  %1206 = vst.msk [vmem:[%s2317_s29 + $0x1c] sm:$0xf] %vm1198_vm0, %v1932_v20  ;;  %v1274_v30 = vadd.f32 %v1273_v28, %v1272_v23  ;;  %v1406_v33 = vmul.f32 %v2052_v17, %v2052_v17  ;;  %v1961_v35 = vpack.c.bf16 %v2359_v12, %v2359_v12 }
 0x113   : > { %1204 = vst.msk [vmem:[%s2317_s29 + $0x14] sm:$0xf] %vm1198_vm0, %v1930_v25  ;;  %v1472_v34 = vsel %vm1263_vm1, %v1404_v29, 0.0  ;;  %v1474_v40 = vsel %vm1263_vm1, %v1405_v26, 0.0  ;;  %v1277_v42 = vsel %vm1263_vm1, %v2052_v17, 0.0  ;;  %v1964_v5 = vpack.c.bf16 %v2364_v18, %v2364_v18 }
 0x114   : > { %v1276_v36 = vadd.f32 %v1275_v32, %v1274_v30  ;;  %v1473_v37 = vadd.f32 %v1472_v34, %v1471_v27  ;;  %1235 = vst.msk [vmem:[%s2317_s29 + $0x90] sm:$0xf] %vm1198_vm0, %v1961_v35  ;;  %v1476_v55 = vsel %vm1263_vm1, %v1406_v33, 0.0  ;;  %v1962_v14 = vpack.c.bf16 %v2368_v22, %v2368_v22 }
 0x115   : > { %v2055_v38 = vpop.f32.mrb[8].mxu0  ;;  %v2386_v39 = vpop.f32.mrb[8].mxu1  ;;  %1238 = vst.msk [vmem:[%s2317_s29 + $0x9c] sm:$0xf] %vm1198_vm0, %v1964_v5 }
 0x116   : > { %v1935_v43 = vpack.c.bf16 %v2055_v38, %v2055_v38  ;;  %v719_v44 = vpop.f32.mrb[9].mxu0  ;;  %v2392_v46 = vpop.f32.mrb[9].mxu1  ;;  %v1475_v47 = vadd.f32 %v1474_v40, %v1473_v37  ;;  %v1278_v50 = vadd.f32 %v1277_v42, %v1276_v36  ;;  %v1409_v63 = vmul.f32 %v2055_v38, %v2055_v38  ;;  %1236 = vst.msk [vmem:[%s2317_s29 + $0x94] sm:$0xf] %vm1198_vm0, %v1962_v14 }
 0x117   : > { %v1933_v48 = vpack.c.bf16 %v719_v44, %v719_v44  ;;  %v1279_v51 = vsel %vm1263_vm1, %v719_v44, 0.0  ;;  %v2056_v52 = vpop.f32.mrb[10].mxu0  ;;  %v2395_v54 = vpop.f32.mrb[10].mxu1  ;;  %v1407_v56 = vmul.f32 %v719_v44, %v719_v44  ;;  %v1283_v7 = vsel %vm1263_vm1, %v2055_v38, 0.0 }
 0x118   : > { %1209 = vst.msk [vmem:[%s2317_s29 + $0x28] sm:$0xf] %vm1198_vm0, %v1935_v43  ;;  %v1936_v57 = vpack.c.bf16 %v2056_v52, %v2056_v52  ;;  %v722_v58 = vpop.f32.mrb[11].mxu0  ;;  %v2400_v59 = vpop.f32.mrb[11].mxu1  ;;  %v1280_v60 = vadd.f32 %v1279_v51, %v1278_v50  ;;  %v1477_v61 = vadd.f32 %v1476_v55, %v1475_v47  ;;  %v1410_v8 = vmul.f32 %v2056_v52, %v2056_v52 }
 0x119   : > { %1207 = vst.msk [vmem:[%s2317_s29 + $0x20] sm:$0xf] %vm1198_vm0, %v1933_v48  ;;  %v1934_v62 = vpack.c.bf16 %v722_v58, %v722_v58  ;;  %v1478_v0 = vsel %vm1263_vm1, %v1407_v56, 0.0  ;;  %v1281_v1 = vsel %vm1263_vm1, %v722_v58, 0.0  ;;  %v1408_v2 = vmul.f32 %v722_v58, %v722_v58 }
 0x11a   : > { %1210 = vst.msk [vmem:[%s2317_s29 + $0x2c] sm:$0xf] %vm1198_vm0, %v1936_v57  ;;  %v1479_v3 = vadd.f32 %v1478_v0, %v1477_v61  ;;  %v1282_v4 = vadd.f32 %v1281_v1, %v1280_v60  ;;  %v1482_v16 = vsel %vm1263_vm1, %v1409_v63, 0.0  ;;  %v1285_v17 = vsel %vm1263_vm1, %v2056_v52, 0.0 }
 0x11b   : > { %1208 = vst.msk [vmem:[%s2317_s29 + $0x24] sm:$0xf] %vm1198_vm0, %v1934_v62  ;;  %v1480_v9 = vsel %vm1263_vm1, %v1408_v2, 0.0  ;;  %v1484_v29 = vsel %vm1263_vm1, %v1410_v8, 0.0  ;;  %v1967_v47 = vpack.c.bf16 %v2386_v39, %v2386_v39  ;;  %v1965_v57 = vpack.c.bf16 %v2392_v46, %v2392_v46 }
 0x11c   : > { %v1284_v10 = vadd.f32 %v1283_v7, %v1282_v4  ;;  %v1481_v11 = vadd.f32 %v1480_v9, %v1479_v3 }
 0x11d   : > { %v2059_v13 = vpop.f32.mrb[12].mxu0  ;;  %v2418_v15 = vpop.f32.mrb[12].mxu1  ;;  %1241 = vst.msk [vmem:[%s2317_s29 + $0xa8] sm:$0xf] %vm1198_vm0, %v1967_v47  ;;  %1239 = vst.msk [vmem:[%s2317_s29 + $0xa0] sm:$0xf] %vm1198_vm0, %v1965_v57 }
 0x11e   : > { %v1939_v19 = vpack.c.bf16 %v2059_v13, %v2059_v13  ;;  %v735_v20 = vpop.f32.mrb[13].mxu0  ;;  %v2422_v21 = vpop.f32.mrb[13].mxu1  ;;  %v1483_v23 = vadd.f32 %v1482_v16, %v1481_v11  ;;  %v1286_v25 = vadd.f32 %v1285_v17, %v1284_v10  ;;  %v1413_v37 = vmul.f32 %v2059_v13, %v2059_v13 }
 0x11f   : > { %v1937_v24 = vpack.c.bf16 %v735_v20, %v735_v20  ;;  %v1287_v26 = vsel %vm1263_vm1, %v735_v20, 0.0  ;;  %v2060_v27 = vpop.f32.mrb[14].mxu0  ;;  %v2427_v28 = vpop.f32.mrb[14].mxu1  ;;  %v1411_v30 = vmul.f32 %v735_v20, %v735_v20  ;;  %v1291_v48 = vsel %vm1263_vm1, %v2059_v13, 0.0 }
 0x120   : > { %1213 = vst.msk [vmem:[%s2317_s29 + $0x38] sm:$0xf] %vm1198_vm0, %v1939_v19  ;;  %v1940_v31 = vpack.c.bf16 %v2060_v27, %v2060_v27  ;;  %v738_v32 = vpop.f32.mrb[15].mxu0  ;;  %v2432_v33 = vpop.f32.mrb[15].mxu1  ;;  %v1288_v34 = vadd.f32 %v1287_v26, %v1286_v25  ;;  %v1485_v35 = vadd.f32 %v1484_v29, %v1483_v23  ;;  %v1414_v50 = vmul.f32 %v2060_v27, %v2060_v27 }
 0x121   : > { %1211 = vst.msk [vmem:[%s2317_s29 + $0x30] sm:$0xf] %vm1198_vm0, %v1937_v24  ;;  %v1938_v36 = vpack.c.bf16 %v738_v32, %v738_v32  ;;  %v1486_v38 = vsel %vm1263_vm1, %v1411_v30, 0.0  ;;  %v1289_v40 = vsel %vm1263_vm1, %v738_v32, 0.0  ;;  %v1412_v42 = vmul.f32 %v738_v32, %v738_v32 }
 0x122   : > { %1214 = vst.msk [vmem:[%s2317_s29 + $0x3c] sm:$0xf] %vm1198_vm0, %v1940_v31  ;;  %v1487_v43 = vadd.f32 %v1486_v38, %v1485_v35  ;;  %v1290_v44 = vadd.f32 %v1289_v40, %v1288_v34  ;;  %v1490_v60 = vsel %vm1263_vm1, %v1413_v37, 0.0  ;;  %v1293_v61 = vsel %vm1263_vm1, %v2060_v27, 0.0 }
 0x123   : > { %1212 = vst.msk [vmem:[%s2317_s29 + $0x34] sm:$0xf] %vm1198_vm0, %v1938_v36  ;;  %v1488_v51 = vsel %vm1263_vm1, %v1412_v42, 0.0  ;;  %v1492_v8 = vsel %vm1263_vm1, %v1414_v50, 0.0  ;;  %v1968_v27 = vpack.c.bf16 %v2395_v54, %v2395_v54  ;;  %v1966_v36 = vpack.c.bf16 %v2400_v59, %v2400_v59 }
 0x124   : > { %v1292_v52 = vadd.f32 %v1291_v48, %v1290_v44  ;;  %v1489_v55 = vadd.f32 %v1488_v51, %v1487_v43 }
 0x125   : > { %v2063_v56 = vpop.f32.mrb[16].mxu0  ;;  %v2450_v58 = vpop.f32.mrb[16].mxu1  ;;  %1242 = vst.msk [vmem:[%s2317_s29 + $0xac] sm:$0xf] %vm1198_vm0, %v1968_v27  ;;  %1240 = vst.msk [vmem:[%s2317_s29 + $0xa4] sm:$0xf] %vm1198_vm0, %v1966_v36 }
 0x126   : > { %v1943_v62 = vpack.c.bf16 %v2063_v56, %v2063_v56  ;;  %v751_v63 = vpop.f32.mrb[17].mxu0  ;;  %v2454_v0 = vpop.f32.mrb[17].mxu1  ;;  %v1491_v1 = vadd.f32 %v1490_v60, %v1489_v55  ;;  %v1294_v3 = vadd.f32 %v1293_v61, %v1292_v52  ;;  %v1417_v19 = vmul.f32 %v2063_v56, %v2063_v56 }
 0x127   : > { %v1941_v2 = vpack.c.bf16 %v751_v63, %v751_v63  ;;  %v1295_v4 = vsel %vm1263_vm1, %v751_v63, 0.0  ;;  %v2064_v5 = vpop.f32.mrb[18].mxu0  ;;  %v2459_v7 = vpop.f32.mrb[18].mxu1  ;;  %v1415_v9 = vmul.f32 %v751_v63, %v751_v63  ;;  %v1299_v29 = vsel %vm1263_vm1, %v2063_v56, 0.0 }
 0x128   : > { %1217 = vst.msk [vmem:[%s2317_s29 + $0x48] sm:$0xf] %vm1198_vm0, %v1943_v62  ;;  %v1944_v10 = vpack.c.bf16 %v2064_v5, %v2064_v5  ;;  %v754_v11 = vpop.f32.mrb[19].mxu0  ;;  %v2464_v13 = vpop.f32.mrb[19].mxu1  ;;  %v1296_v14 = vadd.f32 %v1295_v4, %v1294_v3  ;;  %v1493_v16 = vadd.f32 %v1492_v8, %v1491_v1  ;;  %v1418_v30 = vmul.f32 %v2064_v5, %v2064_v5 }
 0x129   : > { %1215 = vst.msk [vmem:[%s2317_s29 + $0x40] sm:$0xf] %vm1198_vm0, %v1941_v2  ;;  %v1942_v17 = vpack.c.bf16 %v754_v11, %v754_v11  ;;  %v1494_v20 = vsel %vm1263_vm1, %v1415_v9, 0.0  ;;  %v1297_v23 = vsel %vm1263_vm1, %v754_v11, 0.0  ;;  %v1416_v24 = vmul.f32 %v754_v11, %v754_v11 }
 0x12a   : > { %1218 = vst.msk [vmem:[%s2317_s29 + $0x4c] sm:$0xf] %vm1198_vm0, %v1944_v10  ;;  %v1495_v25 = vadd.f32 %v1494_v20, %v1493_v16  ;;  %v1298_v26 = vadd.f32 %v1297_v23, %v1296_v14  ;;  %v1498_v38 = vsel %vm1263_vm1, %v1417_v19, 0.0  ;;  %v1301_v40 = vsel %vm1263_vm1, %v2064_v5, 0.0 }
 0x12b   : > { %1216 = vst.msk [vmem:[%s2317_s29 + $0x44] sm:$0xf] %vm1198_vm0, %v1942_v17  ;;  %v1496_v31 = vsel %vm1263_vm1, %v1416_v24, 0.0  ;;  %v1500_v56 = vsel %vm1263_vm1, %v1418_v30, 0.0  ;;  %v1971_v11 = vpack.c.bf16 %v2418_v15, %v2418_v15  ;;  %v1969_v24 = vpack.c.bf16 %v2422_v21, %v2422_v21 }
 0x12c   : > { %v1300_v32 = vadd.f32 %v1299_v29, %v1298_v26  ;;  %v1497_v34 = vadd.f32 %v1496_v31, %v1495_v25 }
 0x12d   : > { %v2067_v35 = vpop.f32.mrb[20].mxu0  ;;  %v2482_v37 = vpop.f32.mrb[20].mxu1  ;;  %1245 = vst.msk [vmem:[%s2317_s29 + $0xb8] sm:$0xf] %vm1198_vm0, %v1971_v11  ;;  %1243 = vst.msk [vmem:[%s2317_s29 + $0xb0] sm:$0xf] %vm1198_vm0, %v1969_v24 }
 0x12e   : > { %v1947_v42 = vpack.c.bf16 %v2067_v35, %v2067_v35  ;;  %v767_v43 = vpop.f32.mrb[21].mxu0  ;;  %v2486_v44 = vpop.f32.mrb[21].mxu1  ;;  %v1499_v47 = vadd.f32 %v1498_v38, %v1497_v34  ;;  %v1302_v50 = vadd.f32 %v1301_v40, %v1300_v32  ;;  %v1421_v3 = vmul.f32 %v2067_v35, %v2067_v35 }
 0x12f   : > { %v1945_v48 = vpack.c.bf16 %v767_v43, %v767_v43  ;;  %v1303_v51 = vsel %vm1263_vm1, %v767_v43, 0.0  ;;  %v2068_v52 = vpop.f32.mrb[22].mxu0  ;;  %v2491_v55 = vpop.f32.mrb[22].mxu1  ;;  %v1419_v57 = vmul.f32 %v767_v43, %v767_v43  ;;  %v1307_v14 = vsel %vm1263_vm1, %v2067_v35, 0.0 }
 0x130   : > { %1221 = vst.msk [vmem:[%s2317_s29 + $0x58] sm:$0xf] %vm1198_vm0, %v1947_v42  ;;  %v1948_v60 = vpack.c.bf16 %v2068_v52, %v2068_v52  ;;  %v770_v61 = vpop.f32.mrb[23].mxu0  ;;  %v2496_v62 = vpop.f32.mrb[23].mxu1  ;;  %v1304_v63 = vadd.f32 %v1303_v51, %v1302_v50  ;;  %v1501_v1 = vadd.f32 %v1500_v56, %v1499_v47  ;;  %v1422_v16 = vmul.f32 %v2068_v52, %v2068_v52 }
 0x131   : > { %1219 = vst.msk [vmem:[%s2317_s29 + $0x50] sm:$0xf] %vm1198_vm0, %v1945_v48  ;;  %v1946_v2 = vpack.c.bf16 %v770_v61, %v770_v61  ;;  %v1502_v4 = vsel %vm1263_vm1, %v1419_v57, 0.0  ;;  %v1305_v5 = vsel %vm1263_vm1, %v770_v61, 0.0  ;;  %v1420_v8 = vmul.f32 %v770_v61, %v770_v61 }
 0x132   : > { %1222 = vst.msk [vmem:[%s2317_s29 + $0x5c] sm:$0xf] %vm1198_vm0, %v1948_v60  ;;  %v1503_v9 = vadd.f32 %v1502_v4, %v1501_v1  ;;  %v1306_v10 = vadd.f32 %v1305_v5, %v1304_v63  ;;  %v1506_v26 = vsel %vm1263_vm1, %v1421_v3, 0.0  ;;  %v1309_v27 = vsel %vm1263_vm1, %v2068_v52, 0.0 }
 0x133   : > { %1220 = vst.msk [vmem:[%s2317_s29 + $0x54] sm:$0xf] %vm1198_vm0, %v1946_v2  ;;  %v1504_v17 = vsel %vm1263_vm1, %v1420_v8, 0.0  ;;  %v1508_v42 = vsel %vm1263_vm1, %v1422_v16, 0.0  ;;  %v1972_v3 = vpack.c.bf16 %v2427_v28, %v2427_v28 }
 0x134   : > { %v1308_v19 = vadd.f32 %v1307_v14, %v1306_v10  ;;  %v1505_v20 = vadd.f32 %v1504_v17, %v1503_v9  ;;  %v1970_v14 = vpack.c.bf16 %v2432_v33, %v2432_v33 }
 0x135   : > { %v2071_v23 = vpop.f32.mrb[24].mxu0  ;;  %v2514_v25 = vpop.f32.mrb[24].mxu1  ;;  %1246 = vst.msk [vmem:[%s2317_s29 + $0xbc] sm:$0xf] %vm1198_vm0, %v1972_v3 }
 0x136   : > { %v1951_v29 = vpack.c.bf16 %v2071_v23, %v2071_v23  ;;  %v783_v30 = vpop.f32.mrb[25].mxu0  ;;  %v2518_v31 = vpop.f32.mrb[25].mxu1  ;;  %v1507_v32 = vadd.f32 %v1506_v26, %v1505_v20  ;;  %v1310_v35 = vadd.f32 %v1309_v27, %v1308_v19  ;;  %v1425_v57 = vmul.f32 %v2071_v23, %v2071_v23  ;;  %1244 = vst.msk [vmem:[%s2317_s29 + $0xb4] sm:$0xf] %vm1198_vm0, %v1970_v14 }
 0x137   : > { %v1949_v34 = vpack.c.bf16 %v783_v30, %v783_v30  ;;  %v1311_v36 = vsel %vm1263_vm1, %v783_v30, 0.0  ;;  %v2072_v38 = vpop.f32.mrb[26].mxu0  ;;  %v2523_v40 = vpop.f32.mrb[26].mxu1  ;;  %v1423_v43 = vmul.f32 %v783_v30, %v783_v30  ;;  %v1315_v4 = vsel %vm1263_vm1, %v2071_v23, 0.0 }
 0x138   : > { %1225 = vst.msk [vmem:[%s2317_s29 + $0x68] sm:$0xf] %vm1198_vm0, %v1951_v29  ;;  %v1952_v47 = vpack.c.bf16 %v2072_v38, %v2072_v38  ;;  %v786_v48 = vpop.f32.mrb[27].mxu0  ;;  %v2528_v50 = vpop.f32.mrb[27].mxu1  ;;  %v1312_v51 = vadd.f32 %v1311_v36, %v1310_v35  ;;  %v1509_v52 = vadd.f32 %v1508_v42, %v1507_v32  ;;  %v1426_v5 = vmul.f32 %v2072_v38, %v2072_v38 }
 0x139   : > { %1223 = vst.msk [vmem:[%s2317_s29 + $0x60] sm:$0xf] %vm1198_vm0, %v1949_v34  ;;  %v1950_v56 = vpack.c.bf16 %v786_v48, %v786_v48  ;;  %v1510_v60 = vsel %vm1263_vm1, %v1423_v43, 0.0  ;;  %v1313_v61 = vsel %vm1263_vm1, %v786_v48, 0.0  ;;  %v1424_v63 = vmul.f32 %v786_v48, %v786_v48 }
 0x13a   : > { %1226 = vst.msk [vmem:[%s2317_s29 + $0x6c] sm:$0xf] %vm1198_vm0, %v1952_v47  ;;  %v1511_v1 = vadd.f32 %v1510_v60, %v1509_v52  ;;  %v1314_v2 = vadd.f32 %v1313_v61, %v1312_v51  ;;  %v1514_v17 = vsel %vm1263_vm1, %v1425_v57, 0.0  ;;  %v1317_v19 = vsel %vm1263_vm1, %v2072_v38, 0.0 }
 0x13b   : > { %1224 = vst.msk [vmem:[%s2317_s29 + $0x64] sm:$0xf] %vm1198_vm0, %v1950_v56  ;;  %v1512_v8 = vsel %vm1263_vm1, %v1424_v63, 0.0  ;;  %v1516_v35 = vsel %vm1263_vm1, %v1426_v5, 0.0  ;;  %v1431_v5 = vmul.f32 %v2323_v45, %v2323_v45 }
 0x13c   : > { %v1316_v9 = vadd.f32 %v1315_v4, %v1314_v2  ;;  %v1513_v10 = vadd.f32 %v1512_v8, %v1511_v1  ;;  %v1975_v1 = vpack.c.bf16 %v2450_v58, %v2450_v58 }
 0x13d   : > { %v2075_v11 = vpop.f32.mrb[28].mxu0  ;;  %v2546_v16 = vpop.f32.mrb[28].mxu1 }
 0x13e   : > { %v1955_v20 = vpack.c.bf16 %v2075_v11, %v2075_v11  ;;  %v799_v23 = vpop.f32.mrb[29].mxu0  ;;  %v2550_v24 = vpop.f32.mrb[29].mxu1  ;;  %v1515_v26 = vadd.f32 %v1514_v17, %v1513_v10  ;;  %v1318_v29 = vadd.f32 %v1317_v19, %v1316_v9  ;;  %v1429_v52 = vmul.f32 %v2075_v11, %v2075_v11  ;;  %1249 = vst.msk [vmem:[%s2317_s29 + $0xc8] sm:$0xf] %vm1198_vm0, %v1975_v1 }
 0x13f   : > { %v1953_v27 = vpack.c.bf16 %v799_v23, %v799_v23  ;;  %v1319_v30 = vsel %vm1263_vm1, %v799_v23, 0.0  ;;  %v2076_v32 = vpop.f32.mrb[30].mxu0  ;;  %v2555_v34 = vpop.f32.mrb[30].mxu1  ;;  %v1427_v36 = vmul.f32 %v799_v23, %v799_v23  ;;  %v1323_v2 = vsel %vm1263_vm1, %v2075_v11, 0.0 }
 0x140   : > { %1229 = vst.msk [vmem:[%s2317_s29 + $0x78] sm:$0xf] %vm1198_vm0, %v1955_v20  ;;  %v1956_v38 = vpack.c.bf16 %v2076_v32, %v2076_v32  ;;  %v802_v42 = vpop.f32.mrb[31].mxu0  ;;  %v2560_v43 = vpop.f32.mrb[31].mxu1  ;;  %v1320_v47 = vadd.f32 %v1319_v30, %v1318_v29  ;;  %v1517_v48 = vadd.f32 %v1516_v35, %v1515_v26  ;;  %v1430_v3 = vmul.f32 %v2076_v32, %v2076_v32 }
 0x141   : > { %1227 = vst.msk [vmem:[%s2317_s29 + $0x70] sm:$0xf] %vm1198_vm0, %v1953_v27  ;;  %v1954_v51 = vpack.c.bf16 %v802_v42, %v802_v42  ;;  %v1518_v56 = vsel %vm1263_vm1, %v1427_v36, 0.0  ;;  %v1321_v57 = vsel %vm1263_vm1, %v802_v42, 0.0  ;;  %v1428_v60 = vmul.f32 %v802_v42, %v802_v42 }
 0x142   : > { %1230 = vst.msk [vmem:[%s2317_s29 + $0x7c] sm:$0xf] %vm1198_vm0, %v1956_v38  ;;  %v1519_v61 = vadd.f32 %v1518_v56, %v1517_v48  ;;  %v1322_v63 = vadd.f32 %v1321_v57, %v1320_v47  ;;  %v1973_v10 = vpack.c.bf16 %v2454_v0, %v2454_v0  ;;  %v1522_v14 = vsel %vm1263_vm1, %v1429_v52, 0.0 }
 0x143   : > { %1228 = vst.msk [vmem:[%s2317_s29 + $0x74] sm:$0xf] %vm1198_vm0, %v1954_v51  ;;  %v1520_v4 = vsel %vm1263_vm1, %v1428_v60, 0.0  ;;  %v1325_v17 = vsel %vm1263_vm1, %v2076_v32, 0.0  ;;  %v1327_v11 = vsel %vm1263_vm1, %v2323_v45, 0.0  ;;  %v1976_v19 = vpack.c.bf16 %v2459_v7, %v2459_v7 }
 0x144   : > { %v1324_v8 = vadd.f32 %v1323_v2, %v1322_v63  ;;  %v1521_v9 = vadd.f32 %v1520_v4, %v1519_v61  ;;  %1247 = vst.msk [vmem:[%s2317_s29 + $0xc0] sm:$0xf] %vm1198_vm0, %v1973_v10  ;;  %v1974_v26 = vpack.c.bf16 %v2464_v13, %v2464_v13  ;;  %v1524_v27 = vsel %vm1263_vm1, %v1430_v3, 0.0 }
 0x145   : > { %v1526_v29 = vsel %vm1263_vm1, %v1431_v5, 0.0  ;;  %v1432_v30 = vmul.f32 %v2331_v53, %v2331_v53  ;;  %1250 = vst.msk [vmem:[%s2317_s29 + $0xcc] sm:$0xf] %vm1198_vm0, %v1976_v19  ;;  %v1979_v45 = vpack.c.bf16 %v2482_v37, %v2482_v37  ;;  %v1433_v36 = vmul.f32 %v2319_v41, %v2319_v41 }
 0x146   : > { %v1523_v20 = vadd.f32 %v1522_v14, %v1521_v9  ;;  %v1326_v23 = vadd.f32 %v1325_v17, %v1324_v8  ;;  %1248 = vst.msk [vmem:[%s2317_s29 + $0xc4] sm:$0xf] %vm1198_vm0, %v1974_v26  ;;  %v1329_v38 = vsel %vm1263_vm1, %v2331_v53, 0.0  ;;  %v1977_v42 = vpack.c.bf16 %v2486_v44, %v2486_v44 }
 0x147   : > { %1253 = vst.msk [vmem:[%s2317_s29 + $0xd8] sm:$0xf] %vm1198_vm0, %v1979_v45  ;;  %v1331_v47 = vsel %vm1263_vm1, %v2319_v41, 0.0  ;;  %v1980_v52 = vpack.c.bf16 %v2491_v55, %v2491_v55  ;;  %v1434_v56 = vmul.f32 %v2325_v49, %v2325_v49  ;;  %v1528_v57 = vsel %vm1263_vm1, %v1432_v30, 0.0 }
 0x148   : > { %v1328_v32 = vadd.f32 %v1327_v11, %v1326_v23  ;;  %v1525_v35 = vadd.f32 %v1524_v27, %v1523_v20  ;;  %v1435_v53 = vmul.f32 %v2359_v12, %v2359_v12  ;;  %1251 = vst.msk [vmem:[%s2317_s29 + $0xd0] sm:$0xf] %vm1198_vm0, %v1977_v42  ;;  %v1978_v60 = vpack.c.bf16 %v2496_v62, %v2496_v62 }
 0x149   : > { %1254 = vst.msk [vmem:[%s2317_s29 + $0xdc] sm:$0xf] %vm1198_vm0, %v1980_v52  ;;  %v1530_v63 = vsel %vm1263_vm1, %v1433_v36, 0.0  ;;  %v1333_v1 = vsel %vm1263_vm1, %v2325_v49, 0.0  ;;  %v1335_v2 = vsel %vm1263_vm1, %v2359_v12, 0.0  ;;  %v1983_v3 = vpack.c.bf16 %v2514_v25, %v2514_v25 }
 0x14a   : > { %v1527_v48 = vadd.f32 %v1526_v29, %v1525_v35  ;;  %v1330_v51 = vadd.f32 %v1329_v38, %v1328_v32  ;;  %1252 = vst.msk [vmem:[%s2317_s29 + $0xd4] sm:$0xf] %vm1198_vm0, %v1978_v60  ;;  %v1981_v8 = vpack.c.bf16 %v2518_v31, %v2518_v31  ;;  %v1532_v9 = vsel %vm1263_vm1, %v1434_v56, 0.0 }
 0x14b   : > { %v1534_v10 = vsel %vm1263_vm1, %v1435_v53, 0.0  ;;  %v1436_v49 = vmul.f32 %v2368_v22, %v2368_v22  ;;  %1257 = vst.msk [vmem:[%s2317_s29 + $0xe8] sm:$0xf] %vm1198_vm0, %v1983_v3  ;;  %v1984_v12 = vpack.c.bf16 %v2523_v40, %v2523_v40  ;;  %v1437_v11 = vmul.f32 %v2355_v6, %v2355_v6 }
 0x14c   : > { %v1332_v41 = vadd.f32 %v1331_v47, %v1330_v51  ;;  %v1529_v61 = vadd.f32 %v1528_v57, %v1527_v48  ;;  %1255 = vst.msk [vmem:[%s2317_s29 + $0xe0] sm:$0xf] %vm1198_vm0, %v1981_v8  ;;  %v1337_v19 = vsel %vm1263_vm1, %v2368_v22, 0.0  ;;  %v1982_v20 = vpack.c.bf16 %v2528_v50, %v2528_v50 }
 0x14d   : > { %1258 = vst.msk [vmem:[%s2317_s29 + $0xec] sm:$0xf] %vm1198_vm0, %v1984_v12  ;;  %v1339_v23 = vsel %vm1263_vm1, %v2355_v6, 0.0  ;;  %v1987_v29 = vpack.c.bf16 %v2546_v16, %v2546_v16  ;;  %v1438_v30 = vmul.f32 %v2364_v18, %v2364_v18  ;;  %v1536_v45 = vsel %vm1263_vm1, %v1436_v49, 0.0 }
 0x14e   : > { %v1531_v4 = vadd.f32 %v1530_v63, %v1529_v61  ;;  %v1334_v5 = vadd.f32 %v1333_v1, %v1332_v41  ;;  %v1439_v22 = vmul.f32 %v2392_v46, %v2392_v46  ;;  %1256 = vst.msk [vmem:[%s2317_s29 + $0xe4] sm:$0xf] %vm1198_vm0, %v1982_v20  ;;  %v1985_v32 = vpack.c.bf16 %v2550_v24, %v2550_v24 }
 0x14f   : > { %1261 = vst.msk [vmem:[%s2317_s29 + $0xf8] sm:$0xf] %vm1198_vm0, %v1987_v29  ;;  %v1538_v36 = vsel %vm1263_vm1, %v1437_v11, 0.0  ;;  %v1341_v38 = vsel %vm1263_vm1, %v2364_v18, 0.0  ;;  %v1343_v42 = vsel %vm1263_vm1, %v2392_v46, 0.0  ;;  %v1988_v47 = vpack.c.bf16 %v2555_v34, %v2555_v34 }
 0x150   : > { %v1336_v14 = vadd.f32 %v1335_v2, %v1334_v5  ;;  %v1533_v17 = vadd.f32 %v1532_v9, %v1531_v4  ;;  %1259 = vst.msk [vmem:[%s2317_s29 + $0xf0] sm:$0xf] %vm1198_vm0, %v1985_v32  ;;  %v1986_v52 = vpack.c.bf16 %v2560_v43, %v2560_v43  ;;  %v1540_v56 = vsel %vm1263_vm1, %v1438_v30, 0.0 }
 0x151   : > { %v1542_v57 = vsel %vm1263_vm1, %v1439_v22, 0.0  ;;  %v1440_v18 = vmul.f32 %v2400_v59, %v2400_v59  ;;  %1262 = vst.msk [vmem:[%s2317_s29 + $0xfc] sm:$0xf] %vm1198_vm0, %v1988_v47  ;;  %v1441_v60 = vmul.f32 %v2386_v39, %v2386_v39  ;;  %v1345_v41 = vsel %vm1263_vm1, %v2400_v59, 0.0 }
 0x152   : > { %v1535_v26 = vadd.f32 %v1534_v10, %v1533_v17  ;;  %v1338_v27 = vadd.f32 %v1337_v19, %v1336_v14  ;;  %1260 = vst.msk [vmem:[%s2317_s29 + $0xf4] sm:$0xf] %vm1198_vm0, %v1986_v52  ;;  %v1347_v1 = vsel %vm1263_vm1, %v2386_v39, 0.0  ;;  %v1442_v2 = vmul.f32 %v2395_v54, %v2395_v54 }
 0x153   : > { %v1544_v3 = vsel %vm1263_vm1, %v1440_v18, 0.0  ;;  %v1443_v4 = vmul.f32 %v2422_v21, %v2422_v21  ;;  %v1546_v9 = vsel %vm1263_vm1, %v1441_v60, 0.0  ;;  %v1349_v59 = vsel %vm1263_vm1, %v2395_v54, 0.0 }
 0x154   : > { %v1340_v6 = vadd.f32 %v1339_v23, %v1338_v27  ;;  %v1537_v35 = vadd.f32 %v1536_v45, %v1535_v26  ;;  %v1351_v10 = vsel %vm1263_vm1, %v2422_v21, 0.0  ;;  %v1548_v12 = vsel %vm1263_vm1, %v1442_v2, 0.0 }
 0x155   : > { %v1550_v14 = vsel %vm1263_vm1, %v1443_v4, 0.0  ;;  %v1444_v17 = vmul.f32 %v2432_v33, %v2432_v33  ;;  %v1445_v20 = vmul.f32 %v2418_v15, %v2418_v15  ;;  %v1353_v54 = vsel %vm1263_vm1, %v2432_v33, 0.0 }
 0x156   : > { %v1539_v48 = vadd.f32 %v1538_v36, %v1537_v35  ;;  %v1342_v51 = vadd.f32 %v1341_v38, %v1340_v6  ;;  %v1355_v21 = vsel %vm1263_vm1, %v2418_v15, 0.0  ;;  %v1446_v27 = vmul.f32 %v2427_v28, %v2427_v28 }
 0x157   : > { %v1552_v29 = vsel %vm1263_vm1, %v1444_v17, 0.0  ;;  %v1447_v30 = vmul.f32 %v2454_v0, %v2454_v0  ;;  %v1554_v32 = vsel %vm1263_vm1, %v1445_v20, 0.0  ;;  %v1357_v33 = vsel %vm1263_vm1, %v2427_v28, 0.0 }
 0x158   : > { %v1344_v46 = vadd.f32 %v1343_v42, %v1342_v51  ;;  %v1541_v53 = vadd.f32 %v1540_v56, %v1539_v48  ;;  %v1359_v6 = vsel %vm1263_vm1, %v2454_v0, 0.0  ;;  %v1556_v36 = vsel %vm1263_vm1, %v1446_v27, 0.0 }
 0x159   : > { %v1558_v38 = vsel %vm1263_vm1, %v1447_v30, 0.0  ;;  %v1448_v42 = vmul.f32 %v2464_v13, %v2464_v13  ;;  %v1449_v51 = vmul.f32 %v2450_v58, %v2450_v58  ;;  %v1361_v28 = vsel %vm1263_vm1, %v2464_v13, 0.0 }
 0x15a   : > { %v1543_v61 = vadd.f32 %v1542_v57, %v1541_v53  ;;  %v1346_v63 = vadd.f32 %v1345_v41, %v1344_v46  ;;  %v1363_v0 = vsel %vm1263_vm1, %v2450_v58, 0.0  ;;  %v1450_v57 = vmul.f32 %v2459_v7, %v2459_v7 }
 0x15b   : > { %v1560_v18 = vsel %vm1263_vm1, %v1448_v42, 0.0  ;;  %v1451_v46 = vmul.f32 %v2486_v44, %v2486_v44  ;;  %v1562_v41 = vsel %vm1263_vm1, %v1449_v51, 0.0  ;;  %v1365_v13 = vsel %vm1263_vm1, %v2459_v7, 0.0 }
 0x15c   : > { %v1348_v5 = vadd.f32 %v1347_v1, %v1346_v63  ;;  %v1545_v8 = vadd.f32 %v1544_v3, %v1543_v61  ;;  %v1367_v61 = vsel %vm1263_vm1, %v2486_v44, 0.0  ;;  %v1564_v1 = vsel %vm1263_vm1, %v1450_v57, 0.0 }
 0x15d   : > { %v1566_v2 = vsel %vm1263_vm1, %v1451_v46, 0.0  ;;  %v1452_v3 = vmul.f32 %v2496_v62, %v2496_v62  ;;  %v1369_v7 = vsel %vm1263_vm1, %v2496_v62, 0.0  ;;  %v1371_v44 = vsel %vm1263_vm1, %v2482_v37, 0.0 }
 0x15e   : > { %v1547_v49 = vadd.f32 %v1546_v9, %v1545_v8  ;;  %v1350_v39 = vadd.f32 %v1349_v59, %v1348_v5  ;;  %v1453_v8 = vmul.f32 %v2482_v37, %v2482_v37  ;;  %v1373_v62 = vsel %vm1263_vm1, %v2491_v55, 0.0 }
 0x15f   : > { %v1457_v27 = vmul.f32 %v2514_v25, %v2514_v25 }
 0x160   : > { %v1352_v11 = vadd.f32 %v1351_v10, %v1350_v39  ;;  %v1549_v19 = vadd.f32 %v1548_v12, %v1547_v49  ;;  %v1454_v10 = vmul.f32 %v2491_v55, %v2491_v55  ;;  %v1568_v49 = vsel %vm1263_vm1, %v1452_v3, 0.0 }
 0x161   : > { %v1455_v39 = vmul.f32 %v2518_v31, %v2518_v31  ;;  %v1570_v17 = vsel %vm1263_vm1, %v1453_v8, 0.0  ;;  %v1377_v55 = vsel %vm1263_vm1, %v2528_v50, 0.0 }
 0x162   : > { %v1551_v23 = vadd.f32 %v1550_v14, %v1549_v19  ;;  %v1354_v26 = vadd.f32 %v1353_v54, %v1352_v11  ;;  %v1375_v11 = vsel %vm1263_vm1, %v2518_v31, 0.0  ;;  %v1572_v20 = vsel %vm1263_vm1, %v1454_v10, 0.0 }
 0x163   : > { %v1574_v54 = vsel %vm1263_vm1, %v1455_v39, 0.0  ;;  %v1379_v31 = vsel %vm1263_vm1, %v2514_v25, 0.0 }
 0x164   : > { %v1356_v45 = vadd.f32 %v1355_v21, %v1354_v26  ;;  %v1553_v22 = vadd.f32 %v1552_v29, %v1551_v23  ;;  %v1456_v23 = vmul.f32 %v2528_v50, %v2528_v50  ;;  %v1381_v50 = vsel %vm1263_vm1, %v2523_v40, 0.0 }
 0x166   : > { %v1555_v35 = vadd.f32 %v1554_v32, %v1553_v22  ;;  %v1358_v15 = vadd.f32 %v1357_v33, %v1356_v45  ;;  %v1458_v45 = vmul.f32 %v2523_v40, %v2523_v40  ;;  %v1576_v22 = vsel %vm1263_vm1, %v1456_v23, 0.0 }
 0x167   : > { %v1459_v32 = vmul.f32 %v2550_v24, %v2550_v24  ;;  %v1385_v40 = vsel %vm1263_vm1, %v2560_v43, 0.0 }
 0x168   : > { %v1360_v47 = vadd.f32 %v1359_v6, %v1358_v15  ;;  %v1557_v48 = vadd.f32 %v1556_v36, %v1555_v35  ;;  %v1578_v35 = vsel %vm1263_vm1, %v1457_v27, 0.0  ;;  %v1383_v15 = vsel %vm1263_vm1, %v2550_v24, 0.0 }
 0x169   : > { %v1582_v42 = vsel %vm1263_vm1, %v1459_v32, 0.0  ;;  %v1387_v24 = vsel %vm1263_vm1, %v2546_v16, 0.0 }
 0x16a   : > { %v1559_v52 = vadd.f32 %v1558_v38, %v1557_v48  ;;  %v1362_v56 = vadd.f32 %v1361_v28, %v1360_v47  ;;  %v1580_v38 = vsel %vm1263_vm1, %v1458_v45, 0.0  ;;  %v1460_v47 = vmul.f32 %v2560_v43, %v2560_v43 }
 0x16b   : > { %v1461_v28 = vmul.f32 %v2546_v16, %v2546_v16 }
 0x16c   : > { %v1364_v53 = vadd.f32 %v1363_v0, %v1362_v56  ;;  %v1561_v60 = vadd.f32 %v1560_v18, %v1559_v52  ;;  %v1462_v0 = vmul.f32 %v2555_v34, %v2555_v34  ;;  %v1584_v57 = vsel %vm1263_vm1, %v1460_v47, 0.0 }
 0x16e   : > { %v1563_v63 = vadd.f32 %v1562_v41, %v1561_v60  ;;  %v1366_v58 = vadd.f32 %v1365_v13, %v1364_v53  ;;  %v1586_v53 = vsel %vm1263_vm1, %v1461_v28, 0.0  ;;  %v1389_v60 = vsel %vm1263_vm1, %v2555_v34, 0.0 }
 0x16f   : > { %v1588_v13 = vsel %vm1263_vm1, %v1462_v0, 0.0 }
 0x170   : > { %v1368_v4 = vadd.f32 %v1367_v61, %v1366_v58  ;;  %v1565_v5 = vadd.f32 %v1564_v1, %v1563_v63 }
 0x172   : > { %v1567_v9 = vadd.f32 %v1566_v2, %v1565_v5  ;;  %v1370_v59 = vadd.f32 %v1369_v7, %v1368_v4 }
 0x174   : > { %v1372_v12 = vadd.f32 %v1371_v44, %v1370_v59  ;;  %v1569_v14 = vadd.f32 %v1568_v49, %v1567_v9 }
 0x176   : > { %v1571_v19 = vadd.f32 %v1570_v17, %v1569_v14  ;;  %v1374_v37 = vadd.f32 %v1373_v62, %v1372_v12 }
 0x178   : > { %v1376_v26 = vadd.f32 %v1375_v11, %v1374_v37  ;;  %v1573_v21 = vadd.f32 %v1572_v20, %v1571_v19 }
 0x17a   : > { %v1575_v29 = vadd.f32 %v1574_v54, %v1573_v21  ;;  %v1378_v30 = vadd.f32 %v1377_v55, %v1376_v26 }
 0x17c   : > { %v1380_v33 = vadd.f32 %v1379_v31, %v1378_v30  ;;  %v1577_v6 = vadd.f32 %v1576_v22, %v1575_v29 }
 0x17e   : > { %v1579_v36 = vadd.f32 %v1578_v35, %v1577_v6  ;;  %v1382_v25 = vadd.f32 %v1381_v50, %v1380_v33 }
 0x180   : > { %v1384_v48 = vadd.f32 %v1383_v15, %v1382_v25  ;;  %v1581_v51 = vadd.f32 %v1580_v38, %v1579_v36 }
 0x182   : > { %v1583_v52 = vadd.f32 %v1582_v42, %v1581_v51  ;;  %v1386_v56 = vadd.f32 %v1385_v40, %v1384_v48 }
 0x184   : > { %v1388_v18 = vadd.f32 %v1387_v24, %v1386_v56  ;;  %v1585_v46 = vadd.f32 %v1584_v57, %v1583_v52 }
 0x186   : > { %v1390_v41 = vadd.f32 %v1389_v60, %v1388_v18  ;;  %v1587_v43 = vadd.f32 %v1586_v53, %v1585_v46 }
 0x188   : > { %v1391_v61 = vrot.slane %v1390_v41, 4  ;;  %v1589_v16 = vadd.f32 %v1588_v13, %v1587_v43 }
 0x18a   : > { %v1392_v63 = vadd.f32 %v1391_v61, %v1390_v41  ;;  %v1590_v58 = vrot.slane %v1589_v16, 4 }
 0x18c   : > { %v1393_v1 = vrot.slane %v1392_v63, 2  ;;  %v1591_v2 = vadd.f32 %v1590_v58, %v1589_v16 }
 0x18e   : > { %v1394_v3 = vadd.f32 %v1393_v1, %v1392_v63  ;;  %v1592_v4 = vrot.slane %v1591_v2, 2 }
 0x190   : > { %v1395_v5 = vrot.slane %v1394_v3, 1  ;;  %v1593_v8 = vadd.f32 %v1592_v4, %v1591_v2 }
 0x192   : > { %v1396_v34 = vadd.f32 %v1395_v5, %v1394_v3  ;;  %v1594_v7 = vrot.slane %v1593_v8, 1 }
 0x194   : > { %1398 = vst.msk [vmem:[%s322_s6] sm:$0x1] %vm1397_vm2, %v1396_v34  ;;  %v1595_v9 = vadd.f32 %v1594_v7, %v1593_v8 }
 0x196   : > { %1596 = vst.msk [vmem:[%s331_s9] sm:$0x1] %vm1397_vm2, %v1595_v9 }
 0x197 PF: > { %s15_s17 = sadd.s32 1, %s2211_s17   ;;  %s2821_s15 = smov %s2207_s16 }
 0x198   : > { %p12_p5 = scmp.ge.s32.totalorder %s15_s17, 6   ;;  %s2822_s16 = smov %s2824_s18 }
 0x19a   :  { %14 = sbr.rel (!%p12_p5) target bundleno = 2 (0x2), region = 85 }

// kernel: tile.58
= control target key start
LH: loop header
LB: loop body
LE: loop exit
PB: predicated region body
PF: predicated region fallthrough
CT: control target
= control target key end

     0   :  { %s22_s0 = inlined_call_operand.vmem [shape: f32[16], index: 0, kind: input, shape index: {}]   ;;  %s23_s1 = inlined_call_operand.vmem [shape: f32[8,16], index: 1, kind: output, shape index: {}]  }
   0x1   :  { %v4_v0 = vld [vmem:[%s22_s0] ss:$0 sm:$0xff] }
   0x2   :  { %5 = vst [vmem:[%s23_s1] sm:$0xff] %v4_v0 }

// kernel: tile.59
= control target key start
LH: loop header
LB: loop body
LE: loop exit
PB: predicated region body
PF: predicated region fallthrough
CT: control target
= control target key end

     0   :  { %s67_s10 = smov 112   ;;  %s68_s11 = smov 80   ;;  %vm3_vm0 = vcmask 130048   ;;  %vm9_vm1 = vcmask 1048448   ;;  %vm15_vm2 = vcmask 917248   ;;  %vm21_vm3 = vcmask 786048   ;;  %s111_s0 = inlined_call_operand.vmem [shape: f32[8,16], index: 0, kind: input, shape index: {}]   ;;  %s112_s1 = inlined_call_operand.vmem [shape: f32[1,128], index: 1, kind: output, shape index: {}]  }
   0x1   :  { %v53_v0 = vld [vmem:[%s111_s0 + $0x7] sm:$0x1]   ;;  %v55_v1 = vld [vmem:[%s111_s0 + $0x5] sm:$0x1]   ;;  %v54_v2 = vld [vmem:[%s111_s0 + $0x6] sm:$0x1]  }
   0x2   :  { %7 = vrot.lane.b32.xlu0 %v53_v0, %s67_s10  ;;  %19 = vrot.lane.b32.xlu1 %v55_v1, %s68_s11  ;;  %v56_v3 = vld [vmem:[%s111_s0 + $0x4] sm:$0x1]   ;;  %v2_v4 = vld [vmem:[%s111_s0] sm:$0x1]   ;;  %s69_s18 = smov 96   ;;  %s70_s19 = smov 64  }
   0x3   :  { %4 = vst.msk [vmem:[#allocation0] sm:$0x1] %vm3_vm0, %v2_v4   ;;  %v57_v5 = vld [vmem:[%s111_s0 + $0x3] sm:$0x1]   ;;  %v58_v6 = vld [vmem:[%s111_s0 + $0x2] sm:$0x1]  }
   0x4   :  { %s71_s24 = smov 48   ;;  %s72_s25 = smov 32   ;;  %v59_v7 = vld [vmem:[%s111_s0 + $0x1] sm:$0x1]   ;;  %vm27_vm4 = vcmask 654848   ;;  %vm33_vm5 = vcmask 523648  }
   0x5   :  { %s73_s0 = smov 16   ;;  %vm39_vm6 = vcmask 392448   ;;  %vm45_vm7 = vcmask 261248  }
   0x6   :  { %13 = vrot.lane.b32.xlu0 %v54_v2, %s69_s18  ;;  %25 = vrot.lane.b32.xlu1 %v56_v3, %s70_s19 }
   0xa   :  { %31 = vrot.lane.b32.xlu0 %v57_v5, %s71_s24  ;;  %37 = vrot.lane.b32.xlu1 %v58_v6, %s72_s25 }
   0xe   :  { %43 = vrot.lane.b32.xlu0 %v59_v7, %s73_s0 }
  0x74   :  { %v8_v8 = vpop.permute.xlu0 %7   ;;  %v20_v9 = vpop.permute.xlu1 %19  }
  0x75   :  { %10 = vst.msk [vmem:[#allocation0] sm:$0x1] %vm9_vm1, %v8_v8  }
  0x78   :  { %v14_v10 = vpop.permute.xlu0 %13   ;;  %v26_v11 = vpop.permute.xlu1 %25  }
  0x79   :  { %16 = vst.msk [vmem:[#allocation0] sm:$0x1] %vm15_vm2, %v14_v10  }
  0x7a   :  { %22 = vst.msk [vmem:[#allocation0] sm:$0x1] %vm21_vm3, %v20_v9  }
  0x7b   :  { %28 = vst.msk [vmem:[#allocation0] sm:$0x1] %vm27_vm4, %v26_v11  }
  0x7c   :  { %v32_v12 = vpop.permute.xlu0 %31   ;;  %v38_v13 = vpop.permute.xlu1 %37  }
  0x7d   :  { %34 = vst.msk [vmem:[#allocation0] sm:$0x1] %vm33_vm5, %v32_v12  }
  0x7e   :  { %40 = vst.msk [vmem:[#allocation0] sm:$0x1] %vm39_vm6, %v38_v13  }
  0x80   :  { %v44_v14 = vpop.permute.xlu0 %43  }
  0x81   :  { %46 = vst.msk [vmem:[#allocation0] sm:$0x1] %vm45_vm7, %v44_v14  }
  0x88   :  { %v50_v15 = vld [vmem:[#allocation0] sm:$0x1] }
  0x89   :  { %52 = vst [vmem:[%s112_s1] sm:$0x1] %v50_v15 }

// kernel: _lambda_.14
= control target key start
LH: loop header
LB: loop body
LE: loop exit
PB: predicated region body
PF: predicated region fallthrough
CT: control target
= control target key end

     0   :  { %s782_s0 = inlined_call_operand.vmem [shape: bf16[256,128], index: 0, kind: input, shape index: {}]   ;;  %s783_s1 = inlined_call_operand.vmem [shape: f32[1,128], index: 1, kind: input, shape index: {}]   ;;  %s784_s2 = inlined_call_operand.vmem [shape: f32[1,128], index: 2, kind: input, shape index: {}]   ;;  %s785_s3 = inlined_call_operand.vmem [shape: bf16[256,128], index: 3, kind: output, shape index: {}]  }
   0x1   :  { %v419_v0 = vld [vmem:[%s782_s0] sm:$0xff]   ;;  %v562_v4 = vld [vmem:[%s782_s0 + $0x8] sm:$0xff]   ;;  %v563_v5 = vld [vmem:[%s782_s0 + $0x10] sm:$0xff]  }
   0x2   :  { %v618_v1 = vld [vmem:[%s783_s1] ss:$0 sm:$0xff]  ;;  %v420_v2 = vunpack.c.l.bf16 %v419_v0  ;;  %v421_v3 = vunpack.c.h.bf16 %v419_v0  ;;  %v564_v6 = vld [vmem:[%s782_s0 + $0x18] sm:$0xff]   ;;  %v424_v8 = vunpack.c.l.bf16 %v562_v4  ;;  %v425_v9 = vunpack.c.h.bf16 %v562_v4  ;;  %v566_v33 = vld [vmem:[%s782_s0 + $0x28] sm:$0xff]  }
   0x3   :  { %v632_v7 = vld [vmem:[%s784_s2] ss:$0 sm:$0xff]  ;;  %v428_v10 = vunpack.c.l.bf16 %v563_v5  ;;  %v429_v11 = vunpack.c.h.bf16 %v563_v5  ;;  %v432_v14 = vunpack.c.l.bf16 %v564_v6  ;;  %v433_v15 = vunpack.c.h.bf16 %v564_v6  ;;  %v567_v38 = vld [vmem:[%s782_s0 + $0x30] sm:$0xff]   ;;  %v568_v43 = vld [vmem:[%s782_s0 + $0x38] sm:$0xff]  }
   0x4   :  { %v85_v12 = vmul.f32 %v420_v2, %v618_v1  ;;  %v86_v13 = vmul.f32 %v421_v3, %v618_v1  ;;  %v87_v16 = vmul.f32 %v424_v8, %v618_v1  ;;  %v88_v17 = vmul.f32 %v425_v9, %v618_v1  ;;  %v565_v28 = vld [vmem:[%s782_s0 + $0x20] sm:$0xff]  }
   0x5   :  { %v89_v18 = vmul.f32 %v428_v10, %v618_v1  ;;  %v90_v19 = vmul.f32 %v429_v11, %v618_v1  ;;  %v91_v22 = vmul.f32 %v432_v14, %v618_v1  ;;  %v92_v23 = vmul.f32 %v433_v15, %v618_v1  ;;  %v569_v0 = vld [vmem:[%s782_s0 + $0x40] sm:$0xff]   ;;  %v570_v11 = vld [vmem:[%s782_s0 + $0x48] sm:$0xff]  }
   0x6   :  { %v124_v20 = vadd.f32 %v632_v7, %v85_v12  ;;  %v125_v21 = vadd.f32 %v632_v7, %v86_v13  ;;  %v126_v24 = vadd.f32 %v632_v7, %v87_v16  ;;  %v127_v25 = vadd.f32 %v632_v7, %v88_v17  ;;  %v571_v16 = vld [vmem:[%s782_s0 + $0x50] sm:$0xff]  }
   0x7   :  { %v128_v26 = vadd.f32 %v632_v7, %v89_v18  ;;  %v129_v27 = vadd.f32 %v632_v7, %v90_v19  ;;  %v130_v31 = vadd.f32 %v632_v7, %v91_v22  ;;  %v131_v32 = vadd.f32 %v632_v7, %v92_v23 }
   0x8   :  { %v156_v29 = vmax.f32 %v124_v20, 0.0  ;;  %v157_v30 = vmax.f32 %v125_v21, 0.0  ;;  %v158_v34 = vmax.f32 %v126_v24, 0.0  ;;  %v159_v35 = vmax.f32 %v127_v25, 0.0  ;;  %v572_v25 = vld [vmem:[%s782_s0 + $0x58] sm:$0xff]  }
   0x9   :  { %v160_v36 = vmax.f32 %v128_v26, 0.0  ;;  %v161_v37 = vmax.f32 %v129_v27, 0.0  ;;  %v162_v40 = vmax.f32 %v130_v31, 0.0  ;;  %v163_v41 = vmax.f32 %v131_v32, 0.0 }
   0xa   :  { %v485_v39 = vpack.c.bf16 %v157_v30, %v156_v29  ;;  %v436_v42 = vunpack.c.l.bf16 %v565_v28  ;;  %v490_v44 = vpack.c.bf16 %v159_v35, %v158_v34  ;;  %v437_v46 = vunpack.c.h.bf16 %v565_v28 }
   0xb   :  { %v495_v45 = vpack.c.bf16 %v161_v37, %v160_v36  ;;  %v440_v47 = vunpack.c.l.bf16 %v566_v33  ;;  %v500_v48 = vpack.c.bf16 %v163_v41, %v162_v40  ;;  %v441_v50 = vunpack.c.h.bf16 %v566_v33 }
   0xc   :  { %486 = vst [vmem:[%s785_s3] sm:$0xff] %v485_v39   ;;  %v93_v49 = vmul.f32 %v436_v42, %v618_v1  ;;  %v444_v51 = vunpack.c.l.bf16 %v567_v38  ;;  %577 = vst [vmem:[%s785_s3 + $0x8] sm:$0xff] %v490_v44   ;;  %v94_v52 = vmul.f32 %v437_v46, %v618_v1  ;;  %v445_v54 = vunpack.c.h.bf16 %v567_v38  ;;  %v573_v38 = vld [vmem:[%s782_s0 + $0x60] sm:$0xff]  }
   0xd   :  { %578 = vst [vmem:[%s785_s3 + $0x10] sm:$0xff] %v495_v45   ;;  %v95_v53 = vmul.f32 %v440_v47, %v618_v1  ;;  %v448_v55 = vunpack.c.l.bf16 %v568_v43  ;;  %579 = vst [vmem:[%s785_s3 + $0x18] sm:$0xff] %v500_v48   ;;  %v96_v57 = vmul.f32 %v441_v50, %v618_v1  ;;  %v449_v59 = vunpack.c.h.bf16 %v568_v43 }
   0xe   :  { %v132_v56 = vadd.f32 %v632_v7, %v93_v49  ;;  %v97_v58 = vmul.f32 %v444_v51, %v618_v1  ;;  %v133_v60 = vadd.f32 %v632_v7, %v94_v52  ;;  %v98_v62 = vmul.f32 %v445_v54, %v618_v1  ;;  %v574_v51 = vld [vmem:[%s782_s0 + $0x68] sm:$0xff]  }
   0xf   :  { %v134_v61 = vadd.f32 %v632_v7, %v95_v53  ;;  %v99_v63 = vmul.f32 %v448_v55, %v618_v1  ;;  %v135_v3 = vadd.f32 %v632_v7, %v96_v57  ;;  %v100_v5 = vmul.f32 %v449_v59, %v618_v1 }
  0x10   :  { %v164_v2 = vmax.f32 %v132_v56, 0.0  ;;  %v136_v4 = vadd.f32 %v632_v7, %v97_v58  ;;  %v165_v6 = vmax.f32 %v133_v60, 0.0  ;;  %v137_v9 = vadd.f32 %v632_v7, %v98_v62  ;;  %v575_v60 = vld [vmem:[%s782_s0 + $0x70] sm:$0xff]  }
  0x11   :  { %v166_v8 = vmax.f32 %v134_v61, 0.0  ;;  %v138_v10 = vadd.f32 %v632_v7, %v99_v63  ;;  %v167_v12 = vmax.f32 %v135_v3, 0.0  ;;  %v139_v14 = vadd.f32 %v632_v7, %v100_v5 }
  0x12   :  { %v168_v13 = vmax.f32 %v136_v4, 0.0  ;;  %v452_v15 = vunpack.c.l.bf16 %v569_v0  ;;  %v505_v17 = vpack.c.bf16 %v165_v6, %v164_v2  ;;  %v169_v18 = vmax.f32 %v137_v9, 0.0  ;;  %v576_v2 = vld [vmem:[%s782_s0 + $0x78] sm:$0xff]  }
  0x13   :  { %v170_v19 = vmax.f32 %v138_v10, 0.0  ;;  %v453_v20 = vunpack.c.h.bf16 %v569_v0  ;;  %v510_v21 = vpack.c.bf16 %v167_v12, %v166_v8  ;;  %v171_v22 = vmax.f32 %v139_v14, 0.0 }
  0x14   :  { %v101_v23 = vmul.f32 %v452_v15, %v618_v1  ;;  %v456_v24 = vunpack.c.l.bf16 %v570_v11  ;;  %580 = vst [vmem:[%s785_s3 + $0x20] sm:$0xff] %v505_v17   ;;  %v515_v26 = vpack.c.bf16 %v169_v18, %v168_v13  ;;  %v457_v28 = vunpack.c.h.bf16 %v570_v11 }
  0x15   :  { %v102_v27 = vmul.f32 %v453_v20, %v618_v1  ;;  %v460_v29 = vunpack.c.l.bf16 %v571_v16  ;;  %581 = vst [vmem:[%s785_s3 + $0x28] sm:$0xff] %v510_v21   ;;  %v520_v30 = vpack.c.bf16 %v171_v22, %v170_v19  ;;  %v461_v33 = vunpack.c.h.bf16 %v571_v16 }
  0x16   :  { %v140_v31 = vadd.f32 %v632_v7, %v101_v23  ;;  %v103_v32 = vmul.f32 %v456_v24, %v618_v1  ;;  %582 = vst [vmem:[%s785_s3 + $0x30] sm:$0xff] %v515_v26   ;;  %v104_v35 = vmul.f32 %v457_v28, %v618_v1  ;;  %v464_v37 = vunpack.c.l.bf16 %v572_v25 }
  0x17   :  { %v141_v34 = vadd.f32 %v632_v7, %v102_v27  ;;  %v105_v36 = vmul.f32 %v460_v29, %v618_v1  ;;  %583 = vst [vmem:[%s785_s3 + $0x38] sm:$0xff] %v520_v30   ;;  %v106_v41 = vmul.f32 %v461_v33, %v618_v1  ;;  %v465_v42 = vunpack.c.h.bf16 %v572_v25 }
  0x18   :  { %v172_v39 = vmax.f32 %v140_v31, 0.0  ;;  %v142_v40 = vadd.f32 %v632_v7, %v103_v32  ;;  %v143_v44 = vadd.f32 %v632_v7, %v104_v35  ;;  %v107_v46 = vmul.f32 %v464_v37, %v618_v1 }
  0x19   :  { %v173_v43 = vmax.f32 %v141_v34, 0.0  ;;  %v144_v45 = vadd.f32 %v632_v7, %v105_v36  ;;  %v145_v48 = vadd.f32 %v632_v7, %v106_v41  ;;  %v108_v49 = vmul.f32 %v465_v42, %v618_v1 }
  0x1a   :  { %v174_v47 = vmax.f32 %v142_v40, 0.0  ;;  %v468_v50 = vunpack.c.l.bf16 %v573_v38  ;;  %v175_v53 = vmax.f32 %v143_v44, 0.0  ;;  %v146_v55 = vadd.f32 %v632_v7, %v107_v46 }
  0x1b   :  { %v525_v52 = vpack.c.bf16 %v173_v43, %v172_v39  ;;  %v176_v54 = vmax.f32 %v144_v45, 0.0  ;;  %v177_v56 = vmax.f32 %v145_v48, 0.0  ;;  %v147_v57 = vadd.f32 %v632_v7, %v108_v49 }
  0x1c   :  { %v469_v58 = vunpack.c.h.bf16 %v573_v38  ;;  %v109_v59 = vmul.f32 %v468_v50, %v618_v1  ;;  %v530_v61 = vpack.c.bf16 %v175_v53, %v174_v47  ;;  %v178_v62 = vmax.f32 %v146_v55, 0.0 }
  0x1d   :  { %584 = vst [vmem:[%s785_s3 + $0x40] sm:$0xff] %v525_v52   ;;  %v472_v63 = vunpack.c.l.bf16 %v574_v51  ;;  %v473_v0 = vunpack.c.h.bf16 %v574_v51  ;;  %v535_v3 = vpack.c.bf16 %v177_v56, %v176_v54  ;;  %v179_v4 = vmax.f32 %v147_v57, 0.0 }
  0x1e   :  { %v110_v5 = vmul.f32 %v469_v58, %v618_v1  ;;  %v148_v6 = vadd.f32 %v632_v7, %v109_v59  ;;  %585 = vst [vmem:[%s785_s3 + $0x48] sm:$0xff] %v530_v61   ;;  %v476_v10 = vunpack.c.l.bf16 %v575_v60  ;;  %v477_v11 = vunpack.c.h.bf16 %v575_v60 }
  0x1f   :  { %v111_v8 = vmul.f32 %v472_v63, %v618_v1  ;;  %v112_v9 = vmul.f32 %v473_v0, %v618_v1  ;;  %586 = vst [vmem:[%s785_s3 + $0x50] sm:$0xff] %v535_v3   ;;  %v540_v12 = vpack.c.bf16 %v179_v4, %v178_v62  ;;  %v480_v15 = vunpack.c.l.bf16 %v576_v2 }
  0x20   :  { %v149_v13 = vadd.f32 %v632_v7, %v110_v5  ;;  %v180_v14 = vmax.f32 %v148_v6, 0.0  ;;  %v113_v18 = vmul.f32 %v476_v10, %v618_v1  ;;  %v114_v19 = vmul.f32 %v477_v11, %v618_v1 }
  0x21   :  { %v150_v16 = vadd.f32 %v632_v7, %v111_v8  ;;  %v151_v17 = vadd.f32 %v632_v7, %v112_v9  ;;  %587 = vst [vmem:[%s785_s3 + $0x58] sm:$0xff] %v540_v12   ;;  %v481_v21 = vunpack.c.h.bf16 %v576_v2  ;;  %v115_v22 = vmul.f32 %v480_v15, %v618_v1 }
  0x22   :  { %v181_v20 = vmax.f32 %v149_v13, 0.0  ;;  %v152_v25 = vadd.f32 %v632_v7, %v113_v18  ;;  %v153_v26 = vadd.f32 %v632_v7, %v114_v19 }
  0x23   :  { %v182_v23 = vmax.f32 %v150_v16, 0.0  ;;  %v183_v24 = vmax.f32 %v151_v17, 0.0  ;;  %v116_v28 = vmul.f32 %v481_v21, %v618_v1  ;;  %v154_v29 = vadd.f32 %v632_v7, %v115_v22 }
  0x24   :  { %v545_v27 = vpack.c.bf16 %v181_v20, %v180_v14  ;;  %v184_v31 = vmax.f32 %v152_v25, 0.0  ;;  %v185_v32 = vmax.f32 %v153_v26, 0.0 }
  0x25   :  { %v550_v30 = vpack.c.bf16 %v183_v24, %v182_v23  ;;  %v155_v33 = vadd.f32 %v632_v7, %v116_v28  ;;  %v186_v34 = vmax.f32 %v154_v29, 0.0 }
  0x26   :  { %588 = vst [vmem:[%s785_s3 + $0x60] sm:$0xff] %v545_v27   ;;  %v555_v35 = vpack.c.bf16 %v185_v32, %v184_v31 }
  0x27   :  { %589 = vst [vmem:[%s785_s3 + $0x68] sm:$0xff] %v550_v30   ;;  %v187_v36 = vmax.f32 %v155_v33, 0.0 }
  0x28   :  { %590 = vst [vmem:[%s785_s3 + $0x70] sm:$0xff] %v555_v35  }
  0x29   :  { %v560_v1 = vpack.c.bf16 %v187_v36, %v186_v34 }
  0x2b   :  { %591 = vst [vmem:[%s785_s3 + $0x78] sm:$0xff] %v560_v1  }

// kernel: _lambda_.15
= control target key start
LH: loop header
LB: loop body
LE: loop exit
PB: predicated region body
PF: predicated region fallthrough
CT: control target
= control target key end

     0   :  { %s1295_s12 = smov 0   ;;  %s1297_s13 = smov 0   ;;  %s1460_s0 = inlined_call_operand.vmem [shape: bf16[4,3,64], index: 0, kind: input, shape index: {}]   ;;  %s1461_s1 = inlined_call_operand.vmem [shape: bf16[4,64,2048], index: 1, kind: input, shape index: {}]   ;;  %s1462_s2 = inlined_call_operand.vmem [shape: f32[3,1], index: 2, kind: input, shape index: {}]   ;;  %s1463_s3 = inlined_call_operand.vmem [shape: f32[4,3,2048], index: 3, kind: output, shape index: {}]  }
   0x1   :  { %s1299_s14 = smov 0  }
   0x2 LB: > { %s25_s15 = sadd.s32 1, %s1268_s13  ;;  %p1110_p0 = scmp.ge.s32.totalorder %s1272_s14, 1  ;;  %s1272_s14 = sphi %s1299_s14, %s13_s14   ;;  %s1268_s13 = sphi %s1297_s13, %s1465_s13   ;;  %s1264_s12 = sphi %s1295_s12, %s1464_s12  }
   0x3   : > { %p27_p1 = scmp.ge.s32.totalorder %s25_s15, 4  ;;  %p167_p2 = scmp.lt.s32.totalorder %s1272_s14, 5 }
   0x5   : > { %s1467_s15 = smov (%p27_p1, %s25_s15), 0  ;;  %p168_p3 = pnand %p1110_p0, %p167_p2 }
   0x6   : > { %p203_p4 = scmp.lt.s32.totalorder (!%p168_p3), %s1264_s12, 3  ;;  %v293_v0 = vld [vmem:[%s1462_s2] sm:$0x7] (!%p168_p3)  ;;  %v1274_v1 = vmov (!%p168_p3), 0   ;;  %vm619_vm0 = vcmask (!%p168_p3), 523264  }
   0x7   : > { %171 = sbr.rel (%p168_p3) target bundleno = 316 (0x13c), region = 32  ;;  %655 = vmatprep.mubr.bf16.mxu0 (!%p168_p3), %v1274_v1  ;;  %696 = vmatprep.mubr.bf16.mxu1 (!%p168_p3), %v1274_v1 }
   0x8   : > { %1217 = vset.pattern.permute.xlu0 (!%p168_p3), %v1274_v1 }
   0x9   : > { %296 = vperm.xlu0 (!%p168_p3), %1217, %v293_v0  }
   0xe   : > { %s1469_s12 = smov (!%p203_p4, %s1264_s12), 3 }
   0xf   : > { %s1190_s18 = sshll.u32 %s1469_s12, 9  ;;  %s1111_s22 = sshll.u32 %s1469_s12, 1 }
  0x10   : > { %s1325_s21 = scalar_lea.vmem %s1461_s1, %s1190_s18  ;;  %s206_s25 = scalar_lea.vmem %s1460_s0, %s1111_s22 }
  0x11   : > { %v229_v2 = vld [vmem:[%s1325_s21] sm:$0xff]  ;;  %v230_v4 = vld [vmem:[%s1325_s21 + $0x8] sm:$0xff]  ;;  %v231_v32 = vld [vmem:[%s1325_s21 + $0x10] sm:$0xff]  ;;  %s1191_s26 = sshll.u32 %s1469_s12, 6 }
  0x12   : > { %v237_v3 = vld [vmem:[%s1325_s21 + $0x40] sm:$0xff]  ;;  %v238_v6 = vld [vmem:[%s1325_s21 + $0x48] sm:$0xff]  ;;  %v239_v33 = vld [vmem:[%s1325_s21 + $0x50] sm:$0xff]  ;;  %s1429_s29 = scalar_lea.vmem %s1463_s3, %s1191_s26 }
  0x13   : > { %v1117_v5 = vcombine.high %v229_v2, %v237_v3  ;;  %v1116_v7 = vcombine.low %v229_v2, %v237_v3  ;;  %v245_v8 = vld [vmem:[%s1325_s21 + $0x80] sm:$0xff]  ;;  %v1119_v10 = vcombine.high %v230_v4, %v238_v6  ;;  %v1118_v11 = vcombine.low %v230_v4, %v238_v6  ;;  %v246_v13 = vld [vmem:[%s1325_s21 + $0x88] sm:$0xff]  ;;  %v232_v34 = vld [vmem:[%s1325_s21 + $0x18] sm:$0xff] }
  0x14   : > { %v253_v9 = vld [vmem:[%s1325_s21 + $0xc0] sm:$0xff]  ;;  %v254_v14 = vld [vmem:[%s1325_s21 + $0xc8] sm:$0xff]  ;;  %v240_v35 = vld [vmem:[%s1325_s21 + $0x58] sm:$0xff]  ;;  %v1121_v38 = vcombine.high %v231_v32, %v239_v33  ;;  %v1120_v45 = vcombine.low %v231_v32, %v239_v33 }
  0x15   : > { %v1133_v12 = vcombine.high %v245_v8, %v253_v9  ;;  %v261_v15 = vld [vmem:[%s1325_s21 + $0x100] sm:$0xff]  ;;  %623 = vmatprep.subr.bf16.mxu0 %v1117_v5  ;;  %v1135_v16 = vcombine.high %v246_v13, %v254_v14  ;;  %v262_v18 = vld [vmem:[%s1325_s21 + $0x108] sm:$0xff]  ;;  %664 = vmatprep.subr.bf16.mxu1 %v1119_v10  ;;  %v1132_v20 = vcombine.low %v245_v8, %v253_v9  ;;  %v247_v40 = vld [vmem:[%s1325_s21 + $0x90] sm:$0xff] }
  0x16   : > { %v269_v17 = vld [vmem:[%s1325_s21 + $0x140] sm:$0xff]  ;;  %v270_v19 = vld [vmem:[%s1325_s21 + $0x148] sm:$0xff]  ;;  %624 = vmatpush1.bf16.msra.mxu0 %v1116_v7  ;;  %665 = vmatpush1.bf16.msra.mxu1 %v1118_v11  ;;  %v1134_v21 = vcombine.low %v246_v13, %v254_v14  ;;  %v1123_v39 = vcombine.high %v232_v34, %v240_v35  ;;  %v255_v41 = vld [vmem:[%s1325_s21 + $0xd0] sm:$0xff]  ;;  %v1122_v46 = vcombine.low %v232_v34, %v240_v35 }
  0x17   : > { %625 = vmatprep.subr.bf16.mxu0 %v1133_v12  ;;  %v1149_v22 = vcombine.high %v261_v15, %v269_v17  ;;  %666 = vmatprep.subr.bf16.mxu1 %v1135_v16  ;;  %v1151_v23 = vcombine.high %v262_v18, %v270_v19  ;;  %v277_v24 = vld [vmem:[%s1325_s21 + $0x180] sm:$0xff]  ;;  %v278_v26 = vld [vmem:[%s1325_s21 + $0x188] sm:$0xff]  ;;  %v1148_v28 = vcombine.low %v261_v15, %v269_v17  ;;  %v248_v42 = vld [vmem:[%s1325_s21 + $0x98] sm:$0xff] }
  0x18   : > { %v285_v25 = vld [vmem:[%s1325_s21 + $0x1c0] sm:$0xff]  ;;  %v286_v27 = vld [vmem:[%s1325_s21 + $0x1c8] sm:$0xff]  ;;  %v1150_v29 = vcombine.low %v262_v18, %v270_v19  ;;  %v256_v43 = vld [vmem:[%s1325_s21 + $0xd8] sm:$0xff]  ;;  %v1137_v47 = vcombine.high %v247_v40, %v255_v41  ;;  %v1136_v53 = vcombine.low %v247_v40, %v255_v41 }
  0x19   : > { %v1165_v30 = vcombine.high %v277_v24, %v285_v25  ;;  %v1167_v31 = vcombine.high %v278_v26, %v286_v27  ;;  %v1164_v36 = vcombine.low %v277_v24, %v285_v25  ;;  %v1166_v37 = vcombine.low %v278_v26, %v286_v27  ;;  %v1355_v44 = vld [vmem:[%s206_s25] sm:$0x3]  ;;  %v263_v49 = vld [vmem:[%s1325_s21 + $0x110] sm:$0xff]  ;;  %v264_v51 = vld [vmem:[%s1325_s21 + $0x118] sm:$0xff] }
  0x1a   : > { %626 = vmatpush1.bf16.msra.mxu0 %v1132_v20  ;;  %667 = vmatpush1.bf16.msra.mxu1 %v1134_v21  ;;  %v1139_v48 = vcombine.high %v248_v42, %v256_v43  ;;  %v271_v50 = vld [vmem:[%s1325_s21 + $0x150] sm:$0xff]  ;;  %v272_v52 = vld [vmem:[%s1325_s21 + $0x158] sm:$0xff]  ;;  %v1138_v54 = vcombine.low %v248_v42, %v256_v43  ;;  %v233_v2 = vld [vmem:[%s1325_s21 + $0x20] sm:$0xff] }
  0x1b   : > { %627 = vmatprep.subr.bf16.mxu0 %v1149_v22  ;;  %668 = vmatprep.subr.bf16.mxu1 %v1151_v23  ;;  %v1153_v55 = vcombine.high %v263_v49, %v271_v50  ;;  %v1155_v56 = vcombine.high %v264_v51, %v272_v52  ;;  %v279_v57 = vld [vmem:[%s1325_s21 + $0x190] sm:$0xff]  ;;  %v280_v59 = vld [vmem:[%s1325_s21 + $0x198] sm:$0xff]  ;;  %v1152_v61 = vcombine.low %v263_v49, %v271_v50  ;;  %v241_v3 = vld [vmem:[%s1325_s21 + $0x60] sm:$0xff] }
  0x1c   : > { %v287_v58 = vld [vmem:[%s1325_s21 + $0x1d0] sm:$0xff]  ;;  %v288_v60 = vld [vmem:[%s1325_s21 + $0x1d8] sm:$0xff]  ;;  %v1154_v62 = vcombine.low %v264_v51, %v272_v52  ;;  %v234_v4 = vld [vmem:[%s1325_s21 + $0x28] sm:$0xff]  ;;  %v1125_v8 = vcombine.high %v233_v2, %v241_v3  ;;  %v1124_v14 = vcombine.low %v233_v2, %v241_v3 }
  0x1d   : > { %v1169_v63 = vcombine.high %v279_v57, %v287_v58  ;;  %v1171_v0 = vcombine.high %v280_v59, %v288_v60  ;;  %v242_v5 = vld [vmem:[%s1325_s21 + $0x68] sm:$0xff]  ;;  %v1168_v6 = vcombine.low %v279_v57, %v287_v58  ;;  %v1170_v7 = vcombine.low %v280_v59, %v288_v60  ;;  %v249_v10 = vld [vmem:[%s1325_s21 + $0xa0] sm:$0xff]  ;;  %v235_v34 = vld [vmem:[%s1325_s21 + $0x30] sm:$0xff] }
  0x1e   : > { %628 = vmatpush1.bf16.msra.mxu0 %v1148_v28  ;;  %669 = vmatpush1.bf16.msra.mxu1 %v1150_v29  ;;  %v1127_v9 = vcombine.high %v234_v4, %v242_v5  ;;  %v257_v11 = vld [vmem:[%s1325_s21 + $0xe0] sm:$0xff]  ;;  %v250_v12 = vld [vmem:[%s1325_s21 + $0xa8] sm:$0xff]  ;;  %v1126_v15 = vcombine.low %v234_v4, %v242_v5  ;;  %v243_v35 = vld [vmem:[%s1325_s21 + $0x70] sm:$0xff] }
  0x1f   : > { %629 = vmatprep.subr.bf16.mxu0 %v1165_v30  ;;  %670 = vmatprep.subr.bf16.mxu1 %v1167_v31  ;;  %v258_v13 = vld [vmem:[%s1325_s21 + $0xe8] sm:$0xff]  ;;  %v1141_v16 = vcombine.high %v249_v10, %v257_v11  ;;  %v265_v18 = vld [vmem:[%s1325_s21 + $0x120] sm:$0xff]  ;;  %v1140_v22 = vcombine.low %v249_v10, %v257_v11  ;;  %v1129_v40 = vcombine.high %v235_v34, %v243_v35  ;;  %v251_v42 = vld [vmem:[%s1325_s21 + $0xb0] sm:$0xff] }
  0x20   : > { %v1143_v17 = vcombine.high %v250_v12, %v258_v13  ;;  %v273_v19 = vld [vmem:[%s1325_s21 + $0x160] sm:$0xff]  ;;  %v266_v20 = vld [vmem:[%s1325_s21 + $0x128] sm:$0xff]  ;;  %v1142_v23 = vcombine.low %v250_v12, %v258_v13  ;;  %v259_v43 = vld [vmem:[%s1325_s21 + $0xf0] sm:$0xff] }
  0x21   : > { %v274_v21 = vld [vmem:[%s1325_s21 + $0x168] sm:$0xff]  ;;  %v1157_v24 = vcombine.high %v265_v18, %v273_v19  ;;  %v281_v26 = vld [vmem:[%s1325_s21 + $0x1a0] sm:$0xff]  ;;  %v1156_v30 = vcombine.low %v265_v18, %v273_v19  ;;  %v1145_v49 = vcombine.high %v251_v42, %v259_v43  ;;  %v267_v51 = vld [vmem:[%s1325_s21 + $0x130] sm:$0xff] }
  0x22   : > { %630 = vmatpush1.bf16.msra.mxu0 %v1164_v36  ;;  %671 = vmatpush1.bf16.msra.mxu1 %v1166_v37  ;;  %v1159_v25 = vcombine.high %v266_v20, %v274_v21  ;;  %v289_v27 = vld [vmem:[%s1325_s21 + $0x1e0] sm:$0xff]  ;;  %v282_v28 = vld [vmem:[%s1325_s21 + $0x1a8] sm:$0xff]  ;;  %v1158_v31 = vcombine.low %v266_v20, %v274_v21  ;;  %v236_v36 = vld [vmem:[%s1325_s21 + $0x38] sm:$0xff] }
  0x23   : > { %705 = vmatprep.subr.bf16.mxu0 %v1121_v38  ;;  %746 = vmatprep.subr.bf16.mxu1 %v1123_v39  ;;  %v290_v29 = vld [vmem:[%s1325_s21 + $0x1e8] sm:$0xff]  ;;  %v1173_v32 = vcombine.high %v281_v26, %v289_v27  ;;  %v244_v37 = vld [vmem:[%s1325_s21 + $0x78] sm:$0xff]  ;;  %v1172_v38 = vcombine.low %v281_v26, %v289_v27  ;;  %v275_v52 = vld [vmem:[%s1325_s21 + $0x170] sm:$0xff] }
  0x24   : > { %v1175_v33 = vcombine.high %v282_v28, %v290_v29  ;;  %v1174_v39 = vcombine.low %v282_v28, %v290_v29  ;;  %v1131_v41 = vcombine.high %v236_v36, %v244_v37  ;;  %v1161_v57 = vcombine.high %v267_v51, %v275_v52  ;;  %v283_v59 = vld [vmem:[%s1325_s21 + $0x1b0] sm:$0xff] }
  0x25   : > { %1180 = vmatmul.mubr.msk.bf16.vlgmr.msra.gmra.mrb[0].mxu0 %vm619_vm0, %v1355_v44  ;;  %1181 = vmatmul.mubr.msk.bf16.vlgmr.msra.gmra.mrb[0].mxu1 %vm619_vm0, %v1355_v44  ;;  %v291_v60 = vld [vmem:[%s1325_s21 + $0x1f0] sm:$0xff] }
  0x26   : > { %706 = vmatpush1.bf16.msra.mxu0 %v1120_v45  ;;  %747 = vmatpush1.bf16.msra.mxu1 %v1122_v46  ;;  %v252_v45 = vld [vmem:[%s1325_s21 + $0xb8] sm:$0xff]  ;;  %v1177_v2 = vcombine.high %v283_v59, %v291_v60  ;;  %v1176_v4 = vcombine.low %v283_v59, %v291_v60 }
  0x27   : > { %707 = vmatprep.subr.bf16.mxu0 %v1137_v47  ;;  %748 = vmatprep.subr.bf16.mxu1 %v1139_v48  ;;  %v260_v46 = vld [vmem:[%s1325_s21 + $0xf8] sm:$0xff]  ;;  %v1128_v47 = vcombine.low %v235_v34, %v243_v35  ;;  %v1130_v48 = vcombine.low %v236_v36, %v244_v37 }
  0x28   : > { %737 = vmatprep.mubr.bf16.mxu0 %v1274_v1  ;;  %778 = vmatprep.mubr.bf16.mxu1 %v1274_v1  ;;  %v1147_v50 = vcombine.high %v252_v45, %v260_v46 }
  0x2a   : > { %708 = vmatpush1.bf16.msra.mxu0 %v1136_v53  ;;  %749 = vmatpush1.bf16.msra.mxu1 %v1138_v54  ;;  %v268_v53 = vld [vmem:[%s1325_s21 + $0x138] sm:$0xff] }
  0x2b   : > { %709 = vmatprep.subr.bf16.mxu0 %v1153_v55  ;;  %750 = vmatprep.subr.bf16.mxu1 %v1155_v56  ;;  %v276_v54 = vld [vmem:[%s1325_s21 + $0x178] sm:$0xff]  ;;  %v1144_v55 = vcombine.low %v251_v42, %v259_v43  ;;  %v1146_v56 = vcombine.low %v252_v45, %v260_v46 }
  0x2c   : > { %v1163_v58 = vcombine.high %v268_v53, %v276_v54 }
  0x2e   : > { %710 = vmatpush1.bf16.msra.mxu0 %v1152_v61  ;;  %751 = vmatpush1.bf16.msra.mxu1 %v1154_v62  ;;  %v284_v61 = vld [vmem:[%s1325_s21 + $0x1b8] sm:$0xff] }
  0x2f   : > { %711 = vmatprep.subr.bf16.mxu0 %v1169_v63  ;;  %752 = vmatprep.subr.bf16.mxu1 %v1171_v0  ;;  %v292_v62 = vld [vmem:[%s1325_s21 + $0x1f8] sm:$0xff]  ;;  %v1160_v63 = vcombine.low %v267_v51, %v275_v52  ;;  %v1162_v0 = vcombine.low %v268_v53, %v276_v54 }
  0x30   : > { %v1179_v3 = vcombine.high %v284_v61, %v292_v62  ;;  %v1178_v5 = vcombine.low %v284_v61, %v292_v62 }
  0x32   : > { %712 = vmatpush1.bf16.msra.mxu0 %v1168_v6  ;;  %753 = vmatpush1.bf16.msra.mxu1 %v1170_v7 }
  0x33   : > { %787 = vmatprep.subr.bf16.mxu0 %v1125_v8  ;;  %828 = vmatprep.subr.bf16.mxu1 %v1127_v9 }
  0x35   : > { %1182 = vmatmul.mubr.msk.bf16.vlgmr.msra.gmra.mrb[4].mxu0 %vm619_vm0, %v1355_v44  ;;  %1183 = vmatmul.mubr.msk.bf16.vlgmr.msra.gmra.mrb[4].mxu1 %vm619_vm0, %v1355_v44 }
  0x36   : > { %788 = vmatpush1.bf16.msra.mxu0 %v1124_v14  ;;  %829 = vmatpush1.bf16.msra.mxu1 %v1126_v15 }
  0x37   : > { %789 = vmatprep.subr.bf16.mxu0 %v1141_v16  ;;  %830 = vmatprep.subr.bf16.mxu1 %v1143_v17 }
  0x38   : > { %819 = vmatprep.mubr.bf16.mxu0 %v1274_v1  ;;  %860 = vmatprep.mubr.bf16.mxu1 %v1274_v1 }
  0x3a   : > { %790 = vmatpush1.bf16.msra.mxu0 %v1140_v22  ;;  %831 = vmatpush1.bf16.msra.mxu1 %v1142_v23 }
  0x3b   : > { %791 = vmatprep.subr.bf16.mxu0 %v1157_v24  ;;  %832 = vmatprep.subr.bf16.mxu1 %v1159_v25 }
  0x3e   : > { %792 = vmatpush1.bf16.msra.mxu0 %v1156_v30  ;;  %833 = vmatpush1.bf16.msra.mxu1 %v1158_v31 }
  0x3f   : > { %793 = vmatprep.subr.bf16.mxu0 %v1173_v32  ;;  %834 = vmatprep.subr.bf16.mxu1 %v1175_v33 }
  0x42   : > { %794 = vmatpush1.bf16.msra.mxu0 %v1172_v38  ;;  %835 = vmatpush1.bf16.msra.mxu1 %v1174_v39 }
  0x43   : > { %869 = vmatprep.subr.bf16.mxu0 %v1129_v40  ;;  %910 = vmatprep.subr.bf16.mxu1 %v1131_v41 }
  0x45   : > { %1184 = vmatmul.mubr.msk.bf16.vlgmr.msra.gmra.mrb[8].mxu0 %vm619_vm0, %v1355_v44  ;;  %1185 = vmatmul.mubr.msk.bf16.vlgmr.msra.gmra.mrb[8].mxu1 %vm619_vm0, %v1355_v44 }
  0x46   : > { %870 = vmatpush1.bf16.msra.mxu0 %v1128_v47  ;;  %911 = vmatpush1.bf16.msra.mxu1 %v1130_v48 }
  0x47   : > { %871 = vmatprep.subr.bf16.mxu0 %v1145_v49  ;;  %912 = vmatprep.subr.bf16.mxu1 %v1147_v50 }
  0x48   : > { %901 = vmatprep.mubr.bf16.mxu0 %v1274_v1  ;;  %942 = vmatprep.mubr.bf16.mxu1 %v1274_v1 }
  0x4a   : > { %872 = vmatpush1.bf16.msra.mxu0 %v1144_v55  ;;  %913 = vmatpush1.bf16.msra.mxu1 %v1146_v56 }
  0x4b   : > { %873 = vmatprep.subr.bf16.mxu0 %v1161_v57  ;;  %914 = vmatprep.subr.bf16.mxu1 %v1163_v58 }
  0x4e   : > { %874 = vmatpush1.bf16.msra.mxu0 %v1160_v63  ;;  %915 = vmatpush1.bf16.msra.mxu1 %v1162_v0 }
  0x4f   : > { %875 = vmatprep.subr.bf16.mxu0 %v1177_v2  ;;  %916 = vmatprep.subr.bf16.mxu1 %v1179_v3 }
  0x52   : > { %876 = vmatpush1.bf16.msra.mxu0 %v1176_v4  ;;  %917 = vmatpush1.bf16.msra.mxu1 %v1178_v5 }
  0x55   : > { %1186 = vmatmul.mubr.msk.bf16.vlgmr.msra.gmra.mrb[12].mxu0 %vm619_vm0, %v1355_v44  ;;  %1187 = vmatmul.mubr.msk.bf16.vlgmr.msra.gmra.mrb[12].mxu1 %vm619_vm0, %v1355_v44 }
  0x88   : > { %v1419_v1 = vpop.permute.xlu0 %296 }
  0xf8   : > { %v657_v6 = vpop.f32.mrb[0].mxu0  ;;  %v698_v7 = vpop.f32.mrb[0].mxu1 }
  0xf9   : > { %v658_v8 = vadd.f32 %v657_v6, %v1419_v1  ;;  %v659_v9 = vpop.f32.mrb[1].mxu0  ;;  %v699_v11 = vadd.f32 %v698_v7, %v1419_v1  ;;  %v700_v12 = vpop.f32.mrb[1].mxu1 }
  0xfa   : > { %v660_v10 = vadd.f32 %v659_v9, %v1419_v1  ;;  %v661_v13 = vpop.f32.mrb[2].mxu0  ;;  %v701_v14 = vadd.f32 %v700_v12, %v1419_v1  ;;  %v702_v15 = vpop.f32.mrb[2].mxu1 }
  0xfb   : > { %1218 = vtanh.f32 %v658_v8  ;;  %v662_v16 = vpop.f32.mrb[3].mxu0  ;;  %v703_v44 = vpop.f32.mrb[3].mxu1 }
  0xfc   : > { %1220 = vtanh.f32 %v660_v10 }
  0xfd   : > { %1222 = vtanh.f32 %v699_v11 }
  0xfe   : > { %1224 = vtanh.f32 %v701_v14 }
 0x105   : > { %v1219_v17 = vpop.eup %1218 }
 0x106   : > { %v1221_v18 = vpop.eup %1220 }
 0x107   : > { %v1223_v19 = vpop.eup %1222  ;;  %v983_v20 = vcombine.low %v1219_v17, %v1221_v18 }
 0x108   : > { %v1225_v21 = vpop.eup %1224  ;;  %v739_v22 = vpop.f32.mrb[4].mxu0 }
 0x109   : > { %999 = vst [vmem:[%s1429_s29] sm:$0x77] %v983_v20  ;;  %v984_v23 = vcombine.low %v1223_v19, %v1225_v21  ;;  %v740_v24 = vadd.f32 %v739_v22, %v1419_v1  ;;  %v780_v25 = vpop.f32.mrb[4].mxu1  ;;  %v741_v26 = vpop.f32.mrb[5].mxu0 }
 0x10a   : > { %v781_v27 = vadd.f32 %v780_v25, %v1419_v1  ;;  %v742_v28 = vadd.f32 %v741_v26, %v1419_v1  ;;  %v782_v29 = vpop.f32.mrb[5].mxu1  ;;  %v743_v30 = vpop.f32.mrb[6].mxu0 }
 0x10b   : > { %1000 = vst [vmem:[%s1429_s29 + $0x8] sm:$0x77] %v984_v23  ;;  %1226 = vtanh.f32 %v740_v24  ;;  %v783_v31 = vadd.f32 %v782_v29, %v1419_v1  ;;  %v784_v32 = vpop.f32.mrb[6].mxu1  ;;  %v744_v33 = vpop.f32.mrb[7].mxu0 }
 0x10c   : > { %1228 = vtanh.f32 %v781_v27  ;;  %v785_v34 = vpop.f32.mrb[7].mxu1 }
 0x10d   : > { %1230 = vtanh.f32 %v742_v28 }
 0x10e   : > { %1232 = vtanh.f32 %v783_v31 }
 0x115   : > { %v1227_v35 = vpop.eup %1226 }
 0x116   : > { %v1229_v36 = vpop.eup %1228 }
 0x117   : > { %v1231_v37 = vpop.eup %1230 }
 0x118   : > { %v1233_v38 = vpop.eup %1232  ;;  %v985_v39 = vcombine.low %v1227_v35, %v1231_v37  ;;  %v821_v40 = vpop.f32.mrb[8].mxu0 }
 0x119   : > { %v986_v41 = vcombine.low %v1229_v36, %v1233_v38  ;;  %v822_v42 = vadd.f32 %v821_v40, %v1419_v1  ;;  %v862_v43 = vpop.f32.mrb[8].mxu1  ;;  %v823_v45 = vpop.f32.mrb[9].mxu0 }
 0x11a   : > { %1001 = vst [vmem:[%s1429_s29 + $0x10] sm:$0x77] %v985_v39  ;;  %v863_v46 = vadd.f32 %v862_v43, %v1419_v1  ;;  %v824_v47 = vadd.f32 %v823_v45, %v1419_v1  ;;  %v864_v48 = vpop.f32.mrb[9].mxu1  ;;  %v825_v49 = vpop.f32.mrb[10].mxu0 }
 0x11b   : > { %1002 = vst [vmem:[%s1429_s29 + $0x18] sm:$0x77] %v986_v41  ;;  %1234 = vtanh.f32 %v822_v42  ;;  %v865_v50 = vadd.f32 %v864_v48, %v1419_v1  ;;  %v866_v51 = vpop.f32.mrb[10].mxu1  ;;  %v826_v52 = vpop.f32.mrb[11].mxu0 }
 0x11c   : > { %1236 = vtanh.f32 %v863_v46  ;;  %v867_v53 = vpop.f32.mrb[11].mxu1 }
 0x11d   : > { %1238 = vtanh.f32 %v824_v47 }
 0x11e   : > { %1240 = vtanh.f32 %v865_v50 }
 0x125   : > { %v1235_v54 = vpop.eup %1234 }
 0x126   : > { %v1237_v55 = vpop.eup %1236 }
 0x127   : > { %v1239_v56 = vpop.eup %1238 }
 0x128   : > { %v1241_v57 = vpop.eup %1240  ;;  %v987_v58 = vcombine.low %v1235_v54, %v1239_v56  ;;  %v903_v59 = vpop.f32.mrb[12].mxu0 }
 0x129   : > { %v988_v60 = vcombine.low %v1237_v55, %v1241_v57  ;;  %v904_v61 = vadd.f32 %v903_v59, %v1419_v1  ;;  %v944_v62 = vpop.f32.mrb[12].mxu1  ;;  %v905_v63 = vpop.f32.mrb[13].mxu0 }
 0x12a   : > { %1003 = vst [vmem:[%s1429_s29 + $0x20] sm:$0x77] %v987_v58  ;;  %v945_v0 = vadd.f32 %v944_v62, %v1419_v1  ;;  %v906_v2 = vadd.f32 %v905_v63, %v1419_v1  ;;  %v946_v3 = vpop.f32.mrb[13].mxu1  ;;  %v907_v4 = vpop.f32.mrb[14].mxu0 }
 0x12b   : > { %1004 = vst [vmem:[%s1429_s29 + $0x28] sm:$0x77] %v988_v60  ;;  %1242 = vtanh.f32 %v904_v61  ;;  %v947_v5 = vadd.f32 %v946_v3, %v1419_v1  ;;  %v948_v6 = vpop.f32.mrb[14].mxu1  ;;  %v908_v7 = vpop.f32.mrb[15].mxu0 }
 0x12c   : > { %1244 = vtanh.f32 %v945_v0  ;;  %v949_v8 = vpop.f32.mrb[15].mxu1 }
 0x12d   : > { %1246 = vtanh.f32 %v906_v2 }
 0x12e   : > { %1248 = vtanh.f32 %v947_v5 }
 0x135   : > { %v1243_v9 = vpop.eup %1242 }
 0x136   : > { %v1245_v10 = vpop.eup %1244 }
 0x137   : > { %v1247_v11 = vpop.eup %1246 }
 0x138   : > { %v1249_v12 = vpop.eup %1248  ;;  %v989_v13 = vcombine.low %v1243_v9, %v1247_v11 }
 0x139   : > { %v990_v14 = vcombine.low %v1245_v10, %v1249_v12 }
 0x13a   : > { %1005 = vst [vmem:[%s1429_s29 + $0x30] sm:$0x77] %v989_v13 }
 0x13b   : > { %1006 = vst [vmem:[%s1429_s29 + $0x38] sm:$0x77] %v990_v14 }
 0x13c PF: > { %s13_s14 = sadd.s32 1, %s1272_s14   ;;  %s1464_s12 = smov %s1268_s13 }
 0x13d   : > { %p10_p5 = scmp.ge.s32.totalorder %s13_s14, 6   ;;  %s1465_s13 = smov %s1467_s15 }
 0x13f   :  { %12 = sbr.rel (!%p10_p5) target bundleno = 2 (0x2), region = 65 }

</bundles_post_ra>
